<compile_context>
chip_gen: v5e
topology: v5e:2x2
jax: 0.10.0
libtpu: 0.0.40
codegen_flags: <defaults>
</compile_context>

<pallas_src>
import functools

import numpy as np
import jax
import jax.numpy as jnp
from jax import lax
from jax.experimental import pallas as pl
from jax.experimental.pallas import tpu as pltpu


# ---------------------------------------------------------------------------
# Kernel 1: fused Linear (+ optional PReLU pre/post activation)
#           slope is an SMEM scalar, rows tiled with a fixed block.
# ---------------------------------------------------------------------------
def _make_linear_kernel(pre: bool, post: bool):
    def kernel(a_ref, x_ref, w_ref, b_ref, o_ref):
        a = a_ref[0]                          # SMEM scalar PReLU slope
        x = x_ref[...]
        if pre:                               # PReLU before the matmul
            x = jnp.where(x >= 0, x, a * x)
        y = jnp.dot(x, w_ref[...], preferred_element_type=jnp.float32) + b_ref[...]
        if post:                              # PReLU after the matmul
            y = jnp.where(y >= 0, y, a * y)
        o_ref[...] = y
    return kernel


def linear_prelu(x, w, b, a, *, pre=False, post=False, bm=128):
    """y = [prelu]( [prelu](x) @ w + b ).  w is (K, Nout), b is (Nout,)."""
    M, K = x.shape
    _, N = w.shape
    Mp = -(-M // bm) * bm                     # pad rows to a multiple of bm
    if Mp != M:
        x = jnp.pad(x, ((0, Mp - M), (0, 0)))
    a_arr = jnp.reshape(jnp.asarray(a, jnp.float32), (1,))
    b2 = jnp.reshape(b, (1, N)).astype(jnp.float32)
    y = pl.pallas_call(
        _make_linear_kernel(pre, post),
        out_shape=jax.ShapeDtypeStruct((Mp, N), jnp.float32),
        grid=(Mp // bm,),
        in_specs=[
            pl.BlockSpec(memory_space=pltpu.MemorySpace.SMEM),   # PReLU slope
            pl.BlockSpec((bm, K), lambda i: (i, 0)),
            pl.BlockSpec((K, N), lambda i: (0, 0)),
            pl.BlockSpec((1, N), lambda i: (0, 0)),
        ],
        out_specs=pl.BlockSpec((bm, N), lambda i: (i, 0)),
        compiler_params=pltpu.CompilerParams(dimension_semantics=("parallel",)),
    )(a_arr, x.astype(jnp.float32), w.astype(jnp.float32), b2)
    return y[:M] if Mp != M else y


# ---------------------------------------------------------------------------
# Kernel 2: fused bidirectional LSTM + Linear(2H -> N) projection
#   gates_in = x @ [W_ih_f | W_ih_b] + [b_f | b_b] hoisted out of the loop,
#   fwd and bwd directions run in the same loop iteration,
#   projection done as one big matmul on the stored hidden states.
# ---------------------------------------------------------------------------
def _bilstm_proj_kernel(x_ref, wih_ref, whh_f_ref, whh_b_ref, b_ref,
                        wp_f_ref, wp_b_ref, bp_ref, o_ref,
                        gin_sc, hfs_sc, hbs_sc, hf_sc, cf_sc, hb_sc, cb_sc):
    T, tb, N = x_ref.shape
    H = whh_f_ref.shape[0]
    G = 4 * H

    # 1) hoisted input projection for BOTH directions (one MXU-friendly matmul)
    x2 = x_ref[...].reshape(T * tb, N)
    gin = jnp.dot(x2, wih_ref[...], preferred_element_type=jnp.float32) + b_ref[...]
    gin_sc[...] = gin.reshape(T, tb, 2 * G)

    # 2) fused fwd + bwd recurrence; only (tb,H)@(H,4H) on the serial path
    hf_sc[...] = jnp.zeros_like(hf_sc)
    cf_sc[...] = jnp.zeros_like(cf_sc)
    hb_sc[...] = jnp.zeros_like(hb_sc)
    cb_sc[...] = jnp.zeros_like(cb_sc)

    def cell(gates, c):
        i_g = jax.nn.sigmoid(gates[:, 0:H])
        f_g = jax.nn.sigmoid(gates[:, H:2 * H])
        g_g = jnp.tanh(gates[:, 2 * H:3 * H])
        o_g = jax.nn.sigmoid(gates[:, 3 * H:4 * H])
        c_new = f_g * c + i_g * g_g
        h_new = o_g * jnp.tanh(c_new)
        return h_new, c_new

    def step(k, carry):
        t_b = T - 1 - k
        gin_f = gin_sc[k][:, 0:G]
        gin_b = gin_sc[t_b][:, G:2 * G]
        gates_f = gin_f + jnp.dot(hf_sc[...], whh_f_ref[...],
                                  preferred_element_type=jnp.float32)
        gates_b = gin_b + jnp.dot(hb_sc[...], whh_b_ref[...],
                                  preferred_element_type=jnp.float32)
        h_f, c_f = cell(gates_f, cf_sc[...])
        h_b, c_b = cell(gates_b, cb_sc[...])
        hf_sc[...] = h_f
        cf_sc[...] = c_f
        hb_sc[...] = h_b
        cb_sc[...] = c_b
        hfs_sc[k] = h_f
        hbs_sc[t_b] = h_b
        return carry

    lax.fori_loop(0, T, step, 0)

    # 3) fused bidirectional projection: out = H_f@Wp_f + H_b@Wp_b + b_p
    hf_all = hfs_sc[...].reshape(T * tb, H)
    hb_all = hbs_sc[...].reshape(T * tb, H)
    proj = (jnp.dot(hf_all, wp_f_ref[...], preferred_element_type=jnp.float32)
            + jnp.dot(hb_all, wp_b_ref[...], preferred_element_type=jnp.float32)
            + bp_ref[...])
    o_ref[...] = proj.reshape(T, tb, N)


def single_rnn(x, p, tb=16):
    """SingleRNN: fused BiLSTM + Linear(2H -> N).  x: (Bseq, T, N) -> same shape.

    tb is a per-generation knob: tb = Bseq//2 keeps >=2 parallel blocks for the
    two TensorCores on v7x; tb = Bseq gives one big block on single-TC v5e/v6e.
    """
    Bseq, T, N = x.shape
    H = p['whh_f'].shape[0]
    if Bseq % tb != 0:
        tb = Bseq
    xt = jnp.transpose(x, (1, 0, 2)).astype(jnp.float32)          # (T, Bseq, N)
    wih = jnp.concatenate([p['wih_f'], p['wih_b']], axis=1)       # (N, 8H)
    bias = jnp.concatenate([p['b_f'], p['b_b']]).reshape(1, 8 * H)
    wp_f = p['proj_w'][:H]                                        # (H, N)
    wp_b = p['proj_w'][H:]                                        # (H, N)
    bp = p['proj_b'].reshape(1, N)
    out = pl.pallas_call(
        _bilstm_proj_kernel,
        out_shape=jax.ShapeDtypeStruct((T, Bseq, N), jnp.float32),
        grid=(Bseq // tb,),
        in_specs=[
            pl.BlockSpec((T, tb, N), lambda i: (0, i, 0)),
            pl.BlockSpec((N, 8 * H), lambda i: (0, 0)),
            pl.BlockSpec((H, 4 * H), lambda i: (0, 0)),
            pl.BlockSpec((H, 4 * H), lambda i: (0, 0)),
            pl.BlockSpec((1, 8 * H), lambda i: (0, 0)),
            pl.BlockSpec((H, N), lambda i: (0, 0)),
            pl.BlockSpec((H, N), lambda i: (0, 0)),
            pl.BlockSpec((1, N), lambda i: (0, 0)),
        ],
        out_specs=pl.BlockSpec((T, tb, N), lambda i: (0, i, 0)),
        scratch_shapes=[
            pltpu.VMEM((T, tb, 8 * H), jnp.float32),   # precomputed input gates
            pltpu.VMEM((T, tb, H), jnp.float32),       # fwd hidden states
            pltpu.VMEM((T, tb, H), jnp.float32),       # bwd hidden states
            pltpu.VMEM((tb, H), jnp.float32),          # h_f
            pltpu.VMEM((tb, H), jnp.float32),          # c_f
            pltpu.VMEM((tb, H), jnp.float32),          # h_b
            pltpu.VMEM((tb, H), jnp.float32),          # c_b
        ],
        compiler_params=pltpu.CompilerParams(dimension_semantics=("parallel",)),
    )(xt, wih, p['whh_f'], p['whh_b'], bias, wp_f, wp_b, bp)
    return jnp.transpose(out, (1, 0, 2))                          # (Bseq, T, N)


# ---------------------------------------------------------------------------
# Kernel 3: GroupNorm(1, C) + residual add on a lane-dense (Bn, C*S) slab
# ---------------------------------------------------------------------------
def _make_gn_add_kernel(eps):
    def kernel(res_ref, x_ref, g_ref, b_ref, o_ref):
        x = x_ref[...]                                            # (bn, C*S)
        mean = jnp.mean(x, axis=-1, keepdims=True)
        var = jnp.mean((x - mean) ** 2, axis=-1, keepdims=True)
        xn = (x - mean) * lax.rsqrt(var + eps)
        o_ref[...] = res_ref[...] + xn * g_ref[...] + b_ref[...]
    return kernel


def groupnorm_add(res, x, gamma, beta, eps=1e-8):
    """res + GroupNorm(1, C)(x); res, x: (Bn, C, S)."""
    Bn, C, S = x.shape
    CS = C * S
    res2 = res.reshape(Bn, CS).astype(jnp.float32)
    x2 = x.reshape(Bn, CS).astype(jnp.float32)
    g = jnp.repeat(gamma, S).reshape(1, CS).astype(jnp.float32)
    b = jnp.repeat(beta, S).reshape(1, CS).astype(jnp.float32)
    bn_blk = 8 if (Bn % 8 == 0) else Bn          # (8,128)-legal row blocking
    out = pl.pallas_call(
        _make_gn_add_kernel(eps),
        out_shape=jax.ShapeDtypeStruct((Bn, CS), jnp.float32),
        grid=(Bn // bn_blk,),
        in_specs=[
            pl.BlockSpec((bn_blk, CS), lambda i: (i, 0)),
            pl.BlockSpec((bn_blk, CS), lambda i: (i, 0)),
            pl.BlockSpec((1, CS), lambda i: (0, 0)),
            pl.BlockSpec((1, CS), lambda i: (0, 0)),
        ],
        out_specs=pl.BlockSpec((bn_blk, CS), lambda i: (i, 0)),
        compiler_params=pltpu.CompilerParams(dimension_semantics=("parallel",)),
    )(res2, x2, g, b)
    return out.reshape(Bn, C, S)


# ---------------------------------------------------------------------------
# Kernel 4: fully fused TAC block (transform -> mean -> average -> concat-linear)
#   channel-major layout (B, ch*S, N); concat replaced by split cc weights,
#   num_mic / PReLU slopes live in SMEM, intermediates stay in VMEM.
# ---------------------------------------------------------------------------
def _make_tac_kernel(use_all: bool, ch: int):
    def kernel(num_mic_ref, a_ref, x_ref, trw_ref, trb_ref, avw_ref, avb_ref,
               cct_ref, ccm_ref, ccb_ref, o_ref):
        bidx = pl.program_id(0)
        rows = x_ref.shape[1]                  # ch * S
        S = rows // ch
        H3 = trw_ref.shape[1]
        a_tr, a_av, a_cc = a_ref[0], a_ref[1], a_ref[2]

        # transform: Linear(N -> 3H) + PReLU on all (ch*S) rows at once
        x = x_ref[...].reshape(rows, x_ref.shape[2])
        t = jnp.dot(x, trw_ref[...], preferred_element_type=jnp.float32) + trb_ref[...]
        t = jnp.where(t >= 0, t, a_tr * t)                        # (ch*S, 3H)

        # channel mean per (b, spatial) without reshapes: sum static S-row slabs
        if use_all:
            acc = t[0:S]
            for c in range(1, ch):
                acc = acc + t[c * S:(c + 1) * S]
            m = acc * jnp.float32(1.0 / ch)
        else:
            nm = num_mic_ref[bidx]
            acc = jnp.zeros((S, H3), jnp.float32)
            for c in range(ch):
                wgt = jnp.where(c < nm, jnp.float32(1.0), jnp.float32(0.0))
                acc = acc + wgt * t[c * S:(c + 1) * S]
            m = acc / nm.astype(jnp.float32)

        # average: Linear(3H -> 3H) + PReLU on the per-(b, spatial) mean
        m = jnp.dot(m, avw_ref[...], preferred_element_type=jnp.float32) + avb_ref[...]
        m = jnp.where(m >= 0, m, a_av * m)                        # (S, 3H)

        # concat-free ch_concat: cat([t, mean]) @ W  ==  t @ W_top + mean @ W_bot
        y_t = jnp.dot(t, cct_ref[...], preferred_element_type=jnp.float32)      # (ch*S, N)
        y_m = jnp.dot(m, ccm_ref[...], preferred_element_type=jnp.float32) + ccb_ref[...]
        for c in range(ch):
            yc = y_t[c * S:(c + 1) * S] + y_m
            yc = jnp.where(yc >= 0, yc, a_cc * yc)
            o_ref[:, c * S:(c + 1) * S, :] = yc.reshape(1, S, yc.shape[-1])
    return kernel


def tac_block(ch_in, num_mic, lp, use_all, ch):
    """ch_in: (B, ch*S, N) channel-major rows -> (B, ch*S, N)."""
    B, SC, N = ch_in.shape
    H3 = lp['tr_w'].shape[1]
    slopes = jnp.stack([lp['tr_a'], lp['av_a'], lp['cc_a']]).astype(jnp.float32)
    cc_top = lp['cc_w'][:H3]                   # acts on the transformed channels
    cc_bot = lp['cc_w'][H3:]                   # acts on the averaged branch
    return pl.pallas_call(
        _make_tac_kernel(use_all, ch),
        out_shape=jax.ShapeDtypeStruct((B, SC, N), jnp.float32),
        grid=(B,),
        in_specs=[
            pl.BlockSpec(memory_space=pltpu.MemorySpace.SMEM),    # num_mic (B,)
            pl.BlockSpec(memory_space=pltpu.MemorySpace.SMEM),    # PReLU slopes (3,)
            pl.BlockSpec((1, SC, N), lambda b: (b, 0, 0)),
            pl.BlockSpec((N, H3), lambda b: (0, 0)),
            pl.BlockSpec((1, H3), lambda b: (0, 0)),
            pl.BlockSpec((H3, H3), lambda b: (0, 0)),
            pl.BlockSpec((1, H3), lambda b: (0, 0)),
            pl.BlockSpec((H3, N), lambda b: (0, 0)),
            pl.BlockSpec((H3, N), lambda b: (0, 0)),
            pl.BlockSpec((1, N), lambda b: (0, 0)),
        ],
        out_specs=pl.BlockSpec((1, SC, N), lambda b: (b, 0, 0)),
        compiler_params=pltpu.CompilerParams(dimension_semantics=("parallel",)),
    )(num_mic.astype(jnp.int32), slopes, ch_in.astype(jnp.float32),
      lp['tr_w'], lp['tr_b'].reshape(1, H3),
      lp['av_w'], lp['av_b'].reshape(1, H3),
      cc_top, cc_bot, lp['cc_b'].reshape(1, N))


# ---------------------------------------------------------------------------
# Parameter init (deterministic, synthetic)
# ---------------------------------------------------------------------------
def _normal(key, shape, scale=0.1):
    return scale * jax.random.normal(key, shape, jnp.float32)


def init_lstm(key, in_dim, hid):
    ks = jax.random.split(key, 6)
    return dict(
        wih_f=_normal(ks[0], (in_dim, 4 * hid)),   # (= W_ih^T), gate order i,f,g,o
        whh_f=_normal(ks[1], (hid, 4 * hid)),
        b_f=_normal(ks[2], (4 * hid,)),            # b_ih + b_hh combined
        wih_b=_normal(ks[3], (in_dim, 4 * hid)),
        whh_b=_normal(ks[4], (hid, 4 * hid)),
        b_b=_normal(ks[5], (4 * hid,)),
    )


def init_single_rnn(key, in_dim, hid):
    k1, k2, k3 = jax.random.split(key, 3)
    p = init_lstm(k1, in_dim, hid)
    p['proj_w'] = _normal(k2, (2 * hid, in_dim))   # rows [:H]=fwd, [H:]=bwd
    p['proj_b'] = _normal(k3, (in_dim,))
    return p


def init_layer(key, N, H):
    ks = jax.random.split(key, 8)
    return dict(
        row=init_single_rnn(ks[0], N, H),
        col=init_single_rnn(ks[1], N, H),
        tr_w=_normal(ks[2], (N, 3 * H)),
        tr_b=_normal(jax.random.fold_in(ks[2], 1), (3 * H,)),
        tr_a=jnp.float32(0.25),
        av_w=_normal(ks[3], (3 * H, 3 * H)),
        av_b=_normal(jax.random.fold_in(ks[3], 1), (3 * H,)),
        av_a=jnp.float32(0.25),
        cc_w=_normal(ks[4], (6 * H, N)),
        cc_b=_normal(jax.random.fold_in(ks[4], 1), (N,)),
        cc_a=jnp.float32(0.25),
        row_norm_g=jnp.ones((N,), jnp.float32), row_norm_b=jnp.zeros((N,), jnp.float32),
        col_norm_g=jnp.ones((N,), jnp.float32), col_norm_b=jnp.zeros((N,), jnp.float32),
        ch_norm_g=jnp.ones((N,), jnp.float32), ch_norm_b=jnp.zeros((N,), jnp.float32),
    )


def init_params(key, input_size, hidden_size, output_size, num_layers):
    ks = jax.random.split(key, num_layers + 2)
    return dict(
        layers=[init_layer(ks[i], input_size, hidden_size) for i in range(num_layers)],
        out_a=jnp.float32(0.25),                            # nn.PReLU() default
        out_w=_normal(ks[-2], (input_size, output_size)),   # Conv2d 1x1 as matmul
        out_b=_normal(ks[-1], (output_size,)),
    )


# ---------------------------------------------------------------------------
# DPRNN_TAC forward (fully jittable; all-mic vs masked mean is a static flag)
# ---------------------------------------------------------------------------
def dprnn_tac_forward(params, x, num_mic, *, use_all_mics=True):
    B, ch, N, d1, d2 = x.shape
    S = d1 * d2
    out = x.reshape(B * ch, N, d1, d2).astype(jnp.float32)

    for lp in params['layers']:
        # ----- row RNN (sequences along dim1), fused BiLSTM+proj kernel -----
        row_in = jnp.transpose(out, (0, 3, 2, 1)).reshape(B * ch * d2, d1, N)
        row_out = single_rnn(row_in, lp['row'])
        row_out = jnp.transpose(row_out.reshape(B * ch, d2, d1, N), (0, 3, 2, 1))
        out = groupnorm_add(out.reshape(B * ch, N, S),
                            row_out.reshape(B * ch, N, S),
                            lp['row_norm_g'], lp['row_norm_b']
                            ).reshape(B * ch, N, d1, d2)

        # ----- column RNN (sequences along dim2) -----
        col_in = jnp.transpose(out, (0, 2, 3, 1)).reshape(B * ch * d1, d2, N)
        col_out = single_rnn(col_in, lp['col'])
        col_out = jnp.transpose(col_out.reshape(B * ch, d1, d2, N), (0, 3, 1, 2))
        out = groupnorm_add(out.reshape(B * ch, N, S),
                            col_out.reshape(B * ch, N, S),
                            lp['col_norm_g'], lp['col_norm_b']
                            ).reshape(B * ch, N, d1, d2)

        # ----- TAC: one fused kernel (transform + mean + average + concat) -----
        ch_in = jnp.transpose(out.reshape(B, ch, N, S), (0, 1, 3, 2)).reshape(B, ch * S, N)
        ch_fin = tac_block(ch_in, num_mic, lp, use_all_mics, ch)
        ch_fin = jnp.transpose(ch_fin.reshape(B, ch, S, N), (0, 1, 3, 2)).reshape(B * ch, N, S)
        out = groupnorm_add(out.reshape(B * ch, N, S), ch_fin,
                            lp['ch_norm_g'], lp['ch_norm_b']
                            ).reshape(B * ch, N, d1, d2)

    # ----- output head: PReLU + Conv2d(N, output_size, 1) as fused matmul -----
    xl = jnp.transpose(out, (0, 2, 3, 1)).reshape(-1, N)          # (B*ch*d1*d2, N)
    y = linear_prelu(xl, params['out_w'], params['out_b'], params['out_a'], pre=True)
    out_size = y.shape[-1]
    y = jnp.transpose(y.reshape(B * ch, d1, d2, out_size), (0, 3, 1, 2))
    return y                                                      # (B*ch, output_size, d1, d2)


# ---------------------------------------------------------------------------
if __name__ == "__main__":
    B, CH, N, H, OUT, D1, D2 = 2, 2, 16, 16, 16, 8, 8
    key = jax.random.PRNGKey(0)
    kx, kp = jax.random.split(key)
    x = jax.random.normal(kx, (B, CH, N, D1, D2), jnp.float32)

    # PyTorch branches at runtime on num_mic.max()==0; here the branch is
    # resolved host-side (static flag) so the whole forward stays in one jit.
    # TODO(synk): a traced runtime num_mic.max()==0 branch has no jit-friendly
    # equivalent; both paths are implemented, selection is static.
    num_mic_np = np.zeros((B,), np.int32)
    use_all = int(num_mic_np.max()) == 0
    num_mic = jnp.asarray(num_mic_np)

    params = init_params(kp, input_size=N, hidden_size=H, output_size=OUT, num_layers=1)

    fwd = jax.jit(functools.partial(dprnn_tac_forward, use_all_mics=use_all))
    y = fwd(params, x, num_mic)
    y = jax.block_until_ready(y)
    assert y.shape == (B * CH, OUT, D1, D2), y.shape
    assert bool(jnp.all(jnp.isfinite(y)))
    print("KERNEL_OK")
</pallas_src>

<mosaic_0001>
module attributes {stable_mosaic.version = 11 : i64} {
  func.func @_bilstm_proj_kernel(%arg0: i32, %arg1: memref<8x16x16xf32, #tpu.memory_space<vmem>>, %arg2: memref<16x128xf32, #tpu.memory_space<vmem>>, %arg3: memref<16x64xf32, #tpu.memory_space<vmem>>, %arg4: memref<16x64xf32, #tpu.memory_space<vmem>>, %arg5: memref<1x128xf32, #tpu.memory_space<vmem>>, %arg6: memref<16x16xf32, #tpu.memory_space<vmem>>, %arg7: memref<16x16xf32, #tpu.memory_space<vmem>>, %arg8: memref<1x16xf32, #tpu.memory_space<vmem>>, %arg9: memref<8x16x16xf32, #tpu.memory_space<vmem>>, %arg10: memref<8x16x128xf32, #tpu.memory_space<vmem>>, %arg11: memref<8x16x16xf32, #tpu.memory_space<vmem>>, %arg12: memref<8x16x16xf32, #tpu.memory_space<vmem>>, %arg13: memref<16x16xf32, #tpu.memory_space<vmem>>, %arg14: memref<16x16xf32, #tpu.memory_space<vmem>>, %arg15: memref<16x16xf32, #tpu.memory_space<vmem>>, %arg16: memref<16x16xf32, #tpu.memory_space<vmem>>) attributes {dimension_semantics = [#tpu.dimension_semantics<parallel>], iteration_bounds = array<i64: 2>, scalar_prefetch = 0 : i64, scratch_operands = 7 : i64, tpu.core_type = #tpu.core_type<tc>, window_params = [{transform_indices = @transform_0, window_bounds = array<i64: 8, 16, 16>}, {pipeline_mode = #tpu.pipeline_mode<synchronous>, transform_indices = @transform_1, window_bounds = array<i64: 16, 128>}, {pipeline_mode = #tpu.pipeline_mode<synchronous>, transform_indices = @transform_2, window_bounds = array<i64: 16, 64>}, {pipeline_mode = #tpu.pipeline_mode<synchronous>, transform_indices = @transform_3, window_bounds = array<i64: 16, 64>}, {pipeline_mode = #tpu.pipeline_mode<synchronous>, transform_indices = @transform_4, window_bounds = array<i64: 1, 128>}, {pipeline_mode = #tpu.pipeline_mode<synchronous>, transform_indices = @transform_5, window_bounds = array<i64: 16, 16>}, {pipeline_mode = #tpu.pipeline_mode<synchronous>, transform_indices = @transform_6, window_bounds = array<i64: 16, 16>}, {pipeline_mode = #tpu.pipeline_mode<synchronous>, transform_indices = @transform_7, window_bounds = array<i64: 1, 16>}, {transform_indices = @transform_8, window_bounds = array<i64: 8, 16, 16>}]} {
    %c0 = arith.constant 0 : index
    %c0_0 = arith.constant 0 : index
    %c0_1 = arith.constant 0 : index
    %0 = vector.load %arg1[%c0, %c0_0, %c0_1] : memref<8x16x16xf32, #tpu.memory_space<vmem>>, vector<8x16x16xf32>
    %1 = vector.shape_cast %0 : vector<8x16x16xf32> to vector<128x16xf32>
    %c0_2 = arith.constant 0 : index
    %c0_3 = arith.constant 0 : index
    %2 = vector.load %arg2[%c0_2, %c0_3] : memref<16x128xf32, #tpu.memory_space<vmem>>, vector<16x128xf32>
    %cst = arith.constant dense<0.000000e+00> : vector<128x128xf32>
    %3 = tpu.matmul %1, %2, %cst {dimension_numbers = #tpu.dot_dimension_numbers<[1], [0], [0], [1], [0, 0, 1, 1], [], []>} : vector<128x16xf32>, vector<16x128xf32>, vector<128x128xf32> -> vector<128x128xf32>
    %c0_4 = arith.constant 0 : index
    %c0_5 = arith.constant 0 : index
    %4 = vector.load %arg5[%c0_4, %c0_5] : memref<1x128xf32, #tpu.memory_space<vmem>>, vector<1x128xf32>
    %5 = vector.broadcast %4 : vector<1x128xf32> to vector<128x128xf32>
    %6 = arith.addf %3, %5 : vector<128x128xf32>
    %7 = vector.shape_cast %6 : vector<128x128xf32> to vector<8x16x128xf32>
    %c0_6 = arith.constant 0 : index
    %c0_7 = arith.constant 0 : index
    %c0_8 = arith.constant 0 : index
    %8 = vector.load %arg10[%c0_6, %c0_7, %c0_8] : memref<8x16x128xf32, #tpu.memory_space<vmem>>, vector<8x16x128xf32>
    tpu.vector_store %arg10[%c0_6, %c0_7, %c0_8], %7 {strides = array<i32>} : memref<8x16x128xf32, #tpu.memory_space<vmem>>, vector<8x16x128xf32>,
    %cst_9 = arith.constant 0.000000e+00 : f32
    %9 = vector.broadcast %cst_9 : f32 to vector<16x16xf32>
    %c0_10 = arith.constant 0 : index
    %c0_11 = arith.constant 0 : index
    %10 = vector.load %arg13[%c0_10, %c0_11] : memref<16x16xf32, #tpu.memory_space<vmem>>, vector<16x16xf32>
    tpu.vector_store %arg13[%c0_10, %c0_11], %9 {strides = array<i32>} : memref<16x16xf32, #tpu.memory_space<vmem>>, vector<16x16xf32>,
    %cst_12 = arith.constant 0.000000e+00 : f32
    %11 = vector.broadcast %cst_12 : f32 to vector<16x16xf32>
    %c0_13 = arith.constant 0 : index
    %c0_14 = arith.constant 0 : index
    %12 = vector.load %arg14[%c0_13, %c0_14] : memref<16x16xf32, #tpu.memory_space<vmem>>, vector<16x16xf32>
    tpu.vector_store %arg14[%c0_13, %c0_14], %11 {strides = array<i32>} : memref<16x16xf32, #tpu.memory_space<vmem>>, vector<16x16xf32>,
    %cst_15 = arith.constant 0.000000e+00 : f32
    %13 = vector.broadcast %cst_15 : f32 to vector<16x16xf32>
    %c0_16 = arith.constant 0 : index
    %c0_17 = arith.constant 0 : index
    %14 = vector.load %arg15[%c0_16, %c0_17] : memref<16x16xf32, #tpu.memory_space<vmem>>, vector<16x16xf32>
    tpu.vector_store %arg15[%c0_16, %c0_17], %13 {strides = array<i32>} : memref<16x16xf32, #tpu.memory_space<vmem>>, vector<16x16xf32>,
    %cst_18 = arith.constant 0.000000e+00 : f32
    %15 = vector.broadcast %cst_18 : f32 to vector<16x16xf32>
    %c0_19 = arith.constant 0 : index
    %c0_20 = arith.constant 0 : index
    %16 = vector.load %arg16[%c0_19, %c0_20] : memref<16x16xf32, #tpu.memory_space<vmem>>, vector<16x16xf32>
    tpu.vector_store %arg16[%c0_19, %c0_20], %15 {strides = array<i32>} : memref<16x16xf32, #tpu.memory_space<vmem>>, vector<16x16xf32>,
    %c0_i32 = arith.constant 0 : i32
    %c8_i32 = arith.constant 8 : i32
    %17 = arith.addi %c0_i32, %c8_i32 : i32
    %c1_i32 = arith.constant 1 : i32
    scf.for %arg17 = %c0_i32 to %17 step %c1_i32  : i32 {
      %c7_i32 = arith.constant 7 : i32
      %32 = arith.subi %c7_i32, %arg17 : i32
      %33 = arith.index_cast %arg17 : i32 to index
      %c0_39 = arith.constant 0 : index
      %c0_40 = arith.constant 0 : index
      %34 = vector.load %arg10[%33, %c0_39, %c0_40] : memref<8x16x128xf32, #tpu.memory_space<vmem>>, vector<1x16x128xf32>
      %35 = vector.shape_cast %34 : vector<1x16x128xf32> to vector<16x128xf32>
      %36 = vector.extract_strided_slice %35 {offsets = [0, 0], sizes = [16, 64], strides = [1, 1]} : vector<16x128xf32> to vector<16x64xf32>
      %37 = arith.index_cast %32 : i32 to index
      %c0_41 = arith.constant 0 : index
      %c0_42 = arith.constant 0 : index
      %38 = vector.load %arg10[%37, %c0_41, %c0_42] : memref<8x16x128xf32, #tpu.memory_space<vmem>>, vector<1x16x128xf32>
      %39 = vector.shape_cast %38 : vector<1x16x128xf32> to vector<16x128xf32>
      %40 = vector.extract_strided_slice %39 {offsets = [0, 64], sizes = [16, 64], strides = [1, 1]} : vector<16x128xf32> to vector<16x64xf32>
      %c0_43 = arith.constant 0 : index
      %c0_44 = arith.constant 0 : index
      %41 = vector.load %arg13[%c0_43, %c0_44] : memref<16x16xf32, #tpu.memory_space<vmem>>, vector<16x16xf32>
      %c0_45 = arith.constant 0 : index
      %c0_46 = arith.constant 0 : index
      %42 = vector.load %arg3[%c0_45, %c0_46] : memref<16x64xf32, #tpu.memory_space<vmem>>, vector<16x64xf32>
      %cst_47 = arith.constant dense<0.000000e+00> : vector<16x64xf32>
      %43 = tpu.matmul %41, %42, %cst_47 {dimension_numbers = #tpu.dot_dimension_numbers<[1], [0], [0], [1], [0, 0, 1, 1], [], []>} : vector<16x16xf32>, vector<16x64xf32>, vector<16x64xf32> -> vector<16x64xf32>
      %44 = arith.addf %36, %43 : vector<16x64xf32>
      %c0_48 = arith.constant 0 : index
      %c0_49 = arith.constant 0 : index
      %45 = vector.load %arg15[%c0_48, %c0_49] : memref<16x16xf32, #tpu.memory_space<vmem>>, vector<16x16xf32>
      %c0_50 = arith.constant 0 : index
      %c0_51 = arith.constant 0 : index
      %46 = vector.load %arg4[%c0_50, %c0_51] : memref<16x64xf32, #tpu.memory_space<vmem>>, vector<16x64xf32>
      %cst_52 = arith.constant dense<0.000000e+00> : vector<16x64xf32>
      %47 = tpu.matmul %45, %46, %cst_52 {dimension_numbers = #tpu.dot_dimension_numbers<[1], [0], [0], [1], [0, 0, 1, 1], [], []>} : vector<16x16xf32>, vector<16x64xf32>, vector<16x64xf32> -> vector<16x64xf32>
      %48 = arith.addf %40, %47 : vector<16x64xf32>
      %c0_53 = arith.constant 0 : index
      %c0_54 = arith.constant 0 : index
      %49 = vector.load %arg14[%c0_53, %c0_54] : memref<16x16xf32, #tpu.memory_space<vmem>>, vector<16x16xf32>
      %50 = vector.extract_strided_slice %44 {offsets = [0, 0], sizes = [16, 16], strides = [1, 1]} : vector<16x64xf32> to vector<16x16xf32>
      %51 = arith.negf %50 : vector<16x16xf32>
      %52 = math.exp %51 : vector<16x16xf32>
      %cst_55 = arith.constant 1.000000e+00 : f32
      %53 = vector.broadcast %cst_55 : f32 to vector<16x16xf32>
      %54 = arith.addf %53, %52 : vector<16x16xf32>
      %55 = arith.divf %53, %54 : vector<16x16xf32>
      %56 = vector.extract_strided_slice %44 {offsets = [0, 16], sizes = [16, 16], strides = [1, 1]} : vector<16x64xf32> to vector<16x16xf32>
      %57 = arith.negf %56 : vector<16x16xf32>
      %58 = math.exp %57 : vector<16x16xf32>
      %cst_56 = arith.constant 1.000000e+00 : f32
      %59 = vector.broadcast %cst_56 : f32 to vector<16x16xf32>
      %60 = arith.addf %59, %58 : vector<16x16xf32>
      %61 = arith.divf %59, %60 : vector<16x16xf32>
      %62 = vector.extract_strided_slice %44 {offsets = [0, 32], sizes = [16, 16], strides = [1, 1]} : vector<16x64xf32> to vector<16x16xf32>
      %63 = math.tanh %62 : vector<16x16xf32>
      %64 = vector.extract_strided_slice %44 {offsets = [0, 48], sizes = [16, 16], strides = [1, 1]} : vector<16x64xf32> to vector<16x16xf32>
      %65 = arith.negf %64 : vector<16x16xf32>
      %66 = math.exp %65 : vector<16x16xf32>
      %cst_57 = arith.constant 1.000000e+00 : f32
      %67 = vector.broadcast %cst_57 : f32 to vector<16x16xf32>
      %68 = arith.addf %67, %66 : vector<16x16xf32>
      %69 = arith.divf %67, %68 : vector<16x16xf32>
      %70 = arith.mulf %61, %49 : vector<16x16xf32>
      %71 = arith.mulf %55, %63 : vector<16x16xf32>
      %72 = arith.addf %70, %71 : vector<16x16xf32>
      %73 = math.tanh %72 : vector<16x16xf32>
      %74 = arith.mulf %69, %73 : vector<16x16xf32>
      %c0_58 = arith.constant 0 : index
      %c0_59 = arith.constant 0 : index
      %75 = vector.load %arg16[%c0_58, %c0_59] : memref<16x16xf32, #tpu.memory_space<vmem>>, vector<16x16xf32>
      %76 = vector.extract_strided_slice %48 {offsets = [0, 0], sizes = [16, 16], strides = [1, 1]} : vector<16x64xf32> to vector<16x16xf32>
      %77 = arith.negf %76 : vector<16x16xf32>
      %78 = math.exp %77 : vector<16x16xf32>
      %cst_60 = arith.constant 1.000000e+00 : f32
      %79 = vector.broadcast %cst_60 : f32 to vector<16x16xf32>
      %80 = arith.addf %79, %78 : vector<16x16xf32>
      %81 = arith.divf %79, %80 : vector<16x16xf32>
      %82 = vector.extract_strided_slice %48 {offsets = [0, 16], sizes = [16, 16], strides = [1, 1]} : vector<16x64xf32> to vector<16x16xf32>
      %83 = arith.negf %82 : vector<16x16xf32>
      %84 = math.exp %83 : vector<16x16xf32>
      %cst_61 = arith.constant 1.000000e+00 : f32
      %85 = vector.broadcast %cst_61 : f32 to vector<16x16xf32>
      %86 = arith.addf %85, %84 : vector<16x16xf32>
      %87 = arith.divf %85, %86 : vector<16x16xf32>
      %88 = vector.extract_strided_slice %48 {offsets = [0, 32], sizes = [16, 16], strides = [1, 1]} : vector<16x64xf32> to vector<16x16xf32>
      %89 = math.tanh %88 : vector<16x16xf32>
      %90 = vector.extract_strided_slice %48 {offsets = [0, 48], sizes = [16, 16], strides = [1, 1]} : vector<16x64xf32> to vector<16x16xf32>
      %91 = arith.negf %90 : vector<16x16xf32>
      %92 = math.exp %91 : vector<16x16xf32>
      %cst_62 = arith.constant 1.000000e+00 : f32
      %93 = vector.broadcast %cst_62 : f32 to vector<16x16xf32>
      %94 = arith.addf %93, %92 : vector<16x16xf32>
      %95 = arith.divf %93, %94 : vector<16x16xf32>
      %96 = arith.mulf %87, %75 : vector<16x16xf32>
      %97 = arith.mulf %81, %89 : vector<16x16xf32>
      %98 = arith.addf %96, %97 : vector<16x16xf32>
      %99 = math.tanh %98 : vector<16x16xf32>
      %100 = arith.mulf %95, %99 : vector<16x16xf32>
      %c0_63 = arith.constant 0 : index
      %c0_64 = arith.constant 0 : index
      %101 = vector.load %arg13[%c0_63, %c0_64] : memref<16x16xf32, #tpu.memory_space<vmem>>, vector<16x16xf32>
      tpu.vector_store %arg13[%c0_63, %c0_64], %74 {strides = array<i32>} : memref<16x16xf32, #tpu.memory_space<vmem>>, vector<16x16xf32>,
      %c0_65 = arith.constant 0 : index
      %c0_66 = arith.constant 0 : index
      %102 = vector.load %arg14[%c0_65, %c0_66] : memref<16x16xf32, #tpu.memory_space<vmem>>, vector<16x16xf32>
      tpu.vector_store %arg14[%c0_65, %c0_66], %72 {strides = array<i32>} : memref<16x16xf32, #tpu.memory_space<vmem>>, vector<16x16xf32>,
      %c0_67 = arith.constant 0 : index
      %c0_68 = arith.constant 0 : index
      %103 = vector.load %arg15[%c0_67, %c0_68] : memref<16x16xf32, #tpu.memory_space<vmem>>, vector<16x16xf32>
      tpu.vector_store %arg15[%c0_67, %c0_68], %100 {strides = array<i32>} : memref<16x16xf32, #tpu.memory_space<vmem>>, vector<16x16xf32>,
      %c0_69 = arith.constant 0 : index
      %c0_70 = arith.constant 0 : index
      %104 = vector.load %arg16[%c0_69, %c0_70] : memref<16x16xf32, #tpu.memory_space<vmem>>, vector<16x16xf32>
      tpu.vector_store %arg16[%c0_69, %c0_70], %98 {strides = array<i32>} : memref<16x16xf32, #tpu.memory_space<vmem>>, vector<16x16xf32>,
      %105 = arith.index_cast %arg17 : i32 to index
      %c0_71 = arith.constant 0 : index
      %c0_72 = arith.constant 0 : index
      %106 = vector.load %arg11[%105, %c0_71, %c0_72] : memref<8x16x16xf32, #tpu.memory_space<vmem>>, vector<1x16x16xf32>
      %107 = vector.shape_cast %106 : vector<1x16x16xf32> to vector<16x16xf32>
      %108 = vector.shape_cast %74 : vector<16x16xf32> to vector<1x16x16xf32>
      tpu.vector_store %arg11[%105, %c0_71, %c0_72], %108 {strides = array<i32>} : memref<8x16x16xf32, #tpu.memory_space<vmem>>, vector<1x16x16xf32>,
      %109 = arith.index_cast %32 : i32 to index
      %c0_73 = arith.constant 0 : index
      %c0_74 = arith.constant 0 : index
      %110 = vector.load %arg12[%109, %c0_73, %c0_74] : memref<8x16x16xf32, #tpu.memory_space<vmem>>, vector<1x16x16xf32>
      %111 = vector.shape_cast %110 : vector<1x16x16xf32> to vector<16x16xf32>
      %112 = vector.shape_cast %100 : vector<16x16xf32> to vector<1x16x16xf32>
      tpu.vector_store %arg12[%109, %c0_73, %c0_74], %112 {strides = array<i32>} : memref<8x16x16xf32, #tpu.memory_space<vmem>>, vector<1x16x16xf32>,
    }
    %c8_i32_21 = arith.constant 8 : i32
    %c0_22 = arith.constant 0 : index
    %c0_23 = arith.constant 0 : index
    %c0_24 = arith.constant 0 : index
    %18 = vector.load %arg11[%c0_22, %c0_23, %c0_24] : memref<8x16x16xf32, #tpu.memory_space<vmem>>, vector<8x16x16xf32>
    %19 = vector.shape_cast %18 : vector<8x16x16xf32> to vector<128x16xf32>
    %c0_25 = arith.constant 0 : index
    %c0_26 = arith.constant 0 : index
    %c0_27 = arith.constant 0 : index
    %20 = vector.load %arg12[%c0_25, %c0_26, %c0_27] : memref<8x16x16xf32, #tpu.memory_space<vmem>>, vector<8x16x16xf32>
    %21 = vector.shape_cast %20 : vector<8x16x16xf32> to vector<128x16xf32>
    %c0_28 = arith.constant 0 : index
    %c0_29 = arith.constant 0 : index
    %22 = vector.load %arg6[%c0_28, %c0_29] : memref<16x16xf32, #tpu.memory_space<vmem>>, vector<16x16xf32>
    %cst_30 = arith.constant dense<0.000000e+00> : vector<128x16xf32>
    %23 = tpu.matmul %19, %22, %cst_30 {dimension_numbers = #tpu.dot_dimension_numbers<[1], [0], [0], [1], [0, 0, 1, 1], [], []>} : vector<128x16xf32>, vector<16x16xf32>, vector<128x16xf32> -> vector<128x16xf32>
    %c0_31 = arith.constant 0 : index
    %c0_32 = arith.constant 0 : index
    %24 = vector.load %arg7[%c0_31, %c0_32] : memref<16x16xf32, #tpu.memory_space<vmem>>, vector<16x16xf32>
    %cst_33 = arith.constant dense<0.000000e+00> : vector<128x16xf32>
    %25 = tpu.matmul %21, %24, %cst_33 {dimension_numbers = #tpu.dot_dimension_numbers<[1], [0], [0], [1], [0, 0, 1, 1], [], []>} : vector<128x16xf32>, vector<16x16xf32>, vector<128x16xf32> -> vector<128x16xf32>
    %26 = arith.addf %23, %25 : vector<128x16xf32>
    %c0_34 = arith.constant 0 : index
    %c0_35 = arith.constant 0 : index
    %27 = vector.load %arg8[%c0_34, %c0_35] : memref<1x16xf32, #tpu.memory_space<vmem>>, vector<1x16xf32>
    %28 = vector.broadcast %27 : vector<1x16xf32> to vector<128x16xf32>
    %29 = arith.addf %26, %28 : vector<128x16xf32>
    %30 = vector.shape_cast %29 : vector<128x16xf32> to vector<8x16x16xf32>
    %c0_36 = arith.constant 0 : index
    %c0_37 = arith.constant 0 : index
    %c0_38 = arith.constant 0 : index
    %31 = vector.load %arg9[%c0_36, %c0_37, %c0_38] : memref<8x16x16xf32, #tpu.memory_space<vmem>>, vector<8x16x16xf32>
    tpu.vector_store %arg9[%c0_36, %c0_37, %c0_38], %30 {strides = array<i32>} : memref<8x16x16xf32, #tpu.memory_space<vmem>>, vector<8x16x16xf32>,
    return
  }
  func.func @transform_0(%arg0: i32) -> (i32, i32, i32) {
    %c0_i32 = arith.constant 0 : i32
    %c0_i32_0 = arith.constant 0 : i32
    %c0_i32_1 = arith.constant 0 : i32
    return %c0_i32, %arg0, %c0_i32_0 : i32, i32, i32
  }
  func.func @transform_1(%arg0: i32) -> (i32, i32) {
    %c0_i32 = arith.constant 0 : i32
    %c0_i32_0 = arith.constant 0 : i32
    %c0_i32_1 = arith.constant 0 : i32
    return %c0_i32, %c0_i32_0 : i32, i32
  }
  func.func @transform_2(%arg0: i32) -> (i32, i32) {
    %c0_i32 = arith.constant 0 : i32
    %c0_i32_0 = arith.constant 0 : i32
    %c0_i32_1 = arith.constant 0 : i32
    return %c0_i32, %c0_i32_0 : i32, i32
  }
  func.func @transform_3(%arg0: i32) -> (i32, i32) {
    %c0_i32 = arith.constant 0 : i32
    %c0_i32_0 = arith.constant 0 : i32
    %c0_i32_1 = arith.constant 0 : i32
    return %c0_i32, %c0_i32_0 : i32, i32
  }
  func.func @transform_4(%arg0: i32) -> (i32, i32) {
    %c0_i32 = arith.constant 0 : i32
    %c0_i32_0 = arith.constant 0 : i32
    %c0_i32_1 = arith.constant 0 : i32
    return %c0_i32, %c0_i32_0 : i32, i32
  }
  func.func @transform_5(%arg0: i32) -> (i32, i32) {
    %c0_i32 = arith.constant 0 : i32
    %c0_i32_0 = arith.constant 0 : i32
    %c0_i32_1 = arith.constant 0 : i32
    return %c0_i32, %c0_i32_0 : i32, i32
  }
  func.func @transform_6(%arg0: i32) -> (i32, i32) {
    %c0_i32 = arith.constant 0 : i32
    %c0_i32_0 = arith.constant 0 : i32
    %c0_i32_1 = arith.constant 0 : i32
    return %c0_i32, %c0_i32_0 : i32, i32
  }
  func.func @transform_7(%arg0: i32) -> (i32, i32) {
    %c0_i32 = arith.constant 0 : i32
    %c0_i32_0 = arith.constant 0 : i32
    %c0_i32_1 = arith.constant 0 : i32
    return %c0_i32, %c0_i32_0 : i32, i32
  }
  func.func @transform_8(%arg0: i32) -> (i32, i32, i32) {
    %c0_i32 = arith.constant 0 : i32
    %c0_i32_0 = arith.constant 0 : i32
    %c0_i32_1 = arith.constant 0 : i32
    return %c0_i32, %arg0, %c0_i32_0 : i32, i32, i32
  }
}

module attributes {stable_mosaic.version = 11 : i64} {
  func.func @kernel(%arg0: i32, %arg1: memref<4x1024xf32, #tpu.memory_space<vmem>>, %arg2: memref<4x1024xf32, #tpu.memory_space<vmem>>, %arg3: memref<1x1024xf32, #tpu.memory_space<vmem>>, %arg4: memref<1x1024xf32, #tpu.memory_space<vmem>>, %arg5: memref<4x1024xf32, #tpu.memory_space<vmem>>) attributes {dimension_semantics = [#tpu.dimension_semantics<parallel>], iteration_bounds = array<i64: 1>, scalar_prefetch = 0 : i64, scratch_operands = 0 : i64, tpu.core_type = #tpu.core_type<tc>, window_params = [{transform_indices = @transform_0, window_bounds = array<i64: 4, 1024>}, {transform_indices = @transform_1, window_bounds = array<i64: 4, 1024>}, {pipeline_mode = #tpu.pipeline_mode<synchronous>, transform_indices = @transform_2, window_bounds = array<i64: 1, 1024>}, {pipeline_mode = #tpu.pipeline_mode<synchronous>, transform_indices = @transform_3, window_bounds = array<i64: 1, 1024>}, {transform_indices = @transform_4, window_bounds = array<i64: 4, 1024>}]} {
    %c0 = arith.constant 0 : index
    %c0_0 = arith.constant 0 : index
    %0 = vector.load %arg2[%c0, %c0_0] : memref<4x1024xf32, #tpu.memory_space<vmem>>, vector<4x1024xf32>
    %cst = arith.constant dense<0.000000e+00> : vector<4xf32>
    %1 = vector.multi_reduction <add>, %0, %cst [1] : vector<4x1024xf32> to vector<4xf32>
    %2 = vector.shape_cast %1 : vector<4xf32> to vector<4x1xf32>
    %cst_1 = arith.constant 1.024000e+03 : f32
    %3 = vector.broadcast %cst_1 : f32 to vector<4x1xf32>
    %4 = arith.divf %2, %3 : vector<4x1xf32>
    %5 = vector.broadcast %4 : vector<4x1xf32> to vector<4x1024xf32>
    %6 = arith.subf %0, %5 : vector<4x1024xf32>
    %7 = arith.mulf %6, %6 : vector<4x1024xf32>
    %cst_2 = arith.constant dense<0.000000e+00> : vector<4xf32>
    %8 = vector.multi_reduction <add>, %7, %cst_2 [1] : vector<4x1024xf32> to vector<4xf32>
    %9 = vector.shape_cast %8 : vector<4xf32> to vector<4x1xf32>
    %cst_3 = arith.constant 1.024000e+03 : f32
    %10 = vector.broadcast %cst_3 : f32 to vector<4x1xf32>
    %11 = arith.divf %9, %10 : vector<4x1xf32>
    %12 = vector.broadcast %4 : vector<4x1xf32> to vector<4x1024xf32>
    %13 = arith.subf %0, %12 : vector<4x1024xf32>
    %cst_4 = arith.constant 9.99999993E-9 : f32
    %14 = vector.broadcast %cst_4 : f32 to vector<4x1xf32>
    %15 = arith.addf %11, %14 : vector<4x1xf32>
    %16 = math.rsqrt %15 : vector<4x1xf32>
    %17 = vector.broadcast %16 : vector<4x1xf32> to vector<4x1024xf32>
    %18 = arith.mulf %13, %17 : vector<4x1024xf32>
    %c0_5 = arith.constant 0 : index
    %c0_6 = arith.constant 0 : index
    %19 = vector.load %arg1[%c0_5, %c0_6] : memref<4x1024xf32, #tpu.memory_space<vmem>>, vector<4x1024xf32>
    %c0_7 = arith.constant 0 : index
    %c0_8 = arith.constant 0 : index
    %20 = vector.load %arg3[%c0_7, %c0_8] : memref<1x1024xf32, #tpu.memory_space<vmem>>, vector<1x1024xf32>
    %21 = vector.broadcast %20 : vector<1x1024xf32> to vector<4x1024xf32>
    %22 = arith.mulf %18, %21 : vector<4x1024xf32>
    %23 = arith.addf %19, %22 : vector<4x1024xf32>
    %c0_9 = arith.constant 0 : index
    %c0_10 = arith.constant 0 : index
    %24 = vector.load %arg4[%c0_9, %c0_10] : memref<1x1024xf32, #tpu.memory_space<vmem>>, vector<1x1024xf32>
    %25 = vector.broadcast %24 : vector<1x1024xf32> to vector<4x1024xf32>
    %26 = arith.addf %23, %25 : vector<4x1024xf32>
    %c0_11 = arith.constant 0 : index
    %c0_12 = arith.constant 0 : index
    %27 = vector.load %arg5[%c0_11, %c0_12] : memref<4x1024xf32, #tpu.memory_space<vmem>>, vector<4x1024xf32>
    tpu.vector_store %arg5[%c0_11, %c0_12], %26 {strides = array<i32>} : memref<4x1024xf32, #tpu.memory_space<vmem>>, vector<4x1024xf32>,
    return
  }
  func.func @transform_0(%arg0: i32) -> (i32, i32) {
    %c0_i32 = arith.constant 0 : i32
    %c0_i32_0 = arith.constant 0 : i32
    return %arg0, %c0_i32 : i32, i32
  }
  func.func @transform_1(%arg0: i32) -> (i32, i32) {
    %c0_i32 = arith.constant 0 : i32
    %c0_i32_0 = arith.constant 0 : i32
    return %arg0, %c0_i32 : i32, i32
  }
  func.func @transform_2(%arg0: i32) -> (i32, i32) {
    %c0_i32 = arith.constant 0 : i32
    %c0_i32_0 = arith.constant 0 : i32
    %c0_i32_1 = arith.constant 0 : i32
    return %c0_i32, %c0_i32_0 : i32, i32
  }
  func.func @transform_3(%arg0: i32) -> (i32, i32) {
    %c0_i32 = arith.constant 0 : i32
    %c0_i32_0 = arith.constant 0 : i32
    %c0_i32_1 = arith.constant 0 : i32
    return %c0_i32, %c0_i32_0 : i32, i32
  }
  func.func @transform_4(%arg0: i32) -> (i32, i32) {
    %c0_i32 = arith.constant 0 : i32
    %c0_i32_0 = arith.constant 0 : i32
    return %arg0, %c0_i32 : i32, i32
  }
}

module attributes {stable_mosaic.version = 11 : i64} {
  func.func @kernel(%arg0: i32, %arg1: memref<2xi32, #tpu.memory_space<smem>>, %arg2: memref<3xf32, #tpu.memory_space<smem>>, %arg3: memref<1x128x16xf32, #tpu.memory_space<vmem>>, %arg4: memref<16x48xf32, #tpu.memory_space<vmem>>, %arg5: memref<1x48xf32, #tpu.memory_space<vmem>>, %arg6: memref<48x48xf32, #tpu.memory_space<vmem>>, %arg7: memref<1x48xf32, #tpu.memory_space<vmem>>, %arg8: memref<48x16xf32, #tpu.memory_space<vmem>>, %arg9: memref<48x16xf32, #tpu.memory_space<vmem>>, %arg10: memref<1x16xf32, #tpu.memory_space<vmem>>, %arg11: memref<1x128x16xf32, #tpu.memory_space<vmem>>) attributes {dimension_semantics = [#tpu.dimension_semantics<parallel>], iteration_bounds = array<i64: 2>, scalar_prefetch = 0 : i64, scratch_operands = 0 : i64, tpu.core_type = #tpu.core_type<tc>, window_params = [{transform_indices = @transform_0, window_bounds = array<i64: 2>}, {transform_indices = @transform_1, window_bounds = array<i64: 3>}, {transform_indices = @transform_2, window_bounds = array<i64: 1, 128, 16>}, {pipeline_mode = #tpu.pipeline_mode<synchronous>, transform_indices = @transform_3, window_bounds = array<i64: 16, 48>}, {pipeline_mode = #tpu.pipeline_mode<synchronous>, transform_indices = @transform_4, window_bounds = array<i64: 1, 48>}, {pipeline_mode = #tpu.pipeline_mode<synchronous>, transform_indices = @transform_5, window_bounds = array<i64: 48, 48>}, {pipeline_mode = #tpu.pipeline_mode<synchronous>, transform_indices = @transform_6, window_bounds = array<i64: 1, 48>}, {pipeline_mode = #tpu.pipeline_mode<synchronous>, transform_indices = @transform_7, window_bounds = array<i64: 48, 16>}, {pipeline_mode = #tpu.pipeline_mode<synchronous>, transform_indices = @transform_8, window_bounds = array<i64: 48, 16>}, {pipeline_mode = #tpu.pipeline_mode<synchronous>, transform_indices = @transform_9, window_bounds = array<i64: 1, 16>}, {transform_indices = @transform_10, window_bounds = array<i64: 1, 128, 16>}]} {
    %c0 = arith.constant 0 : index
    %0 = memref.load %arg2[%c0] : memref<3xf32, #tpu.memory_space<smem>>
    %c1 = arith.constant 1 : index
    %1 = memref.load %arg2[%c1] : memref<3xf32, #tpu.memory_space<smem>>
    %c2 = arith.constant 2 : index
    %2 = memref.load %arg2[%c2] : memref<3xf32, #tpu.memory_space<smem>>
    %c0_0 = arith.constant 0 : index
    %c0_1 = arith.constant 0 : index
    %c0_2 = arith.constant 0 : index
    %3 = vector.load %arg3[%c0_0, %c0_1, %c0_2] : memref<1x128x16xf32, #tpu.memory_space<vmem>>, vector<1x128x16xf32>
    %4 = vector.shape_cast %3 : vector<1x128x16xf32> to vector<128x16xf32>
    %c0_3 = arith.constant 0 : index
    %c0_4 = arith.constant 0 : index
    %5 = vector.load %arg4[%c0_3, %c0_4] : memref<16x48xf32, #tpu.memory_space<vmem>>, vector<16x48xf32>
    %cst = arith.constant dense<0.000000e+00> : vector<128x48xf32>
    %6 = tpu.matmul %4, %5, %cst {dimension_numbers = #tpu.dot_dimension_numbers<[1], [0], [0], [1], [0, 0, 1, 1], [], []>} : vector<128x16xf32>, vector<16x48xf32>, vector<128x48xf32> -> vector<128x48xf32>
    %c0_5 = arith.constant 0 : index
    %c0_6 = arith.constant 0 : index
    %7 = vector.load %arg5[%c0_5, %c0_6] : memref<1x48xf32, #tpu.memory_space<vmem>>, vector<1x48xf32>
    %8 = vector.broadcast %7 : vector<1x48xf32> to vector<128x48xf32>
    %9 = arith.addf %6, %8 : vector<128x48xf32>
    %cst_7 = arith.constant 0.000000e+00 : f32
    %10 = vector.broadcast %cst_7 : f32 to vector<128x48xf32>
    %11 = arith.cmpf oge, %9, %10 : vector<128x48xf32>
    %12 = vector.broadcast %0 : f32 to vector<128x48xf32>
    %13 = arith.mulf %12, %9 : vector<128x48xf32>
    %14 = arith.select %11, %9, %13 : vector<128x48xi1>, vector<128x48xf32>
    %15 = vector.extract_strided_slice %14 {offsets = [0, 0], sizes = [64, 48], strides = [1, 1]} : vector<128x48xf32> to vector<64x48xf32>
    %16 = vector.extract_strided_slice %14 {offsets = [64, 0], sizes = [64, 48], strides = [1, 1]} : vector<128x48xf32> to vector<64x48xf32>
    %17 = arith.addf %15, %16 : vector<64x48xf32>
    %cst_8 = arith.constant 5.000000e-01 : f32
    %18 = vector.broadcast %cst_8 : f32 to vector<64x48xf32>
    %19 = arith.mulf %17, %18 : vector<64x48xf32>
    %c0_9 = arith.constant 0 : index
    %c0_10 = arith.constant 0 : index
    %20 = vector.load %arg6[%c0_9, %c0_10] : memref<48x48xf32, #tpu.memory_space<vmem>>, vector<48x48xf32>
    %cst_11 = arith.constant dense<0.000000e+00> : vector<64x48xf32>
    %21 = tpu.matmul %19, %20, %cst_11 {dimension_numbers = #tpu.dot_dimension_numbers<[1], [0], [0], [1], [0, 0, 1, 1], [], []>} : vector<64x48xf32>, vector<48x48xf32>, vector<64x48xf32> -> vector<64x48xf32>
    %c0_12 = arith.constant 0 : index
    %c0_13 = arith.constant 0 : index
    %22 = vector.load %arg7[%c0_12, %c0_13] : memref<1x48xf32, #tpu.memory_space<vmem>>, vector<1x48xf32>
    %23 = vector.broadcast %22 : vector<1x48xf32> to vector<64x48xf32>
    %24 = arith.addf %21, %23 : vector<64x48xf32>
    %cst_14 = arith.constant 0.000000e+00 : f32
    %25 = vector.broadcast %cst_14 : f32 to vector<64x48xf32>
    %26 = arith.cmpf oge, %24, %25 : vector<64x48xf32>
    %27 = vector.broadcast %1 : f32 to vector<64x48xf32>
    %28 = arith.mulf %27, %24 : vector<64x48xf32>
    %29 = arith.select %26, %24, %28 : vector<64x48xi1>, vector<64x48xf32>
    %c0_15 = arith.constant 0 : index
    %c0_16 = arith.constant 0 : index
    %30 = vector.load %arg8[%c0_15, %c0_16] : memref<48x16xf32, #tpu.memory_space<vmem>>, vector<48x16xf32>
    %cst_17 = arith.constant dense<0.000000e+00> : vector<128x16xf32>
    %31 = tpu.matmul %14, %30, %cst_17 {dimension_numbers = #tpu.dot_dimension_numbers<[1], [0], [0], [1], [0, 0, 1, 1], [], []>} : vector<128x48xf32>, vector<48x16xf32>, vector<128x16xf32> -> vector<128x16xf32>
    %c0_18 = arith.constant 0 : index
    %c0_19 = arith.constant 0 : index
    %32 = vector.load %arg9[%c0_18, %c0_19] : memref<48x16xf32, #tpu.memory_space<vmem>>, vector<48x16xf32>
    %cst_20 = arith.constant dense<0.000000e+00> : vector<64x16xf32>
    %33 = tpu.matmul %29, %32, %cst_20 {dimension_numbers = #tpu.dot_dimension_numbers<[1], [0], [0], [1], [0, 0, 1, 1], [], []>} : vector<64x48xf32>, vector<48x16xf32>, vector<64x16xf32> -> vector<64x16xf32>
    %c0_21 = arith.constant 0 : index
    %c0_22 = arith.constant 0 : index
    %34 = vector.load %arg10[%c0_21, %c0_22] : memref<1x16xf32, #tpu.memory_space<vmem>>, vector<1x16xf32>
    %35 = vector.broadcast %34 : vector<1x16xf32> to vector<64x16xf32>
    %36 = arith.addf %33, %35 : vector<64x16xf32>
    %37 = vector.extract_strided_slice %31 {offsets = [0, 0], sizes = [64, 16], strides = [1, 1]} : vector<128x16xf32> to vector<64x16xf32>
    %38 = arith.addf %37, %36 : vector<64x16xf32>
    %cst_23 = arith.constant 0.000000e+00 : f32
    %39 = vector.broadcast %cst_23 : f32 to vector<64x16xf32>
    %40 = arith.cmpf oge, %38, %39 : vector<64x16xf32>
    %41 = vector.broadcast %2 : f32 to vector<64x16xf32>
    %42 = arith.mulf %41, %38 : vector<64x16xf32>
    %43 = arith.select %40, %38, %42 : vector<64x16xi1>, vector<64x16xf32>
    %44 = vector.shape_cast %43 : vector<64x16xf32> to vector<1x64x16xf32>
    %c0_24 = arith.constant 0 : index
    %c0_25 = arith.constant 0 : index
    %c0_26 = arith.constant 0 : index
    %45 = vector.load %arg11[%c0_24, %c0_25, %c0_26] : memref<1x128x16xf32, #tpu.memory_space<vmem>>, vector<1x64x16xf32>
    tpu.vector_store %arg11[%c0_24, %c0_25, %c0_26], %44 {strides = array<i32>} : memref<1x128x16xf32, #tpu.memory_space<vmem>>, vector<1x64x16xf32>,
    %46 = vector.extract_strided_slice %31 {offsets = [64, 0], sizes = [64, 16], strides = [1, 1]} : vector<128x16xf32> to vector<64x16xf32>
    %47 = arith.addf %46, %36 : vector<64x16xf32>
    %cst_27 = arith.constant 0.000000e+00 : f32
    %48 = vector.broadcast %cst_27 : f32 to vector<64x16xf32>
    %49 = arith.cmpf oge, %47, %48 : vector<64x16xf32>
    %50 = vector.broadcast %2 : f32 to vector<64x16xf32>
    %51 = arith.mulf %50, %47 : vector<64x16xf32>
    %52 = arith.select %49, %47, %51 : vector<64x16xi1>, vector<64x16xf32>
    %53 = vector.shape_cast %52 : vector<64x16xf32> to vector<1x64x16xf32>
    %c0_28 = arith.constant 0 : index
    %c64 = arith.constant 64 : index
    %c0_29 = arith.constant 0 : index
    %54 = vector.load %arg11[%c0_28, %c64, %c0_29] : memref<1x128x16xf32, #tpu.memory_space<vmem>>, vector<1x64x16xf32>
    tpu.vector_store %arg11[%c0_28, %c64, %c0_29], %53 {strides = array<i32>} : memref<1x128x16xf32, #tpu.memory_space<vmem>>, vector<1x64x16xf32>,
    return
  }
  func.func @transform_0(%arg0: i32) -> i32 {
    %c0_i32 = arith.constant 0 : i32
    %c0_i32_0 = arith.constant 0 : i32
    return %c0_i32 : i32
  }
  func.func @transform_1(%arg0: i32) -> i32 {
    %c0_i32 = arith.constant 0 : i32
    %c0_i32_0 = arith.constant 0 : i32
    return %c0_i32 : i32
  }
  func.func @transform_2(%arg0: i32) -> (i32, i32, i32) {
    %c0_i32 = arith.constant 0 : i32
    %c0_i32_0 = arith.constant 0 : i32
    %c0_i32_1 = arith.constant 0 : i32
    return %arg0, %c0_i32, %c0_i32_0 : i32, i32, i32
  }
  func.func @transform_3(%arg0: i32) -> (i32, i32) {
    %c0_i32 = arith.constant 0 : i32
    %c0_i32_0 = arith.constant 0 : i32
    %c0_i32_1 = arith.constant 0 : i32
    return %c0_i32, %c0_i32_0 : i32, i32
  }
  func.func @transform_4(%arg0: i32) -> (i32, i32) {
    %c0_i32 = arith.constant 0 : i32
    %c0_i32_0 = arith.constant 0 : i32
    %c0_i32_1 = arith.constant 0 : i32
    return %c0_i32, %c0_i32_0 : i32, i32
  }
  func.func @transform_5(%arg0: i32) -> (i32, i32) {
    %c0_i32 = arith.constant 0 : i32
    %c0_i32_0 = arith.constant 0 : i32
    %c0_i32_1 = arith.constant 0 : i32
    return %c0_i32, %c0_i32_0 : i32, i32
  }
  func.func @transform_6(%arg0: i32) -> (i32, i32) {
    %c0_i32 = arith.constant 0 : i32
    %c0_i32_0 = arith.constant 0 : i32
    %c0_i32_1 = arith.constant 0 : i32
    return %c0_i32, %c0_i32_0 : i32, i32
  }
  func.func @transform_7(%arg0: i32) -> (i32, i32) {
    %c0_i32 = arith.constant 0 : i32
    %c0_i32_0 = arith.constant 0 : i32
    %c0_i32_1 = arith.constant 0 : i32
    return %c0_i32, %c0_i32_0 : i32, i32
  }
  func.func @transform_8(%arg0: i32) -> (i32, i32) {
    %c0_i32 = arith.constant 0 : i32
    %c0_i32_0 = arith.constant 0 : i32
    %c0_i32_1 = arith.constant 0 : i32
    return %c0_i32, %c0_i32_0 : i32, i32
  }
  func.func @transform_9(%arg0: i32) -> (i32, i32) {
    %c0_i32 = arith.constant 0 : i32
    %c0_i32_0 = arith.constant 0 : i32
    %c0_i32_1 = arith.constant 0 : i32
    return %c0_i32, %c0_i32_0 : i32, i32
  }
  func.func @transform_10(%arg0: i32) -> (i32, i32, i32) {
    %c0_i32 = arith.constant 0 : i32
    %c0_i32_0 = arith.constant 0 : i32
    %c0_i32_1 = arith.constant 0 : i32
    return %arg0, %c0_i32, %c0_i32_0 : i32, i32, i32
  }
}

module attributes {stable_mosaic.version = 11 : i64} {
  func.func @kernel(%arg0: i32, %arg1: memref<1xf32, #tpu.memory_space<smem>>, %arg2: memref<128x16xf32, #tpu.memory_space<vmem>>, %arg3: memref<16x16xf32, #tpu.memory_space<vmem>>, %arg4: memref<1x16xf32, #tpu.memory_space<vmem>>, %arg5: memref<128x16xf32, #tpu.memory_space<vmem>>) attributes {dimension_semantics = [#tpu.dimension_semantics<parallel>], iteration_bounds = array<i64: 2>, scalar_prefetch = 0 : i64, scratch_operands = 0 : i64, tpu.core_type = #tpu.core_type<tc>, window_params = [{transform_indices = @transform_0, window_bounds = array<i64: 1>}, {transform_indices = @transform_1, window_bounds = array<i64: 128, 16>}, {pipeline_mode = #tpu.pipeline_mode<synchronous>, transform_indices = @transform_2, window_bounds = array<i64: 16, 16>}, {pipeline_mode = #tpu.pipeline_mode<synchronous>, transform_indices = @transform_3, window_bounds = array<i64: 1, 16>}, {transform_indices = @transform_4, window_bounds = array<i64: 128, 16>}]} {
    %c0 = arith.constant 0 : index
    %0 = memref.load %arg1[%c0] : memref<1xf32, #tpu.memory_space<smem>>
    %c0_0 = arith.constant 0 : index
    %c0_1 = arith.constant 0 : index
    %1 = vector.load %arg2[%c0_0, %c0_1] : memref<128x16xf32, #tpu.memory_space<vmem>>, vector<128x16xf32>
    %cst = arith.constant 0.000000e+00 : f32
    %2 = vector.broadcast %cst : f32 to vector<128x16xf32>
    %3 = arith.cmpf oge, %1, %2 : vector<128x16xf32>
    %4 = vector.broadcast %0 : f32 to vector<128x16xf32>
    %5 = arith.mulf %4, %1 : vector<128x16xf32>
    %6 = arith.select %3, %1, %5 : vector<128x16xi1>, vector<128x16xf32>
    %c0_2 = arith.constant 0 : index
    %c0_3 = arith.constant 0 : index
    %7 = vector.load %arg3[%c0_2, %c0_3] : memref<16x16xf32, #tpu.memory_space<vmem>>, vector<16x16xf32>
    %cst_4 = arith.constant dense<0.000000e+00> : vector<128x16xf32>
    %8 = tpu.matmul %6, %7, %cst_4 {dimension_numbers = #tpu.dot_dimension_numbers<[1], [0], [0], [1], [0, 0, 1, 1], [], []>} : vector<128x16xf32>, vector<16x16xf32>, vector<128x16xf32> -> vector<128x16xf32>
    %c0_5 = arith.constant 0 : index
    %c0_6 = arith.constant 0 : index
    %9 = vector.load %arg4[%c0_5, %c0_6] : memref<1x16xf32, #tpu.memory_space<vmem>>, vector<1x16xf32>
    %10 = vector.broadcast %9 : vector<1x16xf32> to vector<128x16xf32>
    %11 = arith.addf %8, %10 : vector<128x16xf32>
    %c0_7 = arith.constant 0 : index
    %c0_8 = arith.constant 0 : index
    %12 = vector.load %arg5[%c0_7, %c0_8] : memref<128x16xf32, #tpu.memory_space<vmem>>, vector<128x16xf32>
    tpu.vector_store %arg5[%c0_7, %c0_8], %11 {strides = array<i32>} : memref<128x16xf32, #tpu.memory_space<vmem>>, vector<128x16xf32>,
    return
  }
  func.func @transform_0(%arg0: i32) -> i32 {
    %c0_i32 = arith.constant 0 : i32
    %c0_i32_0 = arith.constant 0 : i32
    return %c0_i32 : i32
  }
  func.func @transform_1(%arg0: i32) -> (i32, i32) {
    %c0_i32 = arith.constant 0 : i32
    %c0_i32_0 = arith.constant 0 : i32
    return %arg0, %c0_i32 : i32, i32
  }
  func.func @transform_2(%arg0: i32) -> (i32, i32) {
    %c0_i32 = arith.constant 0 : i32
    %c0_i32_0 = arith.constant 0 : i32
    %c0_i32_1 = arith.constant 0 : i32
    return %c0_i32, %c0_i32_0 : i32, i32
  }
  func.func @transform_3(%arg0: i32) -> (i32, i32) {
    %c0_i32 = arith.constant 0 : i32
    %c0_i32_0 = arith.constant 0 : i32
    %c0_i32_1 = arith.constant 0 : i32
    return %c0_i32, %c0_i32_0 : i32, i32
  }
  func.func @transform_4(%arg0: i32) -> (i32, i32) {
    %c0_i32 = arith.constant 0 : i32
    %c0_i32_0 = arith.constant 0 : i32
    return %arg0, %c0_i32 : i32, i32
  }
}

</mosaic_0001>

<bundles_post_ra>
// kernel: dprnn_tac_forward.8
= control target key start
LH: loop header
LB: loop body
LE: loop exit
PB: predicated region body
PF: predicated region fallthrough
CT: control target
= control target key end

     0   :  { %vm48_vm0 = vcmask 1043456   ;;  %v228_v27 = vmov 1024.0   ;;  %v229_v33 = vmov 839922192   ;;  %s348_s1 = inlined_call_operand.vmem [shape: f32[4,1024], index: 1, kind: input, shape index: {}]   ;;  %s349_s2 = inlined_call_operand.vmem [shape: f32[1,1024], index: 2, kind: input, shape index: {}]   ;;  %s350_s3 = inlined_call_operand.vmem [shape: f32[1,1024], index: 3, kind: input, shape index: {}]   ;;  %s351_s0 = inlined_call_operand.vmem [shape: f32[4,1024], index: 0, kind: input, shape index: {}]   ;;  %s352_s4 = inlined_call_operand.vmem [shape: f32[4,1024], index: 4, kind: output, shape index: {}]  }
   0x1   :  { %v17_v0 = vld [vmem:[%s348_s1] sm:$0xff]  ;;  %v18_v1 = vld [vmem:[%s348_s1 + $0x8] sm:$0xff]  ;;  %v19_v2 = vld [vmem:[%s348_s1 + $0x10] sm:$0xff]  ;;  %224 = vrcp.f32 %v228_v27  ;;  %v275_v34 = vunpack.c.l.s4 %v229_v33 }
   0x2   :  { %v20_v3 = vld [vmem:[%s348_s1 + $0x18] sm:$0xff]  ;;  %25 = vst [vmem:[#allocation1] ss:$2 sm:$0xff] %v17_v0 }
   0x3   :  { %27 = vst [vmem:[#allocation1 + $0x10] ss:$2 sm:$0xff] %v18_v1  ;;  %v77_v36 = vunpack.c.0.s8 %v275_v34  ;;  %v155_v34 = vld [vmem:[%s351_s0 + $0x8] sm:$0xff] }
   0x4   :  { %29 = vst [vmem:[#allocation1 + $0x20] ss:$2 sm:$0xff] %v19_v2 }
   0x5   :  { %31 = vst [vmem:[#allocation1 + $0x30] ss:$2 sm:$0xff] %v20_v3 }
   0x7   :  { %v225_v28 = vpop.eup %224 }
   0x8   :  { %v67_v29 = vmul.f32 1024.0, %v225_v28  ;;  %vm71_vm1 = vweird.f32 %v225_v28 }
   0x9   :  { %v32_v4 = vld.sshfl [vmem:[#allocation1] sm:$0xff pattern:$0x75316420]  ;;  %v33_v5 = vld.sshfl [vmem:[#allocation1 + $0x8] sm:$0xff pattern:$0x75316420] }
   0xa   :  { %v34_v6 = vld.sshfl [vmem:[#allocation1 + $0x10] sm:$0xff pattern:$0x75316420]  ;;  %v35_v7 = vld.sshfl [vmem:[#allocation1 + $0x18] sm:$0xff pattern:$0x75316420] }
   0xb   :  { %v49_v8 = vsel %vm48_vm0, %v32_v4, 0.0  ;;  %v50_v9 = vsel %vm48_vm0, %v33_v5, 0.0  ;;  %v52_v10 = vsel %vm48_vm0, %v34_v6, 0.0  ;;  %v36_v11 = vld.sshfl [vmem:[#allocation1 + $0x20] sm:$0xff pattern:$0x75316420] }
   0xc   :  { %v51_v12 = vadd.f32 %v50_v9, %v49_v8  ;;  %v54_v13 = vsel %vm48_vm0, %v35_v7, 0.0  ;;  %v37_v14 = vld.sshfl [vmem:[#allocation1 + $0x28] sm:$0xff pattern:$0x75316420]  ;;  %v56_v16 = vsel %vm48_vm0, %v36_v11, 0.0  ;;  %v68_v30 = vsub.f32 1.0, %v67_v29 }
   0xd   :  { %v38_v17 = vld.sshfl [vmem:[#allocation1 + $0x30] sm:$0xff pattern:$0x75316420]  ;;  %v58_v19 = vsel %vm48_vm0, %v37_v14, 0.0 }
   0xe   :  { %v53_v15 = vadd.f32 %v52_v10, %v51_v12  ;;  %v39_v20 = vld.sshfl [vmem:[#allocation1 + $0x38] sm:$0xff pattern:$0x75316420]  ;;  %v60_v22 = vsel %vm48_vm0, %v38_v17, 0.0  ;;  %v69_v31 = vmul.f32 %v225_v28, %v68_v30  ;;  %v158_v10 = vld [vmem:[%s349_s2] sm:$0xff] }
   0xf   :  { %v62_v24 = vsel %vm48_vm0, %v39_v20, 0.0  ;;  %v163_v14 = vperm.slane %v158_v10, 3  ;;  %v167_v17 = vperm.slane %v158_v10, 7  ;;  %v160_v20 = vperm.slane %v158_v10, 0 }
  0x10   :  { %v55_v18 = vadd.f32 %v54_v13, %v53_v15  ;;  %v70_v32 = vadd.f32 %v225_v28, %v69_v31  ;;  %v161_v13 = vperm.slane %v158_v10, 1  ;;  %v165_v15 = vperm.slane %v158_v10, 5 }
  0x11   :  { %v166_v27 = vperm.slane %v158_v10, 6 }
  0x12   :  { %v57_v21 = vadd.f32 %v56_v16, %v55_v18  ;;  %v72_v35 = vsel %vm71_vm1, %v225_v28, %v70_v32  ;;  %v188_v18 = vld [vmem:[%s350_s3] sm:$0xff]  ;;  %v171_v28 = vrot.slane %v167_v17, 4 }
  0x13   :  { %v191_v29 = vperm.slane %v188_v18, 1  ;;  %v193_v30 = vperm.slane %v188_v18, 3  ;;  %v195_v31 = vperm.slane %v188_v18, 5  ;;  %v197_v32 = vperm.slane %v188_v18, 7 }
  0x14   :  { %v59_v23 = vadd.f32 %v58_v19, %v57_v21  ;;  %v162_v21 = vperm.slane %v158_v10, 2 }
  0x16   :  { %v61_v25 = vadd.f32 %v60_v22, %v59_v23  ;;  %v164_v22 = vperm.slane %v158_v10, 4  ;;  %v168_v23 = vrot.slane %v161_v13, 4 }
  0x18   :  { %v63_v26 = vadd.f32 %v62_v24, %v61_v25  ;;  %v169_v24 = vrot.slane %v163_v14, 4  ;;  %v170_v25 = vrot.slane %v165_v15, 4 }
  0x1a   :  { %64 = vadd.xlane.f32.xlu0 %v63_v26 }
  0x8d   :  { %v65_v37 = vpop.xlane.xlu0 %64 }
  0x8e   :  { %v73_v38 = vmul.f32 %v72_v35, %v65_v37  ;;  %v192_v37 = vperm.slane %v188_v18, 2 }
  0x90   :  { %v78_v39 = vperm.slane %v73_v38, %v77_v36  ;;  %v172_v38 = vsel %vm48_vm0, %v160_v20, %v168_v23 }
  0x92   :  { %v280_v40 = vsub.f32 %v17_v0, %v78_v39  ;;  %v282_v41 = vsub.f32 %v18_v1, %v78_v39  ;;  %v284_v42 = vsub.f32 %v19_v2, %v78_v39  ;;  %v286_v43 = vsub.f32 %v20_v3, %v78_v39 }
  0x93   :  { %v173_v39 = vsel %vm48_vm0, %v162_v21, %v169_v24 }
  0x94   :  { %v84_v44 = vmul.f32 %v280_v40, %v280_v40  ;;  %v85_v45 = vmul.f32 %v282_v41, %v282_v41  ;;  %v86_v46 = vmul.f32 %v284_v42, %v284_v42  ;;  %v87_v47 = vmul.f32 %v286_v43, %v286_v43 }
  0x96   :  { %92 = vst [vmem:[#allocation1] ss:$2 sm:$0xff] %v84_v44  ;;  %v174_v44 = vsel %vm48_vm0, %v164_v22, %v170_v25 }
  0x97   :  { %94 = vst [vmem:[#allocation1 + $0x10] ss:$2 sm:$0xff] %v85_v45 }
  0x98   :  { %96 = vst [vmem:[#allocation1 + $0x20] ss:$2 sm:$0xff] %v86_v46  ;;  %v175_v46 = vsel %vm48_vm0, %v166_v27, %v171_v28 }
  0x99   :  { %98 = vst [vmem:[#allocation1 + $0x30] ss:$2 sm:$0xff] %v87_v47  ;;  %v194_v47 = vperm.slane %v188_v18, 4 }
  0x9d   :  { %v99_v48 = vld.sshfl [vmem:[#allocation1] sm:$0xff pattern:$0x75316420]  ;;  %v100_v49 = vld.sshfl [vmem:[#allocation1 + $0x8] sm:$0xff pattern:$0x75316420] }
  0x9e   :  { %v101_v50 = vld.sshfl [vmem:[#allocation1 + $0x10] sm:$0xff pattern:$0x75316420]  ;;  %v115_v51 = vsel %vm48_vm0, %v99_v48, 0.0  ;;  %v116_v52 = vsel %vm48_vm0, %v100_v49, 0.0  ;;  %v196_v48 = vperm.slane %v188_v18, 6 }
  0x9f   :  { %v102_v53 = vld.sshfl [vmem:[#allocation1 + $0x18] sm:$0xff pattern:$0x75316420]  ;;  %v117_v54 = vadd.f32 %v116_v52, %v115_v51  ;;  %v118_v55 = vsel %vm48_vm0, %v101_v50, 0.0  ;;  %v198_v50 = vrot.slane %v191_v29, 4  ;;  %v199_v51 = vrot.slane %v193_v30, 4 }
  0xa0   :  { %v103_v56 = vld.sshfl [vmem:[#allocation1 + $0x20] sm:$0xff pattern:$0x75316420]  ;;  %v120_v58 = vsel %vm48_vm0, %v102_v53, 0.0  ;;  %v200_v52 = vrot.slane %v195_v31, 4  ;;  %v201_v53 = vrot.slane %v197_v32, 4 }
  0xa1   :  { %v119_v57 = vadd.f32 %v118_v55, %v117_v54  ;;  %v104_v59 = vld.sshfl [vmem:[#allocation1 + $0x28] sm:$0xff pattern:$0x75316420]  ;;  %v122_v61 = vsel %vm48_vm0, %v103_v56, 0.0 }
  0xa2   :  { %v105_v62 = vld.sshfl [vmem:[#allocation1 + $0x30] sm:$0xff pattern:$0x75316420]  ;;  %v124_v0 = vsel %vm48_vm0, %v104_v59, 0.0 }
  0xa3   :  { %v121_v60 = vadd.f32 %v120_v58, %v119_v57  ;;  %v106_v1 = vld.sshfl [vmem:[#allocation1 + $0x38] sm:$0xff pattern:$0x75316420]  ;;  %v126_v3 = vsel %vm48_vm0, %v105_v62, 0.0  ;;  %v154_v58 = vld [vmem:[%s351_s0] sm:$0xff]  ;;  %v204_v62 = vsel %vm48_vm0, %v194_v47, %v200_v52 }
  0xa4   :  { %v128_v5 = vsel %vm48_vm0, %v106_v1, 0.0 }
  0xa5   :  { %v123_v63 = vadd.f32 %v122_v61, %v121_v60  ;;  %v203_v61 = vsel %vm48_vm0, %v192_v37, %v199_v51 }
  0xa7   :  { %v125_v2 = vadd.f32 %v124_v0, %v123_v63  ;;  %v205_v63 = vsel %vm48_vm0, %v196_v48, %v201_v53 }
  0xa9   :  { %v127_v4 = vadd.f32 %v126_v3, %v125_v2 }
  0xab   :  { %v129_v6 = vadd.f32 %v128_v5, %v127_v4 }
  0xad   :  { %130 = vadd.xlane.f32.xlu0 %v129_v6 }
 0x120   :  { %v131_v7 = vpop.xlane.xlu0 %130 }
 0x121   :  { %v132_v8 = vmul.f32 %v131_v7, %v72_v35  ;;  %v190_v35 = vperm.slane %v188_v18, 0 }
 0x123   :  { %v133_v9 = vadd.f32 1e-08, %v132_v8  ;;  %v202_v60 = vsel %vm48_vm0, %v190_v35, %v198_v50 }
 0x125   :  { %226 = vrsqrt.f32 %v133_v9  ;;  %vm140_vm3 = vweird.f32 %v133_v9 }
 0x12b   :  { %v227_v11 = vpop.eup %226 }
 0x12c   :  { %v135_v12 = vmul.f32 %v227_v11, %v133_v9  ;;  %vm141_vm2 = vweird.f32 %v227_v11 }
 0x12d   :  { %vm142_vm4 = vmor %vm140_vm3, %vm141_vm2 }
 0x12e   :  { %v136_v16 = vmul.f32 %v227_v11, %v135_v12 }
 0x130   :  { %v137_v19 = vmul.f32 0.5, %v136_v16 }
 0x132   :  { %v138_v26 = vsub.f32 1.5, %v137_v19 }
 0x134   :  { %v139_v33 = vmul.f32 %v227_v11, %v138_v26 }
 0x136   :  { %v143_v45 = vsel %vm142_vm4, %v227_v11, %v139_v33 }
 0x137   :  { %v148_v49 = vperm.slane %v143_v45, %v77_v36  ;;  %v156_v36 = vld [vmem:[%s351_s0 + $0x10] sm:$0xff] }
 0x139   :  { %v150_v54 = vmul.f32 %v148_v49, %v280_v40  ;;  %v151_v55 = vmul.f32 %v148_v49, %v282_v41  ;;  %v152_v56 = vmul.f32 %v148_v49, %v284_v42  ;;  %v153_v57 = vmul.f32 %v148_v49, %v286_v43  ;;  %v157_v40 = vld [vmem:[%s351_s0 + $0x18] sm:$0xff] }
 0x13b   :  { %v180_v41 = vmul.f32 %v172_v38, %v150_v54  ;;  %v181_v42 = vmul.f32 %v173_v39, %v151_v55  ;;  %v182_v59 = vmul.f32 %v174_v44, %v152_v56  ;;  %v183_v43 = vmul.f32 %v175_v46, %v153_v57 }
 0x13d   :  { %v184_v0 = vadd.f32 %v180_v41, %v154_v58  ;;  %v185_v1 = vadd.f32 %v181_v42, %v155_v34  ;;  %v186_v2 = vadd.f32 %v182_v59, %v156_v36  ;;  %v187_v3 = vadd.f32 %v183_v43, %v157_v40 }
 0x13f   :  { %v210_v4 = vadd.f32 %v202_v60, %v184_v0  ;;  %v211_v5 = vadd.f32 %v203_v61, %v185_v1  ;;  %v212_v6 = vadd.f32 %v204_v62, %v186_v2  ;;  %v213_v7 = vadd.f32 %v205_v63, %v187_v3 }
 0x141   :  { %214 = vst [vmem:[%s352_s4] sm:$0xff] %v210_v4 }
 0x142   :  { %215 = vst [vmem:[%s352_s4 + $0x8] sm:$0xff] %v211_v5 }
 0x143   :  { %216 = vst [vmem:[%s352_s4 + $0x10] sm:$0xff] %v212_v6 }
 0x144   :  { %217 = vst [vmem:[%s352_s4 + $0x18] sm:$0xff] %v213_v7 }

// kernel: dprnn_tac_forward.7
= control target key start
LH: loop header
LB: loop body
LE: loop exit
PB: predicated region body
PF: predicated region fallthrough
CT: control target
= control target key end

     0   :  { %s1583_s27 = smov 0   ;;  %s1585_s28 = smov 0   ;;  %s1903_s0 = inlined_call_operand.vmem [shape: f32[8,32,16], index: 0, kind: input, shape index: {}]   ;;  %s1904_s1 = inlined_call_operand.vmem [shape: f32[16,128], index: 1, kind: input, shape index: {}]   ;;  %s1905_s2 = inlined_call_operand.vmem [shape: f32[16,64], index: 2, kind: input, shape index: {}]   ;;  %s1906_s3 = inlined_call_operand.vmem [shape: f32[16,64], index: 3, kind: input, shape index: {}]   ;;  %s1907_s4 = inlined_call_operand.vmem [shape: f32[1,128], index: 4, kind: input, shape index: {}]   ;;  %s1908_s5 = inlined_call_operand.vmem [shape: f32[16,16], index: 5, kind: input, shape index: {}]   ;;  %s1909_s6 = inlined_call_operand.vmem [shape: f32[16,16], index: 6, kind: input, shape index: {}]   ;;  %s1910_s7 = inlined_call_operand.vmem [shape: f32[1,16], index: 7, kind: input, shape index: {}]   ;;  %s1911_s8 = inlined_call_operand.vmem [shape: f32[8,32,16], index: 8, kind: output, shape index: {}]  }
   0x1   :  { %s1587_s29 = smov 0  }
   0x2 LB: > { %s1335_s30 = sadd.s32 4294967295, %s1524_s29   ;;  %s1600_s9 = sadd.s32 1, %s1524_s29   ;;  %s1524_s29 = sphi %s1587_s29, %s1915_s29   ;;  %s1520_s28 = sphi %s1585_s28, %s1914_s28   ;;  %s1516_s27 = sphi %s1583_s27, %s1913_s27  }
   0x3   : > { %s22_s10 = ssub.s32 %s1524_s29, %s1600_s9  ;;  %s25_s11 = sadd.s32 1, %s1520_s28 }
   0x4   : > { %p23_p0 = scmp.eq.s32.totalorder %s22_s10, 0  ;;  %p32_p1 = scmp.ne.s32.totalorder %s1520_s28, %s1516_s27 }
   0x5   : > { %p33_p2 = scmp.eq.s32.totalorder %s1524_s29, 0  ;;  %p209_p3 = scmp.eq.s32.totalorder %s1335_s30, 1 }
   0x6   : > { %s1611_s12 = scalar_select %p23_p0, %s1520_s28, %s25_s11  }
   0x7   : > { %p34_p4 = por %p33_p2, %p32_p1  ;;  %p1613_p5 = por %p209_p3, %p32_p1 }
   0x8   : > { %p1338_p6 = scmp.ge.s32.totalorder %s1524_s29, 2 }
   0xa   : > { %252 = sbr.rel (%p1338_p6) target bundleno = 35 (0x23), region = 44 }
   0xf   : > { %255 = sbr.rel (!%p34_p4) target bundleno = 35 (0x23), region = 48  ;;  %s257_s14 = sand.u32 (%p34_p4), 1, %s1520_s28  }
  0x10   : > { %s1408_s15 = sshll.u32 (%p34_p4), %s1524_s29, 4  ;;  %s1339_s16 = sshll.u32 (%p34_p4), %s257_s14, 7 }
  0x11   : > { %s1623_s19 = scalar_lea.vmem (%p34_p4), %s1903_s0, %s1408_s15  ;;  %s259_s20 = scalar_lea.vmem (%p34_p4), [#allocation9], %s1339_s16 }
  0x12   : > { %v321_v0 = vld [vmem:[%s1623_s19] sm:$0xff] (%p34_p4)  ;;  %v323_v1 = vld [vmem:[%s1623_s19 + $0x8] sm:$0xff] (%p34_p4) }
  0x13   : > { %v325_v2 = vld [vmem:[%s1623_s19 + $0x20] sm:$0xff] (%p34_p4)  ;;  %322 = vst [vmem:[%s259_s20] sm:$0xff] (%p34_p4), %v321_v0  ;;  %v327_v3 = vld [vmem:[%s1623_s19 + $0x28] sm:$0xff] (%p34_p4) }
  0x14   : > { %324 = vst [vmem:[%s259_s20 + $0x8] sm:$0xff] %v323_v1  ;;  %v329_v4 = vld [vmem:[%s1623_s19 + $0x40] sm:$0xff]  ;;  %v331_v5 = vld [vmem:[%s1623_s19 + $0x48] sm:$0xff] }
  0x15   : > { %326 = vst [vmem:[%s259_s20 + $0x10] sm:$0xff] %v325_v2  ;;  %v333_v6 = vld [vmem:[%s1623_s19 + $0x60] sm:$0xff]  ;;  %v335_v7 = vld [vmem:[%s1623_s19 + $0x68] sm:$0xff] }
  0x16   : > { %328 = vst [vmem:[%s259_s20 + $0x18] sm:$0xff] %v327_v3  ;;  %v337_v8 = vld [vmem:[%s1623_s19 + $0x80] sm:$0xff]  ;;  %v339_v9 = vld [vmem:[%s1623_s19 + $0x88] sm:$0xff] }
  0x17   : > { %330 = vst [vmem:[%s259_s20 + $0x20] sm:$0xff] %v329_v4  ;;  %v341_v10 = vld [vmem:[%s1623_s19 + $0xa0] sm:$0xff]  ;;  %v343_v11 = vld [vmem:[%s1623_s19 + $0xa8] sm:$0xff] }
  0x18   : > { %332 = vst [vmem:[%s259_s20 + $0x28] sm:$0xff] %v331_v5  ;;  %v345_v12 = vld [vmem:[%s1623_s19 + $0xc0] sm:$0xff]  ;;  %v347_v13 = vld [vmem:[%s1623_s19 + $0xc8] sm:$0xff] }
  0x19   : > { %334 = vst [vmem:[%s259_s20 + $0x30] sm:$0xff] %v333_v6  ;;  %v349_v14 = vld [vmem:[%s1623_s19 + $0xe0] sm:$0xff]  ;;  %v351_v15 = vld [vmem:[%s1623_s19 + $0xe8] sm:$0xff] }
  0x1a   : > { %336 = vst [vmem:[%s259_s20 + $0x38] sm:$0xff] %v335_v7 }
  0x1b   : > { %338 = vst [vmem:[%s259_s20 + $0x40] sm:$0xff] %v337_v8 }
  0x1c   : > { %340 = vst [vmem:[%s259_s20 + $0x48] sm:$0xff] %v339_v9 }
  0x1d   : > { %342 = vst [vmem:[%s259_s20 + $0x50] sm:$0xff] %v341_v10 }
  0x1e   : > { %344 = vst [vmem:[%s259_s20 + $0x58] sm:$0xff] %v343_v11 }
  0x1f   : > { %346 = vst [vmem:[%s259_s20 + $0x60] sm:$0xff] %v345_v12 }
  0x20   : > { %348 = vst [vmem:[%s259_s20 + $0x68] sm:$0xff] %v347_v13 }
  0x21   : > { %350 = vst [vmem:[%s259_s20 + $0x70] sm:$0xff] %v349_v14 }
  0x22   : > { %352 = vst [vmem:[%s259_s20 + $0x78] sm:$0xff] %v351_v15 }
  0x23 PF: > { %p1342_p7 = scmp.ge.s32.totalorder %s1524_s29, 1  ;;  %p357_p8 = scmp.lt.s32.totalorder %s1524_s29, 3 }
  0x25   : > { %p358_p9 = pnand %p1342_p7, %p357_p8 }
  0x26   : > { %s364_s25 = sand.u32 (!%p358_p9), 1, %s1516_s27   ;;  %s1701_s15 = smov (!%p358_p9), 0  }
  0x27   : > { %361 = sbr.rel (%p358_p9) target bundleno = 1122 (0x462), region = 86  ;;  %s1650_s26 = sshll.u32 (!%p358_p9), %s364_s25, 7 }
  0x28   : > { %s1655_s10 = scalar_lea.vmem (!%p358_p9), [#allocation9], %s1650_s26  ;;  %s1699_s14 = scalar_lea.vmem (!%p358_p9), [#allocation10], %s1650_s26 }
  0x2c   : > { %v415_v16 = vld [vmem:[%s1904_s1 + $0x8] sm:$0xff]  ;;  %v414_v17 = vld [vmem:[%s1904_s1] sm:$0xff]  ;;  %vm420_vm0 = vcmask 130048   ;;  %v1530_v18 = vmov 0.0   ;;  %v408_v27 = vld [vmem:[%s1655_s10 + $0x50] sm:$0xff] }
  0x2d   : > { %1411 = vmatpush.msra.mxu2 %v415_v16  ;;  %1412 = vmatpush.msra.mxu3 %v415_v16  ;;  %550 = vst.msk [vmem:[#allocation5] sm:$0xff] %vm420_vm0, %v1530_v18  ;;  %v406_v19 = vld [vmem:[%s1655_s10 + $0x40] sm:$0xff]  ;;  %v407_v23 = vld [vmem:[%s1655_s10 + $0x48] sm:$0xff]  ;;  %v412_v28 = vld [vmem:[%s1655_s10 + $0x70] sm:$0xff] }
  0x2e   : > { %551 = vst.msk [vmem:[#allocation5 + $0x8] sm:$0xff] %vm420_vm0, %v1530_v18  ;;  %483 = vmatpush.msra.mxu0 %v415_v16  ;;  %1410 = vmatpush.msra.mxu1 %v415_v16  ;;  %v410_v20 = vld [vmem:[%s1655_s10 + $0x60] sm:$0xff]  ;;  %v411_v24 = vld [vmem:[%s1655_s10 + $0x68] sm:$0xff]  ;;  %v400_v29 = vld [vmem:[%s1655_s10 + $0x10] sm:$0xff] }
  0x2f   : > { %1414 = vmatpush.msra.mxu2 %v414_v17  ;;  %1415 = vmatpush.msra.mxu3 %v414_v17  ;;  %552 = vst.msk [vmem:[#allocation6] sm:$0xff] %vm420_vm0, %v1530_v18  ;;  %v398_v21 = vld [vmem:[%s1655_s10] sm:$0xff]  ;;  %v399_v25 = vld [vmem:[%s1655_s10 + $0x8] sm:$0xff]  ;;  %v404_v30 = vld [vmem:[%s1655_s10 + $0x30] sm:$0xff] }
  0x30   : > { %1353 = vmatmul.msk.f32.vlgmr.msra.gmra.mxu2 %vm420_vm0, %v406_v19  ;;  %553 = vst.msk [vmem:[#allocation6 + $0x8] sm:$0xff] %vm420_vm0, %v1530_v18  ;;  %1357 = vmatmul.msk.f32.vlgmr.msra.gmra.mxu3 %vm420_vm0, %v410_v20  ;;  %v402_v22 = vld [vmem:[%s1655_s10 + $0x20] sm:$0xff]  ;;  %v403_v26 = vld [vmem:[%s1655_s10 + $0x28] sm:$0xff]  ;;  %v409_v31 = vld [vmem:[%s1655_s10 + $0x58] sm:$0xff] }
  0x31   : > { %554 = vst.msk [vmem:[#allocation7] sm:$0xff] %vm420_vm0, %v1530_v18  ;;  %484 = vmatpush.msra.mxu0 %v414_v17  ;;  %1413 = vmatpush.msra.mxu1 %v414_v17  ;;  %v413_v32 = vld [vmem:[%s1655_s10 + $0x78] sm:$0xff]  ;;  %v1464_v35 = vld [vmem:[%s1907_s4] ss:$0 sm:$0xff] }
  0x32   : > { %555 = vst.msk [vmem:[#allocation7 + $0x8] sm:$0xff] %vm420_vm0, %v1530_v18  ;;  %1345 = vmatmul.msk.f32.vlgmr.msra.gmra.mxu0 %vm420_vm0, %v398_v21  ;;  %1349 = vmatmul.msk.f32.vlgmr.msra.gmra.mxu1 %vm420_vm0, %v402_v22  ;;  %v401_v33 = vld [vmem:[%s1655_s10 + $0x18] sm:$0xff] }
  0x33   : > { %556 = vst.msk [vmem:[#allocation8] sm:$0xff] %vm420_vm0, %v1530_v18  ;;  %v405_v34 = vld [vmem:[%s1655_s10 + $0x38] sm:$0xff] }
  0x34   : > { %557 = vst.msk [vmem:[#allocation8 + $0x8] sm:$0xff] %vm420_vm0, %v1530_v18 }
  0x38   : > { %1354 = vmatmul.msk.f32.gmra.mxu2 %vm420_vm0, %v407_v23  ;;  %1358 = vmatmul.msk.f32.gmra.mxu3 %vm420_vm0, %v411_v24 }
  0x3a   : > { %1346 = vmatmul.msk.f32.gmra.mxu0 %vm420_vm0, %v399_v25  ;;  %1350 = vmatmul.msk.f32.gmra.mxu1 %vm420_vm0, %v403_v26 }
  0x40   : > { %1355 = vmatmul.msk.f32.gmra.mxu2 %vm420_vm0, %v408_v27  ;;  %1359 = vmatmul.msk.f32.gmra.mxu3 %vm420_vm0, %v412_v28 }
  0x42   : > { %1347 = vmatmul.msk.f32.gmra.mxu0 %vm420_vm0, %v400_v29  ;;  %1351 = vmatmul.msk.f32.gmra.mxu1 %vm420_vm0, %v404_v30 }
  0x48   : > { %1356 = vmatmul.msk.f32.gmra.mxu2 %vm420_vm0, %v409_v31  ;;  %1360 = vmatmul.msk.f32.gmra.mxu3 %vm420_vm0, %v413_v32 }
  0x4a   : > { %1348 = vmatmul.msk.f32.gmra.mxu0 %vm420_vm0, %v401_v33  ;;  %1352 = vmatmul.msk.f32.gmra.mxu1 %vm420_vm0, %v405_v34 }
  0xaf   : > { %v486_v36 = vpop.f32.mrf.mxu0  ;;  %v498_v37 = vpop.f32.mrf.mxu1 }
  0xb0   : > { %v487_v38 = vadd.f32 %v1464_v35, %v486_v36  ;;  %v499_v39 = vadd.f32 %v1464_v35, %v498_v37 }
  0xb2   : > { %534 = vst [vmem:[#allocation2] sm:$0xff] %v487_v38 }
  0xb3   : > { %538 = vst [vmem:[#allocation2 + $0x20] sm:$0xff] %v499_v39  ;;  %v510_v40 = vpop.f32.mrf.mxu2  ;;  %v522_v41 = vpop.f32.mrf.mxu3 }
  0xb4   : > { %v511_v42 = vadd.f32 %v1464_v35, %v510_v40  ;;  %v523_v43 = vadd.f32 %v1464_v35, %v522_v41 }
  0xb6   : > { %542 = vst [vmem:[#allocation2 + $0x40] sm:$0xff] %v511_v42 }
  0xb7   : > { %546 = vst [vmem:[#allocation2 + $0x60] sm:$0xff] %v523_v43  ;;  %v489_v44 = vpop.f32.mrf.mxu0  ;;  %v501_v45 = vpop.f32.mrf.mxu1 }
  0xb8   : > { %v490_v46 = vadd.f32 %v1464_v35, %v489_v44  ;;  %v502_v47 = vadd.f32 %v1464_v35, %v501_v45 }
  0xba   : > { %535 = vst [vmem:[#allocation2 + $0x8] sm:$0xff] %v490_v46 }
  0xbb   : > { %539 = vst [vmem:[#allocation2 + $0x28] sm:$0xff] %v502_v47  ;;  %v513_v48 = vpop.f32.mrf.mxu2  ;;  %v525_v49 = vpop.f32.mrf.mxu3 }
  0xbc   : > { %v514_v50 = vadd.f32 %v1464_v35, %v513_v48  ;;  %v526_v51 = vadd.f32 %v1464_v35, %v525_v49 }
  0xbe   : > { %543 = vst [vmem:[#allocation2 + $0x48] sm:$0xff] %v514_v50 }
  0xbf   : > { %547 = vst [vmem:[#allocation2 + $0x68] sm:$0xff] %v526_v51  ;;  %v492_v52 = vpop.f32.mrf.mxu0  ;;  %v504_v53 = vpop.f32.mrf.mxu1 }
  0xc0   : > { %v493_v54 = vadd.f32 %v1464_v35, %v492_v52  ;;  %v505_v55 = vadd.f32 %v1464_v35, %v504_v53 }
  0xc2   : > { %536 = vst [vmem:[#allocation2 + $0x10] sm:$0xff] %v493_v54 }
  0xc3   : > { %540 = vst [vmem:[#allocation2 + $0x30] sm:$0xff] %v505_v55  ;;  %v516_v56 = vpop.f32.mrf.mxu2  ;;  %v528_v57 = vpop.f32.mrf.mxu3 }
  0xc4   : > { %v517_v58 = vadd.f32 %v1464_v35, %v516_v56  ;;  %v529_v59 = vadd.f32 %v1464_v35, %v528_v57 }
  0xc6   : > { %544 = vst [vmem:[#allocation2 + $0x50] sm:$0xff] %v517_v58 }
  0xc7   : > { %548 = vst [vmem:[#allocation2 + $0x70] sm:$0xff] %v529_v59  ;;  %v495_v60 = vpop.f32.mrf.mxu0  ;;  %v507_v61 = vpop.f32.mrf.mxu1 }
  0xc8   : > { %v496_v62 = vadd.f32 %v1464_v35, %v495_v60  ;;  %v508_v63 = vadd.f32 %v1464_v35, %v507_v61 }
  0xca   : > { %537 = vst [vmem:[#allocation2 + $0x18] sm:$0xff] %v496_v62 }
  0xcb   : > { %541 = vst [vmem:[#allocation2 + $0x38] sm:$0xff] %v508_v63  ;;  %v519_v0 = vpop.f32.mrf.mxu2  ;;  %v531_v1 = vpop.f32.mrf.mxu3 }
  0xcc   : > { %v520_v2 = vadd.f32 %v1464_v35, %v519_v0  ;;  %v532_v3 = vadd.f32 %v1464_v35, %v531_v1 }
  0xce   : > { %545 = vst [vmem:[#allocation2 + $0x58] sm:$0xff] %v520_v2 }
  0xcf   : > { %549 = vst [vmem:[#allocation2 + $0x78] sm:$0xff] %v532_v3 }
  0xd0 LB: >> { %v576_v4 = vld [vmem:[%s1905_s2 + $0x8] sm:$0xff]  ;;  %v575_v6 = vld [vmem:[%s1905_s2] sm:$0xff]  ;;  %s1361_s24 = sshll.u32 %s1528_s15, 4  ;;  %s1531_s26 = smov 64   ;;  %v651_v21 = vld [vmem:[#allocation6] sm:$0xff]  ;;  %s1528_s15 = sphi %s1701_s15, %s563_s15  }
  0xd1   : >> { %v611_v5 = vld [vmem:[%s1906_s3 + $0x8] sm:$0xff]  ;;  %597 = vmatpush.msra.mxu0 %v576_v4  ;;  %v610_v7 = vld [vmem:[%s1906_s3] sm:$0xff]  ;;  %1416 = vmatpush.msra.mxu2 %v576_v4  ;;  %s566_s25 = scalar_lea.vmem [#allocation2], %s1361_s24  ;;  %s1532_s10 = smov 96   ;;  %v736_v23 = vld [vmem:[#allocation8 + $0x8] sm:$0xff] }
  0xd2   : >> { %632 = vmatpush.msra.mxu1 %v611_v5  ;;  %v573_v8 = vld [vmem:[#allocation5] sm:$0xff]  ;;  %1418 = vmatpush.msra.mxu3 %v611_v5  ;;  %v574_v10 = vld [vmem:[#allocation5 + $0x8] sm:$0xff]  ;;  %s1533_s27 = smov 16   ;;  %v652_v24 = vld [vmem:[#allocation6 + $0x8] sm:$0xff]  ;;  %s1534_s11 = smov 80  }
  0xd3   : >> { %v608_v9 = vld [vmem:[#allocation7] sm:$0xff]  ;;  %598 = vmatpush.msra.mxu0 %v575_v6  ;;  %v609_v11 = vld [vmem:[#allocation7 + $0x8] sm:$0xff]  ;;  %1417 = vmatpush.msra.mxu2 %v575_v6  ;;  %s564_s16 = ssub.s32 7, %s1528_s15  ;;  %v735_v56 = vld [vmem:[#allocation8] sm:$0xff]  ;;  %s1535_s19 = smov 32  }
  0xd4   : >> { %633 = vmatpush.msra.mxu1 %v610_v7  ;;  %1363 = vmatmul.msk.f32.vlgmr.msra.gmra.mxu0 %vm420_vm0, %v573_v8  ;;  %s1731_s17 = sshll.u32 %s564_s16, 4  ;;  %s1536_s20 = smov 112  }
  0xd5   : >> { %1365 = vmatmul.msk.f32.vlgmr.msra.gmra.mxu1 %vm420_vm0, %v608_v9  ;;  %1419 = vmatpush.msra.mxu3 %v610_v7  ;;  %s570_s18 = scalar_lea.vmem [#allocation2], %s1731_s17  ;;  %s1537_s21 = smov 48  }
  0xd6   : >> { %1364 = vmatmul.msk.f32.vlgmr.msra.gmra.mxu2 %vm420_vm0, %v574_v10  ;;  %1366 = vmatmul.msk.f32.vlgmr.msra.gmra.mxu3 %vm420_vm0, %v609_v11  ;;  %v567_v12 = vld [vmem:[%s566_s25] sm:$0xff]  ;;  %v568_v16 = vld [vmem:[%s566_s25 + $0x8] sm:$0xff]  ;;  %s859_s22 = scalar_lea.vmem [#allocation3], %s1361_s24  ;;  %s862_s23 = scalar_lea.vmem [#allocation4], %s1731_s17 }
  0xd7   : >> { %v571_v34 = vld [vmem:[%s570_s18] sm:$0xff]  ;;  %v572_v42 = vld [vmem:[%s570_s18 + $0x8] sm:$0xff]  ;;  %s563_s15 = sadd.s32 1, %s1528_s15  }
  0xd8   : >> { %p560_p10 = scmp.ge.s32.totalorder %s563_s15, 8  }
 0x151   : >> { %v600_v13 = vpop.f32.mrf.mxu0 }
 0x152   : >> { %v635_v14 = vpop.f32.mrf.mxu1  ;;  %v606_v15 = vadd.f32 %v600_v13, %v567_v12 }
 0x153   : >> { %643 = vrot.lane.b32.xlu0 %v635_v14, %s1531_s26 }
 0x154   : >> { %1465 = vtanh.f32 %v606_v15  ;;  %v1367_v25 = vmul.f32 -1.442695, %v606_v15 }
 0x159   : >> { %v603_v17 = vpop.f32.mrf.mxu2  ;;  %v638_v18 = vpop.f32.mrf.mxu3 }
 0x15a   : >> { %v1466_v19 = vpop.eup %1465  ;;  %v607_v20 = vadd.f32 %v603_v17, %v568_v16 }
 0x15b   : >> { %645 = vrot.lane.b32.xlu0 %v638_v18, %s1531_s26  ;;  %705 = vrot.lane.b32.xlu1 %v1466_v19, %s1532_s10 }
 0x15c   : >> { %1467 = vtanh.f32 %v607_v20  ;;  %v1368_v28 = vmul.f32 -1.442695, %v607_v20 }
 0x15d   : >> { %1469 = vpow2.f32 %v1367_v25 }
 0x162   : >> { %v1468_v22 = vpop.eup %1467 }
 0x163   : >> { %695 = vrot.lane.b32.xlu0 %v651_v21, %s1533_s27  ;;  %707 = vrot.lane.b32.xlu1 %v1468_v22, %s1532_s10  ;;  %v1470_v26 = vpop.eup %1469 }
 0x164   : >> { %v659_v27 = vadd.f32 1.0, %v1470_v26 }
 0x166   : >> { %1471 = vrcp.f32 %v659_v27  ;;  %vm666_vm1 = vweird.f32 %v659_v27  ;;  %v672_v38 = vand.u32 2147483648, %v659_v27  ;;  %v670_v40 = vand.u32 2147483647, %v659_v27 }
 0x167   : >> { %1473 = vpow2.f32 %v1368_v28 }
 0x168   : >> { %v673_v41 = vor.u32 1.1754944e-38, %v672_v38  ;;  %vm671_vm4 = vcmp.eq.f32.partialorder %v670_v40, 8.507059e+37 }
 0x16b   : >> { %781 = vrot.lane.b32.xlu0 %v736_v23, %s1534_s11  ;;  %697 = vrot.lane.b32.xlu1 %v652_v24, %s1533_s27 }
 0x16c   : >> { %v1472_v29 = vpop.eup %1471 }
 0x16d   : >> { %v662_v30 = vmul.f32 %v1472_v29, %v659_v27  ;;  %v1474_v32 = vpop.eup %1473  ;;  %vm667_vm2 = vweird.f32 %v1472_v29 }
 0x16e   : >> { %v660_v33 = vadd.f32 1.0, %v1474_v32  ;;  %vm668_vm3 = vmor %vm666_vm1, %vm667_vm2 }
 0x16f   : >> { %v663_v31 = vsub.f32 1.0, %v662_v30 }
 0x170   : >> { %1475 = vrcp.f32 %v660_v33  ;;  %vm681_vm5 = vweird.f32 %v660_v33  ;;  %v687_v55 = vand.u32 2147483648, %v660_v33  ;;  %v685_v58 = vand.u32 2147483647, %v660_v33 }
 0x171   : >> { %v664_v35 = vmul.f32 %v1472_v29, %v663_v31 }
 0x172   : >> { %v688_v59 = vor.u32 1.1754944e-38, %v687_v55  ;;  %vm686_vm8 = vcmp.eq.f32.partialorder %v685_v58, 8.507059e+37 }
 0x173   : >> { %v665_v39 = vadd.f32 %v1472_v29, %v664_v35 }
 0x175   : >> { %v669_v43 = vsel %vm668_vm3, %v1472_v29, %v665_v39 }
 0x176   : >> { %v1476_v44 = vpop.eup %1475  ;;  %v1734_v49 = vsel %vm671_vm4, %v673_v41, %v669_v43 }
 0x177   : >> { %v677_v51 = vmul.f32 %v1476_v44, %v660_v33  ;;  %vm682_vm6 = vweird.f32 %v1476_v44 }
 0x178   : >> { %vm683_vm7 = vmor %vm681_vm5, %vm682_vm6 }
 0x179   : >> { %v678_v52 = vsub.f32 1.0, %v677_v51 }
 0x17b   : >> { %v679_v54 = vmul.f32 %v1476_v44, %v678_v52 }
 0x17d   : >> { %v680_v57 = vadd.f32 %v1476_v44, %v679_v54 }
 0x17f   : >> { %v684_v60 = vsel %vm683_vm7, %v1476_v44, %v680_v57 }
 0x180   : >> { %v1741_v62 = vsel %vm686_vm8, %v688_v59, %v684_v60 }
 0x1c5   : >> { %v644_v36 = vpop.permute.xlu0 %643 }
 0x1c6   : >> { %v649_v37 = vadd.f32 %v644_v36, %v571_v34 }
 0x1c8   : >> { %1477 = vtanh.f32 %v649_v37  ;;  %v1369_v0 = vmul.f32 -1.442695, %v649_v37 }
 0x1cd   : >> { %v646_v45 = vpop.permute.xlu0 %645  ;;  %v706_v48 = vpop.permute.xlu1 %705 }
 0x1ce   : >> { %v1478_v46 = vpop.eup %1477  ;;  %v650_v47 = vadd.f32 %v646_v45, %v572_v42  ;;  %v711_v50 = vmul.f32 %v706_v48, %v1734_v49 }
 0x1cf   : >> { %789 = vrot.lane.b32.xlu2 %v1478_v46, %s1532_s10 }
 0x1d0   : >> { %1479 = vtanh.f32 %v650_v47  ;;  %715 = vrot.lane.b32.xlu1 %v711_v50, %s1533_s27  ;;  %v1370_v1 = vmul.f32 -1.442695, %v650_v47 }
 0x1d1   : >> { %1481 = vpow2.f32 %v1369_v0 }
 0x1d2   : >> { %1483 = vpow2.f32 %v1370_v1 }
 0x1d5   : >> { %v708_v61 = vpop.permute.xlu1 %707  ;;  %v696_v32 = vpop.permute.xlu0 %695 }
 0x1d6   : >> { %v1480_v53 = vpop.eup %1479  ;;  %v712_v63 = vmul.f32 %v708_v61, %v1741_v62  ;;  %v701_v35 = vmul.f32 %v696_v32, %v1734_v49 }
 0x1d7   : >> { %791 = vrot.lane.b32.xlu2 %v1480_v53, %s1532_s10  ;;  %v1482_v2 = vpop.eup %1481 }
 0x1d8   : >> { %v743_v3 = vadd.f32 1.0, %v1482_v2  ;;  %v1484_v4 = vpop.eup %1483  ;;  %v900_v2 = vld [vmem:[%s1909_s6 + $0x8] sm:$0xff] (%p560_p10) }
 0x1d9   : >> { %v744_v5 = vadd.f32 1.0, %v1484_v4  ;;  %v899_v4 = vld [vmem:[%s1909_s6] sm:$0xff] (%p560_p10)  ;;  %1420 = vmatpush.msra.mxu2 (%p560_p10), %v900_v2  ;;  %963 = vmatpush.msra.mxu0 (%p560_p10), %v900_v2 }
 0x1da   : >> { %1485 = vrcp.f32 %v743_v3  ;;  %v756_v14 = vand.u32 2147483648, %v743_v3  ;;  %vm750_vm10 = vweird.f32 %v743_v3  ;;  %v754_v15 = vand.u32 2147483647, %v743_v3 }
 0x1db   : >> { %1487 = vrcp.f32 %v744_v5  ;;  %vm765_vm12 = vweird.f32 %v744_v5  ;;  %v771_v19 = vand.u32 2147483648, %v744_v5  ;;  %v769_v23 = vand.u32 2147483647, %v744_v5  ;;  %1421 = vmatpush.msra.mxu2 (%p560_p10), %v899_v4  ;;  %964 = vmatpush.msra.mxu0 (%p560_p10), %v899_v4 }
 0x1dc   : >> { %v757_v18 = vor.u32 1.1754944e-38, %v756_v14  ;;  %vm755_vm14 = vcmp.eq.f32.partialorder %v754_v15, 8.507059e+37 }
 0x1dd   : >> { %v772_v25 = vor.u32 1.1754944e-38, %v771_v19  ;;  %vm770_vm1 = vcmp.eq.f32.partialorder %v769_v23, 8.507059e+37  ;;  %v698_v31 = vpop.permute.xlu1 %697  ;;  %v782_v41 = vpop.permute.xlu0 %781 }
 0x1de   : >> { %v702_v33 = vmul.f32 %v698_v31, %v1741_v62 }
 0x1df   : >> { %779 = vrot.lane.b32.xlu2 %v735_v56, %s1534_s11 }
 0x1e0   : >> { %v1486_v6 = vpop.eup %1485 }
 0x1e1   : >> { %v746_v7 = vmul.f32 %v1486_v6, %v743_v3  ;;  %v1488_v9 = vpop.eup %1487  ;;  %vm751_vm9 = vweird.f32 %v1486_v6  ;;  %v898_v3 = vld [vmem:[%s1908_s5 + $0x8] sm:$0xff] (%p560_p10) }
 0x1e2   : >> { %v761_v10 = vmul.f32 %v1488_v9, %v744_v5  ;;  %vm752_vm11 = vmor %vm750_vm10, %vm751_vm9  ;;  %vm766_vm13 = vweird.f32 %v1488_v9  ;;  %1422 = vmatpush.msra.mxu3 (%p560_p10), %v898_v3  ;;  %v897_v5 = vld [vmem:[%s1908_s5] sm:$0xff] (%p560_p10)  ;;  %1076 = vmatpush.msra.mxu1 (%p560_p10), %v898_v3 }
 0x1e3   : >> { %v747_v8 = vsub.f32 1.0, %v746_v7  ;;  %vm767_vm15 = vmor %vm765_vm12, %vm766_vm13 }
 0x1e4   : >> { %v762_v12 = vsub.f32 1.0, %v761_v10  ;;  %1423 = vmatpush.msra.mxu3 (%p560_p10), %v897_v5  ;;  %1077 = vmatpush.msra.mxu1 (%p560_p10), %v897_v5 }
 0x1e5   : >> { %v748_v11 = vmul.f32 %v1486_v6, %v747_v8 }
 0x1e6   : >> { %v763_v16 = vmul.f32 %v1488_v9, %v762_v12 }
 0x1e7   : >> { %717 = vrot.lane.b32.xlu2 %v712_v63, %s1533_s27  ;;  %v749_v13 = vadd.f32 %v1486_v6, %v748_v11 }
 0x1e8   : >> { %v764_v22 = vadd.f32 %v1488_v9, %v763_v16 }
 0x1e9   : >> { %v753_v17 = vsel %vm752_vm11, %v1486_v6, %v749_v13 }
 0x1ea   : >> { %v758_v21 = vsel %vm755_vm14, %v757_v18, %v753_v17  ;;  %v768_v26 = vsel %vm767_vm15, %v1488_v9, %v764_v22 }
 0x1eb   : >> { %v773_v27 = vsel %vm770_vm1, %v772_v25, %v768_v26 }
 0x1ec   : >> { %v786_v45 = vmul.f32 %v782_v41, %v773_v27 }
 0x229   : >> { %v790_v20 = vpop.permute.xlu2 %789 }
 0x22a   : >> { %v795_v24 = vmul.f32 %v790_v20, %v758_v21 }
 0x22c   : >> { %799 = vrot.lane.b32.xlu0 %v795_v24, %s1533_s27 }
 0x231   : >> { %v792_v28 = vpop.permute.xlu2 %791 }
 0x232   : >> { %v796_v29 = vmul.f32 %v792_v28, %v773_v27 }
 0x234   : >> { %801 = vrot.lane.b32.xlu1 %v796_v29, %s1533_s27 }
 0x239   : >> { %v780_v30 = vpop.permute.xlu2 %779 }
 0x23a   : >> { %v785_v42 = vmul.f32 %v780_v30, %v758_v21 }
 0x241   : >> { %v718_v34 = vpop.permute.xlu2 %717 }
 0x242   : >> { %v722_v36 = vadd.f32 %v718_v34, %v702_v33  ;;  %v716_v37 = vpop.permute.xlu1 %715 }
 0x243   : >> { %v721_v38 = vadd.f32 %v716_v37, %v701_v35 }
 0x244   : >> { %1489 = vtanh.f32 %v722_v36 }
 0x245   : >> { %1491 = vtanh.f32 %v721_v38 }
 0x24a   : >> { %v1490_v39 = vpop.eup %1489 }
 0x24b   : >> { %729 = vrot.lane.b32.xlu0 %v1490_v39, %s1535_s19  ;;  %v1492_v40 = vpop.eup %1491 }
 0x24c   : >> { %727 = vrot.lane.b32.xlu2 %v1492_v40, %s1535_s19 }
 0x29e   : >> { %v800_v43 = vpop.permute.xlu0 %799 }
 0x29f   : >> { %v805_v44 = vadd.f32 %v800_v43, %v785_v42 }
 0x2a1   : >> { %1493 = vtanh.f32 %v805_v44 }
 0x2a6   : >> { %v802_v46 = vpop.permute.xlu1 %801  ;;  %v728_v50 = vpop.permute.xlu2 %727 }
 0x2a7   : >> { %v1494_v47 = vpop.eup %1493  ;;  %v806_v48 = vadd.f32 %v802_v46, %v786_v45  ;;  %v733_v51 = vmul.f32 %v728_v50, %v1734_v49 }
 0x2a8   : >> { %811 = vrot.lane.b32.xlu1 %v1494_v47, %s1535_s19 }
 0x2a9   : >> { %1495 = vtanh.f32 %v806_v48  ;;  %821 = vrot.lane.b32.xlu0 %v733_v51, %s1534_s11 }
 0x2af   : >> { %v1496_v52 = vpop.eup %1495 }
 0x2b0   : >> { %813 = vrot.lane.b32.xlu2 %v1496_v52, %s1535_s19 }
 0x2b1   : >> { %833 = vrot.lane.b32.xlu0 %v722_v36, %s1536_s20 }
 0x2b8   : >> { %831 = vrot.lane.b32.xlu2 %v721_v38, %s1536_s20  ;;  %v1820_v38 = vld [vmem:[%s1910_s7] ss:$0 sm:$0xff] (%p560_p10) }
 0x2b9   : >> { %851 = vrot.lane.b32.xlu0 %v805_v44, %s1537_s21 }
 0x2bd   : >> { %v730_v53 = vpop.permute.xlu0 %729 }
 0x2be   : >> { %v734_v54 = vmul.f32 %v730_v53, %v1741_v62 }
 0x2c0   : >> { %823 = vrot.lane.b32.xlu1 %v734_v54, %s1534_s11 }
 0x30a   : >> { %v814_v55 = vpop.permute.xlu2 %813 }
 0x30b   : >> { %v818_v56 = vmul.f32 %v814_v55, %v773_v27 }
 0x30d   : >> { %843 = vrot.lane.b32.xlu2 %v818_v56, %s1533_s27 }
 0x312   : >> { %v832_v49 = vpop.permute.xlu2 %831 }
 0x313   : >> { %837 = vst.msk [vmem:[#allocation6] sm:$0xff] %vm420_vm0, %v832_v49 }
 0x31a   : >> { %v812_v57 = vpop.permute.xlu1 %811 }
 0x31b   : >> { %v817_v58 = vmul.f32 %v812_v57, %v758_v21  ;;  %v822_v59 = vpop.permute.xlu0 %821 }
 0x31c   : >> { %827 = vst.msk [vmem:[#allocation5] sm:$0xff] %vm420_vm0, %v822_v59 }
 0x31d   : >> { %841 = vrot.lane.b32.xlu1 %v817_v58, %s1533_s27  ;;  %860 = vst.msk [vmem:[%s859_s22] sm:$0xff] %vm420_vm0, %v822_v59 }
 0x323   : >> { %v834_v60 = vpop.permute.xlu0 %833 }
 0x324   : >> { %838 = vst.msk [vmem:[#allocation6 + $0x8] sm:$0xff] %vm420_vm0, %v834_v60 }
 0x325   : >> { %853 = vrot.lane.b32.xlu1 %v806_v48, %s1537_s21 }
 0x32b   : >> { %v852_v61 = vpop.permute.xlu0 %851 }
 0x32c   : >> { %857 = vst.msk [vmem:[#allocation8] sm:$0xff] %vm420_vm0, %v852_v61 }
 0x332   : >> { %v824_v62 = vpop.permute.xlu1 %823 }
 0x333   : >> { %828 = vst.msk [vmem:[#allocation5 + $0x8] sm:$0xff] %vm420_vm0, %v824_v62 }
 0x334   : >> { %861 = vst.msk [vmem:[%s859_s22 + $0x8] sm:$0xff] %vm420_vm0, %v824_v62 }
 0x33b   : > { %v873_v7 = vld [vmem:[#allocation3 + $0x40] sm:$0xff] (%p560_p10)  ;;  %v874_v11 = vld [vmem:[#allocation3 + $0x48] sm:$0xff] (%p560_p10)  ;;  %v875_v15 = vld [vmem:[#allocation3 + $0x50] sm:$0xff] (%p560_p10) }
 0x33c   : > { %v865_v9 = vld [vmem:[#allocation3] sm:$0xff] (%p560_p10)  ;;  %1395 = vmatmul.msk.f32.vlgmr.msra.gmra.mxu3 (%p560_p10), %vm420_vm0, %v873_v7  ;;  %v866_v13 = vld [vmem:[#allocation3 + $0x8] sm:$0xff] (%p560_p10)  ;;  %v867_v17 = vld [vmem:[#allocation3 + $0x10] sm:$0xff] (%p560_p10) }
 0x33d   : > { %1387 = vmatmul.msk.f32.vlgmr.msra.gmra.mxu1 (%p560_p10), %vm420_vm0, %v865_v9  ;;  %v876_v19 = vld [vmem:[#allocation3 + $0x58] sm:$0xff] (%p560_p10)  ;;  %v877_v23 = vld [vmem:[#allocation3 + $0x60] sm:$0xff] (%p560_p10)  ;;  %v878_v27 = vld [vmem:[#allocation3 + $0x68] sm:$0xff] (%p560_p10) }
 0x33e   : > { %v868_v21 = vld [vmem:[#allocation3 + $0x18] sm:$0xff] (%p560_p10)  ;;  %v869_v25 = vld [vmem:[#allocation3 + $0x20] sm:$0xff] (%p560_p10)  ;;  %v870_v29 = vld [vmem:[#allocation3 + $0x28] sm:$0xff] (%p560_p10) }
 0x33f   : > { %v879_v31 = vld [vmem:[#allocation3 + $0x70] sm:$0xff] (%p560_p10)  ;;  %v880_v35 = vld [vmem:[#allocation3 + $0x78] sm:$0xff] (%p560_p10) }
 0x340   : > { %v871_v33 = vld [vmem:[#allocation3 + $0x30] sm:$0xff] (%p560_p10)  ;;  %v872_v37 = vld [vmem:[#allocation3 + $0x38] sm:$0xff] (%p560_p10) }
 0x344   : > { %1396 = vmatmul.msk.f32.gmra.mxu3 (%p560_p10), %vm420_vm0, %v874_v11 }
 0x345   : > { %1388 = vmatmul.msk.f32.gmra.mxu1 (%p560_p10), %vm420_vm0, %v866_v13 }
 0x34c   : > { %1397 = vmatmul.msk.f32.gmra.mxu3 (%p560_p10), %vm420_vm0, %v875_v15 }
 0x34d   : > { %1389 = vmatmul.msk.f32.gmra.mxu1 (%p560_p10), %vm420_vm0, %v867_v17 }
 0x354   : > { %1398 = vmatmul.msk.f32.gmra.mxu3 (%p560_p10), %vm420_vm0, %v876_v19 }
 0x355   : > { %1390 = vmatmul.msk.f32.gmra.mxu1 (%p560_p10), %vm420_vm0, %v868_v21 }
 0x35c   : > { %1399 = vmatmul.msk.f32.gmra.mxu3 (%p560_p10), %vm420_vm0, %v877_v23 }
 0x35d   : > { %1391 = vmatmul.msk.f32.gmra.mxu1 (%p560_p10), %vm420_vm0, %v869_v25 }
 0x364   : > { %1400 = vmatmul.msk.f32.gmra.mxu3 (%p560_p10), %vm420_vm0, %v878_v27 }
 0x365   : > { %1392 = vmatmul.msk.f32.gmra.mxu1 (%p560_p10), %vm420_vm0, %v870_v29 }
 0x367   : >> { %v844_v63 = vpop.permute.xlu2 %843 }
 0x368   : >> { %848 = vst.msk [vmem:[#allocation7 + $0x8] sm:$0xff] %vm420_vm0, %v844_v63 }
 0x369   : >> { %864 = vst.msk [vmem:[%s862_s23 + $0x8] sm:$0xff] %vm420_vm0, %v844_v63 }
 0x36c   : > { %1401 = vmatmul.msk.f32.gmra.mxu3 (%p560_p10), %vm420_vm0, %v879_v31 }
 0x36d   : > { %1393 = vmatmul.msk.f32.gmra.mxu1 (%p560_p10), %vm420_vm0, %v871_v33 }
 0x374   : > { %1402 = vmatmul.msk.f32.gmra.mxu3 (%p560_p10), %vm420_vm0, %v880_v35 }
 0x375   : > { %1394 = vmatmul.msk.f32.gmra.mxu1 (%p560_p10), %vm420_vm0, %v872_v37 }
 0x38f   : >> { %v842_v0 = vpop.permute.xlu1 %841 }
 0x390   : >> { %847 = vst.msk [vmem:[#allocation7] sm:$0xff] %vm420_vm0, %v842_v0 }
 0x391   : >> { %863 = vst.msk [vmem:[%s862_s23] sm:$0xff] %vm420_vm0, %v842_v0 }
 0x394   : > { %562 = sbr.rel (!%p560_p10) target bundleno = 208 (0xd0), region = 174 }
 0x397   : >> { %v854_v1 = vpop.permute.xlu1 %853 }
 0x398   : >> { %858 = vst.msk [vmem:[#allocation8 + $0x8] sm:$0xff] %vm420_vm0, %v854_v1  ;;  %v889_v6 = vld [vmem:[#allocation4 + $0x40] sm:$0xff] (%p560_p10)  ;;  %v890_v10 = vld [vmem:[#allocation4 + $0x48] sm:$0xff] (%p560_p10)  ;;  %v891_v14 = vld [vmem:[#allocation4 + $0x50] sm:$0xff] (%p560_p10) }
 0x399   : > { %v881_v8 = vld [vmem:[#allocation4] sm:$0xff]  ;;  %1379 = vmatmul.msk.f32.vlgmr.msra.gmra.mxu2 %vm420_vm0, %v889_v6  ;;  %v882_v12 = vld [vmem:[#allocation4 + $0x8] sm:$0xff]  ;;  %v883_v16 = vld [vmem:[#allocation4 + $0x10] sm:$0xff]  ;;  %s1409_s19 = sshll.u32 (%p1613_p5), %s1335_s30, 4 }
 0x39a   : > { %1371 = vmatmul.msk.f32.vlgmr.msra.gmra.mxu0 %vm420_vm0, %v881_v8  ;;  %v892_v18 = vld [vmem:[#allocation4 + $0x58] sm:$0xff]  ;;  %v893_v22 = vld [vmem:[#allocation4 + $0x60] sm:$0xff]  ;;  %v894_v26 = vld [vmem:[#allocation4 + $0x68] sm:$0xff]  ;;  %s1172_s13 = scalar_lea.vmem (%p1613_p5), %s1911_s8, %s1409_s19 }
 0x39b   : > { %v884_v20 = vld [vmem:[#allocation4 + $0x18] sm:$0xff]  ;;  %v885_v24 = vld [vmem:[#allocation4 + $0x20] sm:$0xff]  ;;  %v886_v28 = vld [vmem:[#allocation4 + $0x28] sm:$0xff] }
 0x39c   : > { %v895_v30 = vld [vmem:[#allocation4 + $0x70] sm:$0xff]  ;;  %v896_v34 = vld [vmem:[#allocation4 + $0x78] sm:$0xff] }
 0x39d   : > { %v887_v32 = vld [vmem:[#allocation4 + $0x30] sm:$0xff]  ;;  %v888_v36 = vld [vmem:[#allocation4 + $0x38] sm:$0xff] }
 0x3a1   : > { %1380 = vmatmul.msk.f32.gmra.mxu2 %vm420_vm0, %v890_v10 }
 0x3a2   : > { %1372 = vmatmul.msk.f32.gmra.mxu0 %vm420_vm0, %v882_v12 }
 0x3a9   : > { %1381 = vmatmul.msk.f32.gmra.mxu2 %vm420_vm0, %v891_v14 }
 0x3aa   : > { %1373 = vmatmul.msk.f32.gmra.mxu0 %vm420_vm0, %v883_v16 }
 0x3b1   : > { %1382 = vmatmul.msk.f32.gmra.mxu2 %vm420_vm0, %v892_v18 }
 0x3b2   : > { %1374 = vmatmul.msk.f32.gmra.mxu0 %vm420_vm0, %v884_v20 }
 0x3b9   : > { %1383 = vmatmul.msk.f32.gmra.mxu2 %vm420_vm0, %v893_v22 }
 0x3ba   : > { %1375 = vmatmul.msk.f32.gmra.mxu0 %vm420_vm0, %v885_v24  ;;  %v1079_v40 = vpop.f32.mrf.mxu1 }
 0x3bf   : > { %v1103_v44 = vpop.f32.mrf.mxu3 }
 0x3c1   : > { %1384 = vmatmul.msk.f32.gmra.mxu2 %vm420_vm0, %v894_v26 }
 0x3c2   : > { %1376 = vmatmul.msk.f32.gmra.mxu0 %vm420_vm0, %v886_v28  ;;  %v1082_v48 = vpop.f32.mrf.mxu1 }
 0x3c7   : > { %v1106_v53 = vpop.f32.mrf.mxu3 }
 0x3c9   : > { %1385 = vmatmul.msk.f32.gmra.mxu2 %vm420_vm0, %v895_v30 }
 0x3ca   : > { %1377 = vmatmul.msk.f32.gmra.mxu0 %vm420_vm0, %v887_v32  ;;  %v1085_v49 = vpop.f32.mrf.mxu1 }
 0x3cf   : > { %v1109_v60 = vpop.f32.mrf.mxu3 }
 0x3d1   : > { %1386 = vmatmul.msk.f32.gmra.mxu2 %vm420_vm0, %v896_v34 }
 0x3d2   : > { %1378 = vmatmul.msk.f32.gmra.mxu0 %vm420_vm0, %v888_v36  ;;  %v1088_v0 = vpop.f32.mrf.mxu1 }
 0x3d7   : > { %v1112_v4 = vpop.f32.mrf.mxu3 }
 0x3da   : > { %v1091_v8 = vpop.f32.mrf.mxu1 }
 0x3df   : > { %v1115_v12 = vpop.f32.mrf.mxu3 }
 0x3e2   : > { %v1094_v16 = vpop.f32.mrf.mxu1 }
 0x3e7   : > { %v1118_v20 = vpop.f32.mrf.mxu3 }
 0x3ea   : > { %v1097_v24 = vpop.f32.mrf.mxu1 }
 0x3ef   : > { %v1121_v28 = vpop.f32.mrf.mxu3 }
 0x3f2   : > { %v1100_v32 = vpop.f32.mrf.mxu1 }
 0x3f7   : > { %v1124_v36 = vpop.f32.mrf.mxu3 }
 0x417   : > { %v966_v39 = vpop.f32.mrf.mxu0 }
 0x418   : > { %v1080_v41 = vadd.f32 %v1079_v40, %v966_v39 }
 0x41a   : > { %v1131_v42 = vadd.f32 %v1820_v38, %v1080_v41 }
 0x41c   : > { %v990_v43 = vpop.f32.mrf.mxu2  ;;  %1147 = vst.msk [vmem:[%s1699_s14] sm:$0xff] %vm420_vm0, %v1131_v42 }
 0x41d   : > { %v1104_v45 = vadd.f32 %v1103_v44, %v990_v43 }
 0x41f   : > { %v1139_v46 = vadd.f32 %v1820_v38, %v1104_v45  ;;  %v969_v47 = vpop.f32.mrf.mxu0 }
 0x420   : > { %v1083_v50 = vadd.f32 %v1082_v48, %v969_v47 }
 0x421   : > { %1155 = vst.msk [vmem:[%s1699_s14 + $0x40] sm:$0xff] %vm420_vm0, %v1139_v46 }
 0x422   : > { %v1132_v51 = vadd.f32 %v1820_v38, %v1083_v50 }
 0x423   : > { %v1231_v40 = vld [vmem:[%s1699_s14] sm:$0xff] (%p1613_p5) }
 0x424   : > { %v993_v52 = vpop.f32.mrf.mxu2  ;;  %1148 = vst.msk [vmem:[%s1699_s14 + $0x8] sm:$0xff] %vm420_vm0, %v1132_v51 }
 0x425   : > { %v1107_v54 = vadd.f32 %v1106_v53, %v993_v52  ;;  %1232 = vst [vmem:[%s1172_s13] sm:$0xff] (%p1613_p5), %v1231_v40 }
 0x427   : > { %v1140_v55 = vadd.f32 %v1820_v38, %v1107_v54  ;;  %v972_v56 = vpop.f32.mrf.mxu0 }
 0x428   : > { %v1086_v57 = vadd.f32 %v1085_v49, %v972_v56  ;;  %v1247_v47 = vld [vmem:[%s1699_s14 + $0x40] sm:$0xff] (%p1613_p5) }
 0x429   : > { %1156 = vst.msk [vmem:[%s1699_s14 + $0x48] sm:$0xff] %vm420_vm0, %v1140_v55 }
 0x42a   : > { %v1133_v58 = vadd.f32 %v1820_v38, %v1086_v57  ;;  %1248 = vst [vmem:[%s1172_s13 + $0x80] sm:$0xff] (%p1613_p5), %v1247_v47 }
 0x42b   : > { %v1233_v41 = vld [vmem:[%s1699_s14 + $0x8] sm:$0xff] (%p1613_p5) }
 0x42c   : > { %v996_v59 = vpop.f32.mrf.mxu2  ;;  %1149 = vst.msk [vmem:[%s1699_s14 + $0x10] sm:$0xff] %vm420_vm0, %v1133_v58 }
 0x42d   : > { %v1110_v61 = vadd.f32 %v1109_v60, %v996_v59  ;;  %1234 = vst [vmem:[%s1172_s13 + $0x8] sm:$0xff] (%p1613_p5), %v1233_v41 }
 0x42f   : > { %v1141_v62 = vadd.f32 %v1820_v38, %v1110_v61  ;;  %v975_v63 = vpop.f32.mrf.mxu0 }
 0x430   : > { %v1089_v1 = vadd.f32 %v1088_v0, %v975_v63  ;;  %v1249_v48 = vld [vmem:[%s1699_s14 + $0x48] sm:$0xff] (%p1613_p5) }
 0x431   : > { %1157 = vst.msk [vmem:[%s1699_s14 + $0x50] sm:$0xff] %vm420_vm0, %v1141_v62 }
 0x432   : > { %v1134_v2 = vadd.f32 %v1820_v38, %v1089_v1  ;;  %1250 = vst [vmem:[%s1172_s13 + $0x88] sm:$0xff] (%p1613_p5), %v1249_v48 }
 0x434   : > { %v999_v3 = vpop.f32.mrf.mxu2  ;;  %1150 = vst.msk [vmem:[%s1699_s14 + $0x18] sm:$0xff] %vm420_vm0, %v1134_v2 }
 0x435   : > { %v1113_v5 = vadd.f32 %v1112_v4, %v999_v3 }
 0x437   : > { %v1142_v6 = vadd.f32 %v1820_v38, %v1113_v5  ;;  %v978_v7 = vpop.f32.mrf.mxu0 }
 0x438   : > { %v1092_v9 = vadd.f32 %v1091_v8, %v978_v7  ;;  %v1251_v50 = vld [vmem:[%s1699_s14 + $0x50] sm:$0xff] (%p1613_p5) }
 0x439   : > { %1158 = vst.msk [vmem:[%s1699_s14 + $0x58] sm:$0xff] %vm420_vm0, %v1142_v6 }
 0x43a   : > { %v1135_v10 = vadd.f32 %v1820_v38, %v1092_v9  ;;  %1252 = vst [vmem:[%s1172_s13 + $0xa0] sm:$0xff] (%p1613_p5), %v1251_v50 }
 0x43b   : > { %v1237_v42 = vld [vmem:[%s1699_s14 + $0x18] sm:$0xff] (%p1613_p5) }
 0x43c   : > { %v1002_v11 = vpop.f32.mrf.mxu2  ;;  %1151 = vst.msk [vmem:[%s1699_s14 + $0x20] sm:$0xff] %vm420_vm0, %v1135_v10 }
 0x43d   : > { %v1116_v13 = vadd.f32 %v1115_v12, %v1002_v11  ;;  %1238 = vst [vmem:[%s1172_s13 + $0x28] sm:$0xff] (%p1613_p5), %v1237_v42 }
 0x43f   : > { %v1143_v14 = vadd.f32 %v1820_v38, %v1116_v13  ;;  %v981_v15 = vpop.f32.mrf.mxu0 }
 0x440   : > { %v1095_v17 = vadd.f32 %v1094_v16, %v981_v15  ;;  %v1253_v51 = vld [vmem:[%s1699_s14 + $0x58] sm:$0xff] (%p1613_p5) }
 0x441   : > { %1159 = vst.msk [vmem:[%s1699_s14 + $0x60] sm:$0xff] %vm420_vm0, %v1143_v14 }
 0x442   : > { %v1136_v18 = vadd.f32 %v1820_v38, %v1095_v17  ;;  %1254 = vst [vmem:[%s1172_s13 + $0xa8] sm:$0xff] (%p1613_p5), %v1253_v51 }
 0x443   : > { %v1239_v43 = vld [vmem:[%s1699_s14 + $0x20] sm:$0xff] (%p1613_p5) }
 0x444   : > { %v1005_v19 = vpop.f32.mrf.mxu2  ;;  %1152 = vst.msk [vmem:[%s1699_s14 + $0x28] sm:$0xff] %vm420_vm0, %v1136_v18 }
 0x445   : > { %v1119_v21 = vadd.f32 %v1118_v20, %v1005_v19  ;;  %1240 = vst [vmem:[%s1172_s13 + $0x40] sm:$0xff] (%p1613_p5), %v1239_v43 }
 0x447   : > { %v1144_v22 = vadd.f32 %v1820_v38, %v1119_v21  ;;  %v984_v23 = vpop.f32.mrf.mxu0 }
 0x448   : > { %v1098_v25 = vadd.f32 %v1097_v24, %v984_v23  ;;  %v1255_v52 = vld [vmem:[%s1699_s14 + $0x60] sm:$0xff] (%p1613_p5) }
 0x449   : > { %1160 = vst.msk [vmem:[%s1699_s14 + $0x68] sm:$0xff] %vm420_vm0, %v1144_v22 }
 0x44a   : > { %v1137_v26 = vadd.f32 %v1820_v38, %v1098_v25  ;;  %1256 = vst [vmem:[%s1172_s13 + $0xc0] sm:$0xff] (%p1613_p5), %v1255_v52 }
 0x44b   : > { %v1241_v44 = vld [vmem:[%s1699_s14 + $0x28] sm:$0xff] (%p1613_p5) }
 0x44c   : > { %v1008_v27 = vpop.f32.mrf.mxu2  ;;  %1153 = vst.msk [vmem:[%s1699_s14 + $0x30] sm:$0xff] %vm420_vm0, %v1137_v26 }
 0x44d   : > { %v1122_v29 = vadd.f32 %v1121_v28, %v1008_v27  ;;  %1242 = vst [vmem:[%s1172_s13 + $0x48] sm:$0xff] (%p1613_p5), %v1241_v44 }
 0x44f   : > { %v1145_v30 = vadd.f32 %v1820_v38, %v1122_v29  ;;  %v987_v31 = vpop.f32.mrf.mxu0 }
 0x450   : > { %v1101_v33 = vadd.f32 %v1100_v32, %v987_v31  ;;  %v1257_v53 = vld [vmem:[%s1699_s14 + $0x68] sm:$0xff] (%p1613_p5) }
 0x451   : > { %1161 = vst.msk [vmem:[%s1699_s14 + $0x70] sm:$0xff] %vm420_vm0, %v1145_v30 }
 0x452   : > { %v1138_v34 = vadd.f32 %v1820_v38, %v1101_v33  ;;  %1258 = vst [vmem:[%s1172_s13 + $0xc8] sm:$0xff] (%p1613_p5), %v1257_v53 }
 0x453   : > { %v1243_v45 = vld [vmem:[%s1699_s14 + $0x30] sm:$0xff] (%p1613_p5) }
 0x454   : > { %v1011_v35 = vpop.f32.mrf.mxu2  ;;  %1154 = vst.msk [vmem:[%s1699_s14 + $0x38] sm:$0xff] %vm420_vm0, %v1138_v34 }
 0x455   : > { %v1125_v37 = vadd.f32 %v1124_v36, %v1011_v35  ;;  %1169 = sbr.rel (!%p1613_p5) target bundleno = 1122 (0x462), region = 101  ;;  %1244 = vst [vmem:[%s1172_s13 + $0x60] sm:$0xff] (%p1613_p5), %v1243_v45 }
 0x457   : > { %v1146_v39 = vadd.f32 %v1820_v38, %v1125_v37  ;;  %v1235_v38 = vld [vmem:[%s1699_s14 + $0x10] sm:$0xff] (%p1613_p5) }
 0x458   : > { %1236 = vst [vmem:[%s1172_s13 + $0x20] sm:$0xff] (%p1613_p5), %v1235_v38  ;;  %v1259_v54 = vld [vmem:[%s1699_s14 + $0x70] sm:$0xff] (%p1613_p5) }
 0x459   : > { %1162 = vst.msk [vmem:[%s1699_s14 + $0x78] sm:$0xff] %vm420_vm0, %v1146_v39 }
 0x45a   : > { %1260 = vst [vmem:[%s1172_s13 + $0xe0] sm:$0xff] %v1259_v54 }
 0x45b   : > { %v1245_v46 = vld [vmem:[%s1699_s14 + $0x38] sm:$0xff] }
 0x45c   : > { %1246 = vst [vmem:[%s1172_s13 + $0x68] sm:$0xff] %v1245_v46 }
 0x460   : > { %v1261_v55 = vld [vmem:[%s1699_s14 + $0x78] sm:$0xff] }
 0x461   : > { %1262 = vst [vmem:[%s1172_s13 + $0xe8] sm:$0xff] %v1261_v55 }
 0x462 PF: > { %p15_p11 = scmp.ge.s32.totalorder %s1600_s9, 4   ;;  %s1913_s27 = smov %s1520_s28 }
 0x463   : > { %s1914_s28 = smov %s1611_s12  ;;  %s1915_s29 = smov %s1600_s9 }
 0x464   :  { %17 = sbr.rel (!%p15_p11) target bundleno = 2 (0x2), region = 185 }

// kernel: dprnn_tac_forward.13
= control target key start
LH: loop header
LB: loop body
LE: loop exit
PB: predicated region body
PF: predicated region fallthrough
CT: control target
= control target key end

     0   :  { %s835_s0 = inlined_call_operand.<no memory space> [shape: f32[1], index: 0, kind: input, shape index: {}]   ;;  %s836_s1 = inlined_call_operand.vmem [shape: f32[256,16], index: 1, kind: input, shape index: {}]   ;;  %s837_s2 = inlined_call_operand.vmem [shape: f32[16,16], index: 2, kind: input, shape index: {}]   ;;  %s838_s3 = inlined_call_operand.vmem [shape: f32[1,16], index: 3, kind: input, shape index: {}]   ;;  %s839_s4 = inlined_call_operand.hbm [shape: f32[256,16], index: 4, kind: output, shape index: {}]  }
   0x1   :  { %9 = sst [smem:[#allocation2]] %s835_s0 }
   0x2   :  { %10 = vsyncpa [#allocation4], 0 }
   0x3   :  { %12 = vsyncpa [#allocation4 + $0x1], 0  ;;  %s651_s17 = smov 0   ;;  %s653_s18 = smov 0  }
   0x4   :  { %s655_s19 = smov 0   ;;  %s657_s20 = smov 0  }
   0x5 LB: > { %s672_s0 = sadd.s32 4294967295, %s619_s20   ;;  %s480_s21 = sadd.s32 4294967294, %s619_s20   ;;  %s619_s20 = sphi %s657_s20, %s845_s20   ;;  %s615_s19 = sphi %s655_s19, %s844_s19   ;;  %s611_s18 = sphi %s653_s18, %s843_s18   ;;  %s607_s17 = sphi %s651_s17, %s842_s17  }
   0x6   : > { %s676_s22 = sadd.s32 1, %s619_s20   ;;  %s114_s23 = sadd.s32 1, %s615_s19 }
   0x7   : > { %s111_s24 = ssub.s32 %s619_s20, %s676_s22  ;;  %p124_p0 = scmp.ne.s32.totalorder %s615_s19, %s611_s18 }
   0x8   : > { %p112_p1 = scmp.eq.s32.totalorder %s111_s24, 0  ;;  %p125_p2 = scmp.eq.s32.totalorder %s672_s0, 1 }
   0x9   : > { %p130_p3 = scmp.ne.s32.totalorder %s611_s18, %s607_s17  ;;  %p131_p4 = scmp.eq.s32.totalorder %s480_s21, 1 }
   0xa   : > { %s687_s25 = scalar_select %p112_p1, %s615_s19, %s114_s23  }
   0xb   : > { %p689_p5 = por %p125_p2, %p124_p0  ;;  %p693_p6 = por %p131_p4, %p130_p3 }
   0xc   : > { %p483_p7 = scmp.ge.s32.totalorder %s619_s20, 1  ;;  %p167_p8 = scmp.lt.s32.totalorder %s619_s20, 3 }
   0xe   : > { %p168_p9 = pnand %p483_p7, %p167_p8 }
   0xf   : > { %s485_s6 = sshll.u32 (!%p168_p9), %s672_s0, 4  ;;  %s200_s7 = sld [smem:[#allocation2]] (!%p168_p9) }
  0x10   : > { %171 = sbr.rel (%p168_p9) target bundleno = 191 (0xbf), region = 36  ;;  %p194_p10 = scmp.lt.s32.totalorder (!%p168_p9), %s485_s6, 31 }
  0x11   : > { %s190_s12 = sand.u32 (!%p168_p9), 1, %s611_s18   ;;  %s508_s21 = sshll.u32 (!%p168_p9), %s672_s0, 7 }
  0x12   : > { %s484_s13 = sshll.u32 (!%p168_p9), %s190_s12, 7  ;;  %s414_s28 = scalar_lea.hbm (!%p168_p9), %s839_s4, %s508_s21 }
  0x13   : > { %s767_s16 = scalar_lea.vmem (!%p168_p9), [#allocation3], %s484_s13  ;;  %s417_s29 = sshll.u32 (!%p168_p9), %s414_s28, 4  ;;  %s418_s29 = int_to_ptr.hbm [resolvable:$true] %s417_s29 }
  0x14   : > { %s415_s0 = sshll.u32 (!%p168_p9), %s767_s16, 4  ;;  %s403_s30 = scalar_lea.sflag (!%p168_p9), [#allocation4], %s190_s12  ;;  %s416_s0 = int_to_ptr.vmem [resolvable:$true] %s415_s0 }
  0x15   : > { %v267_v0 = vld [vmem:[%s837_s2 + $0x8] sm:$0xff]  ;;  %v266_v1 = vld [vmem:[%s837_s2] sm:$0xff]  ;;  %s847_s6 = smov (!%p194_p10, %s485_s6), 31  ;;  %v711_v2 = vstv %s200_s7  ;;  %vm272_vm0 = vcmask 130048   ;;  %s571_s5 = sshra.s32 %s418_s29, 4  ;;  %s572_s5 = int_to_ptr.hbm [resolvable:$true] %s571_s5 }
  0x16   : > { %510 = vmatpush.msra.mxu2 %v267_v0  ;;  %511 = vmatpush.msra.mxu3 %v267_v0  ;;  %s486_s8 = sshll.u32 %s847_s6, 3  ;;  %v556_v51 = vld [vmem:[%s838_s3] ss:$0 sm:$0xff]  ;;  %s573_s6 = scalar_lea.hbm %s572_s5, 128 }
  0x17   : > { %335 = vmatpush.msra.mxu0 %v267_v0  ;;  %509 = vmatpush.msra.mxu1 %v267_v0  ;;  %s709_s11 = scalar_lea.vmem %s836_s1, %s486_s8  ;;  %p574_p11 = scmp.ne.s32.totalorder %s572_s5, %s573_s6 }
  0x18   : > { %513 = vmatpush.msra.mxu2 %v266_v1  ;;  %514 = vmatpush.msra.mxu3 %v266_v1  ;;  %v209_v3 = vld [vmem:[%s709_s11 + $0x40] sm:$0xff]  ;;  %v210_v11 = vld [vmem:[%s709_s11 + $0x48] sm:$0xff]  ;;  %v211_v27 = vld [vmem:[%s709_s11 + $0x50] sm:$0xff]  ;;  %s577_s9 = scalar_lea.hbm %s839_s4, 256  ;;  %p578_p0 = scmp.lt.s32.totalorder %s572_s5, %s839_s4 }
  0x19   : > { %336 = vmatpush.msra.mxu0 %v266_v1  ;;  %512 = vmatpush.msra.mxu1 %v266_v1  ;;  %v213_v4 = vld [vmem:[%s709_s11 + $0x60] sm:$0xff]  ;;  %vm225_vm1 = vcmp.ge.f32.partialorder %v209_v3, 0.0  ;;  %v242_v6 = vmul.f32 %v711_v2, %v209_v3  ;;  %v214_v12 = vld [vmem:[%s709_s11 + $0x68] sm:$0xff]  ;;  %v243_v19 = vmul.f32 %v711_v2, %v210_v11  ;;  %vm226_vm5 = vcmp.ge.f32.partialorder %v210_v11, 0.0  ;;  %v215_v28 = vld [vmem:[%s709_s11 + $0x70] sm:$0xff]  ;;  %p575_p12 = pnand %p574_p11, %p689_p5  ;;  %p579_p1 = scmp.lt.s32.totalorder %s577_s9, %s573_s6 }
  0x1a   : > { %v201_v5 = vld [vmem:[%s709_s11] sm:$0xff]  ;;  %vm229_vm2 = vcmp.ge.f32.partialorder %v213_v4, 0.0  ;;  %v246_v7 = vmul.f32 %v711_v2, %v213_v4  ;;  %v202_v15 = vld [vmem:[%s709_s11 + $0x8] sm:$0xff]  ;;  %v247_v20 = vmul.f32 %v711_v2, %v214_v12  ;;  %vm230_vm6 = vcmp.ge.f32.partialorder %v214_v12, 0.0  ;;  %v203_v29 = vld [vmem:[%s709_s11 + $0x10] sm:$0xff] }
  0x1b   : > { %v205_v8 = vld [vmem:[%s709_s11 + $0x20] sm:$0xff]  ;;  %vm217_vm3 = vcmp.ge.f32.partialorder %v201_v5, 0.0  ;;  %v234_v9 = vmul.f32 %v711_v2, %v201_v5  ;;  %v258_v13 = vsel %vm225_vm1, %v209_v3, %v242_v6  ;;  %v206_v16 = vld [vmem:[%s709_s11 + $0x28] sm:$0xff]  ;;  %v235_v21 = vmul.f32 %v711_v2, %v202_v15  ;;  %v207_v30 = vld [vmem:[%s709_s11 + $0x30] sm:$0xff]  ;;  %p576_p13 = pneg %p575_p12  ;;  %p580_p2 = por %p579_p1, %p578_p0 }
  0x1c   : > { %vm221_vm4 = vcmp.ge.f32.partialorder %v205_v8, 0.0  ;;  %v238_v10 = vmul.f32 %v711_v2, %v205_v8  ;;  %v262_v14 = vsel %vm229_vm2, %v213_v4, %v246_v7  ;;  %495 = vmatmul.msk.f32.vlgmr.msra.gmra.mxu2 %vm272_vm0, %v258_v13  ;;  %v239_v22 = vmul.f32 %v711_v2, %v206_v16  ;;  %v212_v39 = vld [vmem:[%s709_s11 + $0x58] sm:$0xff] }
  0x1d   : > { %499 = vmatmul.msk.f32.vlgmr.msra.gmra.mxu3 %vm272_vm0, %v262_v14  ;;  %v250_v17 = vsel %vm217_vm3, %v201_v5, %v234_v9  ;;  %vm218_vm7 = vcmp.ge.f32.partialorder %v202_v15, 0.0  ;;  %vm222_vm8 = vcmp.ge.f32.partialorder %v206_v16, 0.0  ;;  %v259_v23 = vsel %vm226_vm5, %v210_v11, %v243_v19  ;;  %v216_v40 = vld [vmem:[%s709_s11 + $0x78] sm:$0xff]  ;;  %p581_p3 = pnand %p580_p2, %p576_p13 }
  0x1e   : > { %v254_v18 = vsel %vm221_vm4, %v205_v8, %v238_v10  ;;  %487 = vmatmul.msk.f32.vlgmr.msra.gmra.mxu0 %vm272_vm0, %v250_v17  ;;  %v263_v24 = vsel %vm230_vm6, %v214_v12, %v247_v20  ;;  %v251_v25 = vsel %vm218_vm7, %v202_v15, %v235_v21  ;;  %v255_v26 = vsel %vm222_vm8, %v206_v16, %v239_v22  ;;  %v204_v41 = vld [vmem:[%s709_s11 + $0x18] sm:$0xff] }
  0x1f   : > { %491 = vmatmul.msk.f32.vlgmr.msra.gmra.mxu1 %vm272_vm0, %v254_v18  ;;  %v244_v31 = vmul.f32 %v711_v2, %v211_v27  ;;  %v248_v32 = vmul.f32 %v711_v2, %v215_v28  ;;  %vm227_vm9 = vcmp.ge.f32.partialorder %v211_v27, 0.0  ;;  %vm231_vm10 = vcmp.ge.f32.partialorder %v215_v28, 0.0  ;;  %v208_v42 = vld [vmem:[%s709_s11 + $0x38] sm:$0xff] }
  0x20   : > { %v236_v33 = vmul.f32 %v711_v2, %v203_v29  ;;  %v240_v34 = vmul.f32 %v711_v2, %v207_v30  ;;  %vm219_vm11 = vcmp.ge.f32.partialorder %v203_v29, 0.0  ;;  %vm223_vm12 = vcmp.ge.f32.partialorder %v207_v30, 0.0 }
  0x21   : > { %v260_v35 = vsel %vm227_vm9, %v211_v27, %v244_v31  ;;  %v264_v36 = vsel %vm231_vm10, %v215_v28, %v248_v32  ;;  %v245_v43 = vmul.f32 %v711_v2, %v212_v39  ;;  %v249_v44 = vmul.f32 %v711_v2, %v216_v40 }
  0x22   : > { %v252_v37 = vsel %vm219_vm11, %v203_v29, %v236_v33  ;;  %v256_v38 = vsel %vm223_vm12, %v207_v30, %v240_v34  ;;  %vm228_vm13 = vcmp.ge.f32.partialorder %v212_v39, 0.0  ;;  %vm232_vm14 = vcmp.ge.f32.partialorder %v216_v40, 0.0 }
  0x23   : > { %v237_v45 = vmul.f32 %v711_v2, %v204_v41  ;;  %v241_v46 = vmul.f32 %v711_v2, %v208_v42  ;;  %vm220_vm15 = vcmp.ge.f32.partialorder %v204_v41, 0.0  ;;  %vm224_vm1 = vcmp.ge.f32.partialorder %v208_v42, 0.0 }
  0x24   : > { %496 = vmatmul.msk.f32.gmra.mxu2 %vm272_vm0, %v259_v23  ;;  %v261_v47 = vsel %vm228_vm13, %v212_v39, %v245_v43  ;;  %v265_v48 = vsel %vm232_vm14, %v216_v40, %v249_v44 }
  0x25   : > { %500 = vmatmul.msk.f32.gmra.mxu3 %vm272_vm0, %v263_v24  ;;  %v253_v49 = vsel %vm220_vm15, %v204_v41, %v237_v45  ;;  %v257_v50 = vsel %vm224_vm1, %v208_v42, %v241_v46 }
  0x26   : > { %488 = vmatmul.msk.f32.gmra.mxu0 %vm272_vm0, %v251_v25 }
  0x27   : > { %492 = vmatmul.msk.f32.gmra.mxu1 %vm272_vm0, %v255_v26 }
  0x2c   : > { %497 = vmatmul.msk.f32.gmra.mxu2 %vm272_vm0, %v260_v35 }
  0x2d   : > { %501 = vmatmul.msk.f32.gmra.mxu3 %vm272_vm0, %v264_v36 }
  0x2e   : > { %489 = vmatmul.msk.f32.gmra.mxu0 %vm272_vm0, %v252_v37 }
  0x2f   : > { %493 = vmatmul.msk.f32.gmra.mxu1 %vm272_vm0, %v256_v38 }
  0x34   : > { %498 = vmatmul.msk.f32.gmra.mxu2 %vm272_vm0, %v261_v47 }
  0x35   : > { %502 = vmatmul.msk.f32.gmra.mxu3 %vm272_vm0, %v265_v48 }
  0x36   : > { %490 = vmatmul.msk.f32.gmra.mxu0 %vm272_vm0, %v253_v49 }
  0x37   : > { %494 = vmatmul.msk.f32.gmra.mxu1 %vm272_vm0, %v257_v50 }
  0x9b   : > { %v338_v52 = vpop.f32.mrf.mxu0 }
  0x9c   : > { %v350_v53 = vpop.f32.mrf.mxu1  ;;  %v339_v54 = vadd.f32 %v556_v51, %v338_v52 }
  0x9d   : > { %v351_v55 = vadd.f32 %v556_v51, %v350_v53 }
  0x9e   : > { %386 = vst.msk [vmem:[%s767_s16] sm:$0xff] %vm272_vm0, %v339_v54 }
  0x9f   : > { %390 = vst.msk [vmem:[%s767_s16 + $0x20] sm:$0xff] %vm272_vm0, %v351_v55  ;;  %v362_v56 = vpop.f32.mrf.mxu2 }
  0xa0   : > { %v374_v57 = vpop.f32.mrf.mxu3  ;;  %v363_v58 = vadd.f32 %v556_v51, %v362_v56 }
  0xa1   : > { %v375_v59 = vadd.f32 %v556_v51, %v374_v57 }
  0xa2   : > { %394 = vst.msk [vmem:[%s767_s16 + $0x40] sm:$0xff] %vm272_vm0, %v363_v58 }
  0xa3   : > { %v341_v60 = vpop.f32.mrf.mxu0  ;;  %398 = vst.msk [vmem:[%s767_s16 + $0x60] sm:$0xff] %vm272_vm0, %v375_v59 }
  0xa4   : > { %v353_v61 = vpop.f32.mrf.mxu1  ;;  %v342_v62 = vadd.f32 %v556_v51, %v341_v60 }
  0xa5   : > { %v354_v63 = vadd.f32 %v556_v51, %v353_v61 }
  0xa6   : > { %387 = vst.msk [vmem:[%s767_s16 + $0x8] sm:$0xff] %vm272_vm0, %v342_v62 }
  0xa7   : > { %391 = vst.msk [vmem:[%s767_s16 + $0x28] sm:$0xff] %vm272_vm0, %v354_v63  ;;  %v365_v0 = vpop.f32.mrf.mxu2 }
  0xa8   : > { %v377_v1 = vpop.f32.mrf.mxu3  ;;  %v366_v2 = vadd.f32 %v556_v51, %v365_v0 }
  0xa9   : > { %v378_v3 = vadd.f32 %v556_v51, %v377_v1 }
  0xaa   : > { %395 = vst.msk [vmem:[%s767_s16 + $0x48] sm:$0xff] %vm272_vm0, %v366_v2 }
  0xab   : > { %v344_v4 = vpop.f32.mrf.mxu0  ;;  %399 = vst.msk [vmem:[%s767_s16 + $0x68] sm:$0xff] %vm272_vm0, %v378_v3 }
  0xac   : > { %v356_v5 = vpop.f32.mrf.mxu1  ;;  %v345_v6 = vadd.f32 %v556_v51, %v344_v4 }
  0xad   : > { %v357_v7 = vadd.f32 %v556_v51, %v356_v5 }
  0xae   : > { %388 = vst.msk [vmem:[%s767_s16 + $0x10] sm:$0xff] %vm272_vm0, %v345_v6 }
  0xaf   : > { %392 = vst.msk [vmem:[%s767_s16 + $0x30] sm:$0xff] %vm272_vm0, %v357_v7  ;;  %v368_v8 = vpop.f32.mrf.mxu2 }
  0xb0   : > { %v380_v9 = vpop.f32.mrf.mxu3  ;;  %v369_v10 = vadd.f32 %v556_v51, %v368_v8 }
  0xb1   : > { %v381_v11 = vadd.f32 %v556_v51, %v380_v9 }
  0xb2   : > { %396 = vst.msk [vmem:[%s767_s16 + $0x50] sm:$0xff] %vm272_vm0, %v369_v10 }
  0xb3   : > { %v347_v12 = vpop.f32.mrf.mxu0  ;;  %400 = vst.msk [vmem:[%s767_s16 + $0x70] sm:$0xff] %vm272_vm0, %v381_v11 }
  0xb4   : > { %v359_v13 = vpop.f32.mrf.mxu1  ;;  %v348_v14 = vadd.f32 %v556_v51, %v347_v12 }
  0xb5   : > { %v360_v15 = vadd.f32 %v556_v51, %v359_v13 }
  0xb6   : > { %389 = vst.msk [vmem:[%s767_s16 + $0x18] sm:$0xff] %vm272_vm0, %v348_v14 }
  0xb7   : > { %393 = vst.msk [vmem:[%s767_s16 + $0x38] sm:$0xff] %vm272_vm0, %v360_v15  ;;  %v371_v16 = vpop.f32.mrf.mxu2 }
  0xb8   : > { %v383_v17 = vpop.f32.mrf.mxu3  ;;  %v372_v18 = vadd.f32 %v556_v51, %v371_v16 }
  0xb9   : > { %v384_v19 = vadd.f32 %v556_v51, %v383_v17 }
  0xba   : > { %397 = vst.msk [vmem:[%s767_s16 + $0x58] sm:$0xff] %vm272_vm0, %v372_v18 }
  0xbb   : > { %401 = vst.msk [vmem:[%s767_s16 + $0x78] sm:$0xff] %vm272_vm0, %v384_v19 }
  0xbc   : > { %584 = shalt.err (!%p581_p3)
}
  0xbd   : > { %s621_s12 = smov 128   ;;  %s622_s13 = smov 8  }
  0xbe   : > { %515 = dma.vmem_to_hbm [thread:$0]  (%p689_p5), %s416_s0, 2048, %s418_s29, %s403_s30, %s621_s12, %s621_s12, %s622_s13  }
  0xbf PF: > { %p521_p4 = scmp.ge.s32.totalorder %s619_s20, 2  ;;  %s432_s14 = sand.u32 1, %s607_s17  }
  0xc0   : > { %s433_s15 = scalar_lea.sflag [#allocation4], %s432_s14 }
  0xc1   : > { %p518_p7 = pnand %p521_p4, %p693_p6 }
  0xc3   : > { %p519_p8 = pneg %p518_p7 }
  0xc5   : > { %602 = dma.done.wait (%p519_p8), %s433_s15, 2048  }
  0xc6   : > { %604 = vsyncadd (%p519_p8), %s433_s15, 4294965248  ;;  %p15_p9 = scmp.ge.s32.totalorder %s676_s22, 4   ;;  %s842_s17 = smov %s611_s18 }
  0xc7   : > { %s843_s18 = smov %s615_s19  ;;  %s844_s19 = smov %s687_s25 }
  0xc8   : > { %s845_s20 = smov %s676_s22  ;;  %17 = sbr.rel (!%p15_p9) target bundleno = 5 (0x5), region = 71 }
  0xcd   :  { %439 = vsyncpa [#allocation4], 1 }
  0xce   :  { %441 = vsyncpa [#allocation4 + $0x1], 1 }

// kernel: dprnn_tac_forward.11
= control target key start
LH: loop header
LB: loop body
LE: loop exit
PB: predicated region body
PF: predicated region fallthrough
CT: control target
= control target key end

     0   :  { %15 = vsyncpa [#allocation3], 0  ;;  %s1564_s0 = inlined_call_operand.vmem [shape: s32[2], index: 0, kind: input, shape index: {}]   ;;  %s1565_s1 = inlined_call_operand.vmem [shape: f32[3], index: 1, kind: input, shape index: {}]   ;;  %s1566_s2 = inlined_call_operand.vmem [shape: f32[2,128,16], index: 2, kind: input, shape index: {}]   ;;  %s1567_s3 = inlined_call_operand.vmem [shape: f32[16,48], index: 3, kind: input, shape index: {}]   ;;  %s1568_s4 = inlined_call_operand.vmem [shape: f32[1,48], index: 4, kind: input, shape index: {}]   ;;  %s1569_s5 = inlined_call_operand.vmem [shape: f32[48,48], index: 5, kind: input, shape index: {}]   ;;  %s1570_s6 = inlined_call_operand.vmem [shape: f32[1,48], index: 6, kind: input, shape index: {}]   ;;  %s1571_s7 = inlined_call_operand.vmem [shape: f32[48,16], index: 7, kind: input, shape index: {}]   ;;  %s1572_s8 = inlined_call_operand.vmem [shape: f32[48,16], index: 8, kind: input, shape index: {}]   ;;  %s1573_s9 = inlined_call_operand.vmem [shape: f32[1,16], index: 9, kind: input, shape index: {}]   ;;  %s1574_s10 = inlined_call_operand.vmem [shape: f32[2,128,16], index: 10, kind: output, shape index: {}]  }
   0x1   :  { %16 = vsyncpa [#allocation5], 0  ;;  %s1254_s13 = smov 0  }
   0x2 LB: > { %s1044_s14 = sadd.s32 4294967295, %s1195_s13   ;;  %p1046_p0 = scmp.ge.s32.totalorder %s1195_s13, 1  ;;  %s1195_s13 = sphi %s1254_s13, %s22_s13  }
   0x3   : > { %p268_p1 = scmp.lt.s32.totalorder %s1195_s13, 3  ;;  %s280_s17 = sshll.u32 %s1564_s0, 4  ;;  %s281_s17 = int_to_ptr.vmem [resolvable:$true] %s280_s17 }
   0x4   : > { %p1134_p3 = scmp.eq.s32.totalorder %s1044_s14, 0  ;;  %s290_s20 = sshll.u32 %s1565_s1, 4  ;;  %s291_s20 = int_to_ptr.vmem [resolvable:$true] %s290_s20 }
   0x5   : > { %p269_p2 = pnand %p1046_p0, %p268_p1  ;;  %s1197_s21 = smov [#allocation2]  }
   0x6   : > { %s1198_s22 = smov [#allocation4]  }
   0x7   : > { %p1127_p4 = pneg %p269_p2 }
   0x8   : > { %332 = sbr.rel (%p269_p2) target bundleno = 551 (0x227), region = 60 }
   0x9   : > { %p1128_p5 = pnand %p1134_p3, %p1127_p4 }
   0xb   : > { %1130 = dma.vmem_to_smem (!%p1128_p5), %s281_s17, 16, %s1197_s21, [#allocation3]  }
   0xc   : > { %1133 = dma.vmem_to_smem (!%p1128_p5), %s291_s20, 16, %s1198_s22, [#allocation5]  }
   0xd   : > { %1186 = dma.done.wait (%p1134_p3), [#allocation3], 16  }
   0xe   : > { %1188 = vsyncadd (%p1134_p3), [#allocation3], 4294967280 }
   0xf   : > { %1190 = dma.done.wait (%p1134_p3), [#allocation5], 16  }
  0x10   : > { %1192 = vsyncadd (%p1134_p3), [#allocation5], 4294967280 }
  0x11   : > { %344 = sfence }
  0x12   : > { %v407_v0 = vld [vmem:[%s1567_s3 + $0x8] sm:$0xff]  ;;  %v406_v1 = vld [vmem:[%s1567_s3] sm:$0xff]  ;;  %p377_p6 = scmp.lt.s32.totalorder %s1044_s14, 1  ;;  %vm412_vm0 = vcmask 130048   ;;  %v695_v20 = vld [vmem:[%s1571_s7 + $0x18] sm:$0xff]  ;;  %s387_s25 = sld [smem:[#allocation4]] }
  0x13   : > { %475 = vmatpush.msra.mxu0 %v407_v0  ;;  %1111 = vmatpush.msra.mxu3 %v407_v0  ;;  %v697_v18 = vld [vmem:[%s1571_s7 + $0x28] sm:$0xff]  ;;  %v696_v19 = vld [vmem:[%s1571_s7 + $0x20] sm:$0xff]  ;;  %v694_v22 = vld [vmem:[%s1571_s7 + $0x10] sm:$0xff]  ;;  %vm601_vm2 = vcmask 392192   ;;  %s1057_s18 = sld [smem:[#allocation4 + $0x1]] }
  0x14   : > { %s1576_s14 = smov (!%p377_p6, %s1044_s14), 1  ;;  %1113 = vmatpush.msra.mxu2 %v697_v18  ;;  %v693_v23 = vld [vmem:[%s1571_s7 + $0x8] sm:$0xff]  ;;  %v692_v24 = vld [vmem:[%s1571_s7] sm:$0xff]  ;;  %v594_v34 = vld [vmem:[%s1569_s5 + $0x18] sm:$0xff]  ;;  %s1058_s21 = sld [smem:[#allocation4 + $0x2]] }
  0x15   : > { %476 = vmatpush.msra.mxu0 %v406_v1  ;;  %1112 = vmatpush.msra.mxu3 %v406_v1  ;;  %s1109_s27 = sshll.u32 %s1576_s14, 7  ;;  %v596_v28 = vld [vmem:[%s1569_s5 + $0x28] sm:$0xff]  ;;  %v1349_v29 = vld [vmem:[%s1568_s4] ss:$0 sm:$0xff]  ;;  %v593_v36 = vld [vmem:[%s1569_s5 + $0x10] sm:$0xff] }
  0x16   : > { %s1287_s30 = scalar_lea.vmem %s1566_s2, %s1109_s27  ;;  %1114 = vmatpush.msra.mxu2 %v696_v19  ;;  %636 = vmatpush.msra.mxu1 %v596_v28  ;;  %v595_v31 = vld [vmem:[%s1569_s5 + $0x20] sm:$0xff]  ;;  %v592_v38 = vld [vmem:[%s1569_s5 + $0x8] sm:$0xff]  ;;  %s1500_s26 = scalar_lea.vmem %s1574_s10, %s1109_s27 }
  0x17   : > { %v390_v2 = vld [vmem:[%s1287_s30] sm:$0xff]  ;;  %v403_v3 = vld [vmem:[%s1287_s30 + $0x68] sm:$0xff]  ;;  %v404_v5 = vld [vmem:[%s1287_s30 + $0x70] sm:$0xff] }
  0x18   : > { %1059 = vmatmul.msk.f32.vlgmr.msra.gmra.mxu0 %vm412_vm0, %v390_v2  ;;  %1072 = vmatmul.msk.f32.vlgmr.msra.gmra.mxu3 %vm412_vm0, %v403_v3  ;;  %v391_v4 = vld [vmem:[%s1287_s30 + $0x8] sm:$0xff]  ;;  %v392_v6 = vld [vmem:[%s1287_s30 + $0x10] sm:$0xff]  ;;  %v405_v7 = vld [vmem:[%s1287_s30 + $0x78] sm:$0xff]  ;;  %v1355_v33 = vstv %s387_s25 }
  0x19   : > { %v393_v8 = vld [vmem:[%s1287_s30 + $0x18] sm:$0xff]  ;;  %v394_v9 = vld [vmem:[%s1287_s30 + $0x20] sm:$0xff]  ;;  %v395_v10 = vld [vmem:[%s1287_s30 + $0x28] sm:$0xff]  ;;  %1115 = vmatpush.msra.mxu2 %v695_v20  ;;  %637 = vmatpush.msra.mxu1 %v595_v31 }
  0x1a   : > { %v396_v11 = vld [vmem:[%s1287_s30 + $0x30] sm:$0xff]  ;;  %v397_v12 = vld [vmem:[%s1287_s30 + $0x38] sm:$0xff]  ;;  %v398_v13 = vld [vmem:[%s1287_s30 + $0x40] sm:$0xff] }
  0x1b   : > { %v399_v14 = vld [vmem:[%s1287_s30 + $0x48] sm:$0xff]  ;;  %v400_v15 = vld [vmem:[%s1287_s30 + $0x50] sm:$0xff]  ;;  %v401_v16 = vld [vmem:[%s1287_s30 + $0x58] sm:$0xff]  ;;  %1116 = vmatpush.msra.mxu2 %v694_v22  ;;  %638 = vmatpush.msra.mxu1 %v594_v34 }
  0x1c   : > { %v402_v17 = vld [vmem:[%s1287_s30 + $0x60] sm:$0xff] }
  0x1d   : > { %1117 = vmatpush.msra.mxu2 %v693_v23  ;;  %639 = vmatpush.msra.mxu1 %v593_v36  ;;  %v591_v40 = vld [vmem:[%s1569_s5] sm:$0xff] }
  0x1f   : > { %1118 = vmatpush.msra.mxu2 %v692_v24  ;;  %640 = vmatpush.msra.mxu1 %v592_v38 }
  0x20   : > { %1060 = vmatmul.msk.f32.gmra.mxu0 %vm412_vm0, %v391_v4  ;;  %1073 = vmatmul.msk.f32.gmra.mxu3 %vm412_vm0, %v404_v5 }
  0x21   : > { %641 = vmatpush.msra.mxu1 %v591_v40 }
  0x23   : > { %756 = vmatpush.msrb.mxu1 %v697_v18 }
  0x25   : > { %757 = vmatpush.msrb.mxu1 %v696_v19 }
  0x27   : > { %758 = vmatpush.msrb.mxu1 %v695_v20 }
  0x28   : > { %1061 = vmatmul.msk.f32.gmra.mxu0 %vm412_vm0, %v392_v6  ;;  %1074 = vmatmul.msk.f32.gmra.mxu3 %vm412_vm0, %v405_v7 }
  0x29   : > { %759 = vmatpush.msrb.mxu1 %v694_v22 }
  0x2b   : > { %760 = vmatpush.msrb.mxu1 %v693_v23 }
  0x2d   : > { %761 = vmatpush.msrb.mxu1 %v692_v24 }
  0x30   : > { %1062 = vmatmul.msk.f32.gmra.mxu0 %vm412_vm0, %v393_v8 }
  0x38   : > { %1063 = vmatmul.msk.f32.gmra.mxu0 %vm412_vm0, %v394_v9 }
  0x40   : > { %1064 = vmatmul.msk.f32.gmra.mxu0 %vm412_vm0, %v395_v10 }
  0x48   : > { %1065 = vmatmul.msk.f32.gmra.mxu0 %vm412_vm0, %v396_v11 }
  0x50   : > { %1066 = vmatmul.msk.f32.gmra.mxu0 %vm412_vm0, %v397_v12 }
  0x58   : > { %1067 = vmatmul.msk.f32.gmra.mxu0 %vm412_vm0, %v398_v13 }
  0x60   : > { %1068 = vmatmul.msk.f32.gmra.mxu0 %vm412_vm0, %v399_v14 }
  0x68   : > { %1069 = vmatmul.msk.f32.gmra.mxu0 %vm412_vm0, %v400_v15 }
  0x70   : > { %1070 = vmatmul.msk.f32.gmra.mxu0 %vm412_vm0, %v401_v16 }
  0x78   : > { %1071 = vmatmul.msk.f32.gmra.mxu0 %vm412_vm0, %v402_v17 }
  0x95   : > { %v478_v21 = vpop.f32.mrf.mxu0 }
  0x96   : > { %v479_v51 = vadd.f32 %v1349_v29, %v478_v21 }
  0x98   : > { %v543_v54 = vmul.f32 %v1355_v33, %v479_v51  ;;  %vm526_vm6 = vcmp.ge.f32.partialorder %v479_v51, 0.0 }
  0x9a   : > { %v1397_v58 = vsel %vm526_vm6, %v479_v51, %v543_v54  ;;  %v813_v51 = vld [vmem:[%s1572_s8 + $0x10] sm:$0xff]  ;;  %v1149_v54 = vld [vmem:[%s1570_s6] ss:$0 sm:$0xff] }
  0x9b   : > { %v517_v19 = vpop.f32.mrf.mxu3 }
  0x9d   : > { %v481_v25 = vpop.f32.mrf.mxu0 }
  0x9e   : > { %v482_v57 = vadd.f32 %v1349_v29, %v481_v25 }
  0xa0   : > { %v544_v63 = vmul.f32 %v1355_v33, %v482_v57  ;;  %vm527_vm8 = vcmp.ge.f32.partialorder %v482_v57, 0.0 }
  0xa2   : > { %v1407_v3 = vsel %vm527_vm8, %v482_v57, %v544_v63 }
  0xa5   : > { %v1339_v26 = vpop.f32.mrf.mxu0 }
  0xa6   : > { %v485_v2 = vadd.f32 %v1349_v29, %v1339_v26  ;;  %v518_v26 = vadd.f32 %v1349_v29, %v517_v19 }
  0xa8   : > { %v545_v8 = vmul.f32 %v1355_v33, %v485_v2  ;;  %vm528_vm10 = vcmp.ge.f32.partialorder %v485_v2, 0.0  ;;  %v556_v31 = vmul.f32 %v1355_v33, %v518_v26  ;;  %vm539_vm15 = vcmp.ge.f32.partialorder %v518_v26, 0.0 }
  0xaa   : > { %v561_v12 = vsel %vm528_vm10, %v485_v2, %v545_v8  ;;  %v572_v38 = vsel %vm539_vm15, %v518_v26, %v556_v31  ;;  %v1490_v31 = vld [vmem:[%s1573_s9] ss:$0 sm:$0xff] }
  0xad   : > { %v1341_v27 = vpop.f32.mrf.mxu0 }
  0xae   : > { %v488_v11 = vadd.f32 %v1349_v29, %v1341_v27 }
  0xb0   : > { %v546_v17 = vmul.f32 %v1355_v33, %v488_v11  ;;  %vm529_vm12 = vcmp.ge.f32.partialorder %v488_v11, 0.0 }
  0xb2   : > { %v562_v21 = vsel %vm529_vm12, %v488_v11, %v546_v17 }
  0xb5   : > { %v490_v30 = vpop.f32.mrf.mxu0 }
  0xb6   : > { %v491_v32 = vadd.f32 %v1349_v29, %v490_v30  ;;  %v520_v30 = vpop.f32.mrf.mxu3 }
  0xb7   : > { %v521_v36 = vadd.f32 %v1349_v29, %v520_v30 }
  0xb8   : > { %v547_v35 = vmul.f32 %v1355_v33, %v491_v32  ;;  %vm530_vm1 = vcmp.ge.f32.partialorder %v491_v32, 0.0 }
  0xb9   : > { %v557_v40 = vmul.f32 %v1355_v33, %v521_v36 }
  0xba   : > { %v1364_v37 = vsel %vm530_vm1, %v491_v32, %v547_v35  ;;  %vm540_vm1 = vcmp.ge.f32.partialorder %v521_v36, 0.0 }
  0xbb   : > { %1087 = vmatmul.msk.f32.vlgmr.msra.gmra.mxu2 %vm601_vm2, %v1364_v37 }
  0xbd   : > { %v493_v39 = vpop.f32.mrf.mxu0 }
  0xbe   : > { %v494_v41 = vadd.f32 %v1349_v29, %v493_v39 }
  0xc0   : > { %v548_v42 = vmul.f32 %v1355_v33, %v494_v41  ;;  %vm531_vm3 = vcmp.ge.f32.partialorder %v494_v41, 0.0 }
  0xc2   : > { %v1376_v43 = vsel %vm531_vm3, %v494_v41, %v548_v42  ;;  %v523_v41 = vpop.f32.mrf.mxu3 }
  0xc3   : > { %1088 = vmatmul.msk.f32.gmra.mxu2 %vm601_vm2, %v1376_v43  ;;  %v580_v39 = vadd.f32 %v572_v38, %v1376_v43 }
  0xc5   : > { %v496_v44 = vpop.f32.mrf.mxu0  ;;  %v588_v42 = vmul.f32 0.5, %v580_v39 }
  0xc6   : > { %v497_v45 = vadd.f32 %v1349_v29, %v496_v44  ;;  %v573_v44 = vsel %vm540_vm1, %v521_v36, %v557_v40  ;;  %v1493_v36 = vstv %s1058_s21 }
  0xc8   : > { %v549_v46 = vmul.f32 %v1355_v33, %v497_v45  ;;  %vm532_vm4 = vcmp.ge.f32.partialorder %v497_v45, 0.0 }
  0xca   : > { %v1382_v47 = vsel %vm532_vm4, %v497_v45, %v549_v46 }
  0xcb   : > { %1089 = vmatmul.msk.f32.gmra.mxu2 %vm601_vm2, %v1382_v47  ;;  %v581_v45 = vadd.f32 %v573_v44, %v1382_v47  ;;  %v814_v47 = vld [vmem:[%s1572_s8 + $0x18] sm:$0xff] }
  0xcd   : > { %v499_v48 = vpop.f32.mrf.mxu0  ;;  %v589_v43 = vmul.f32 0.5, %v581_v45 }
  0xce   : > { %v500_v49 = vadd.f32 %v1349_v29, %v499_v48 }
  0xd0   : > { %v550_v50 = vmul.f32 %v1355_v33, %v500_v49  ;;  %vm533_vm5 = vcmp.ge.f32.partialorder %v500_v49, 0.0 }
  0xd2   : > { %v1389_v52 = vsel %vm533_vm5, %v500_v49, %v550_v50 }
  0xd3   : > { %1090 = vmatmul.msk.f32.gmra.mxu2 %vm601_vm2, %v1389_v52 }
  0xd5   : > { %v502_v53 = vpop.f32.mrf.mxu0 }
  0xd6   : > { %v503_v55 = vadd.f32 %v1349_v29, %v502_v53  ;;  %v811_v53 = vld [vmem:[%s1572_s8] sm:$0xff] }
  0xd8   : > { %v551_v56 = vmul.f32 %v1355_v33, %v503_v55  ;;  %vm534_vm7 = vcmp.ge.f32.partialorder %v503_v55, 0.0 }
  0xda   : > { %v567_v59 = vsel %vm534_vm7, %v503_v55, %v551_v56  ;;  %v675_v56 = vstv %s1057_s18 }
  0xdb   : > { %v575_v60 = vadd.f32 %v567_v59, %v1397_v58  ;;  %1091 = vmatmul.msk.f32.gmra.mxu2 %vm601_vm2, %v567_v59 }
  0xdd   : > { %v583_v61 = vmul.f32 0.5, %v575_v60  ;;  %v505_v62 = vpop.f32.mrf.mxu0 }
  0xde   : > { %v506_v0 = vadd.f32 %v1349_v29, %v505_v62 }
  0xdf   : > { %1075 = vmatmul.msk.f32.vlgmr.msra.gmra.mxu1 %vm601_vm2, %v583_v61 }
  0xe0   : > { %v552_v1 = vmul.f32 %v1355_v33, %v506_v0  ;;  %vm535_vm9 = vcmp.ge.f32.partialorder %v506_v0, 0.0 }
  0xe2   : > { %v568_v4 = vsel %vm535_vm9, %v506_v0, %v552_v1 }
  0xe3   : > { %v576_v5 = vadd.f32 %v568_v4, %v1407_v3  ;;  %1092 = vmatmul.msk.f32.gmra.mxu2 %vm601_vm2, %v568_v4 }
  0xe5   : > { %v584_v6 = vmul.f32 0.5, %v576_v5  ;;  %v508_v7 = vpop.f32.mrf.mxu0 }
  0xe6   : > { %v509_v9 = vadd.f32 %v1349_v29, %v508_v7 }
  0xe7   : > { %1076 = vmatmul.msk.f32.gmra.mxu1 %vm601_vm2, %v584_v6 }
  0xe8   : > { %v553_v10 = vmul.f32 %v1355_v33, %v509_v9  ;;  %vm536_vm11 = vcmp.ge.f32.partialorder %v509_v9, 0.0 }
  0xea   : > { %v569_v13 = vsel %vm536_vm11, %v509_v9, %v553_v10 }
  0xeb   : > { %v577_v14 = vadd.f32 %v569_v13, %v561_v12  ;;  %1093 = vmatmul.msk.f32.gmra.mxu2 %vm601_vm2, %v569_v13 }
  0xed   : > { %v585_v15 = vmul.f32 0.5, %v577_v14  ;;  %v511_v16 = vpop.f32.mrf.mxu0 }
  0xee   : > { %v512_v18 = vadd.f32 %v1349_v29, %v511_v16 }
  0xef   : > { %1077 = vmatmul.msk.f32.gmra.mxu1 %vm601_vm2, %v585_v15 }
  0xf0   : > { %v554_v20 = vmul.f32 %v1355_v33, %v512_v18  ;;  %vm537_vm13 = vcmp.ge.f32.partialorder %v512_v18, 0.0 }
  0xf2   : > { %v570_v22 = vsel %vm537_vm13, %v512_v18, %v554_v20 }
  0xf3   : > { %v578_v23 = vadd.f32 %v570_v22, %v562_v21  ;;  %1094 = vmatmul.msk.f32.gmra.mxu2 %vm601_vm2, %v570_v22 }
  0xf5   : > { %v586_v24 = vmul.f32 0.5, %v578_v23  ;;  %v514_v25 = vpop.f32.mrf.mxu0 }
  0xf6   : > { %v515_v27 = vadd.f32 %v1349_v29, %v514_v25 }
  0xf7   : > { %1078 = vmatmul.msk.f32.gmra.mxu1 %vm601_vm2, %v586_v24 }
  0xf8   : > { %v555_v28 = vmul.f32 %v1355_v33, %v515_v27  ;;  %vm538_vm14 = vcmp.ge.f32.partialorder %v515_v27, 0.0 }
  0xfa   : > { %v571_v32 = vsel %vm538_vm14, %v515_v27, %v555_v28 }
  0xfb   : > { %v579_v34 = vadd.f32 %v571_v32, %v1364_v37  ;;  %1095 = vmatmul.msk.f32.gmra.mxu2 %vm601_vm2, %v571_v32  ;;  %v524_v37 = vadd.f32 %v1349_v29, %v523_v41  ;;  %v816_v29 = vld [vmem:[%s1572_s8 + $0x28] sm:$0xff] }
  0xfc   : > { %855 = vmatpush.msrb.mxu3 %v816_v29 }
  0xfd   : > { %v587_v35 = vmul.f32 0.5, %v579_v34  ;;  %v558_v46 = vmul.f32 %v1355_v33, %v524_v37  ;;  %vm541_vm3 = vcmp.ge.f32.partialorder %v524_v37, 0.0  ;;  %v815_v33 = vld [vmem:[%s1572_s8 + $0x20] sm:$0xff] }
  0xfe   : > { %856 = vmatpush.msrb.mxu3 %v815_v33 }
  0xff   : > { %1079 = vmatmul.msk.f32.gmra.mxu1 %vm601_vm2, %v587_v35  ;;  %v574_v48 = vsel %vm541_vm3, %v524_v37, %v558_v46 }
 0x100   : > { %v582_v49 = vadd.f32 %v574_v48, %v1389_v52  ;;  %857 = vmatpush.msrb.mxu3 %v814_v47  ;;  %v812_v52 = vld [vmem:[%s1572_s8 + $0x8] sm:$0xff] }
 0x102   : > { %v590_v50 = vmul.f32 0.5, %v582_v49  ;;  %858 = vmatpush.msrb.mxu3 %v813_v51 }
 0x103   : > { %1096 = vmatmul.msk.f32.gmra.mxu2 %vm601_vm2, %v572_v38 }
 0x104   : > { %859 = vmatpush.msrb.mxu3 %v812_v52 }
 0x106   : > { %860 = vmatpush.msrb.mxu3 %v811_v53 }
 0x107   : > { %1080 = vmatmul.msk.f32.gmra.mxu1 %vm601_vm2, %v588_v42 }
 0x10b   : > { %1097 = vmatmul.msk.f32.gmra.mxu2 %vm601_vm2, %v573_v44 }
 0x10f   : > { %1081 = vmatmul.msk.f32.gmra.mxu1 %vm601_vm2, %v589_v43 }
 0x113   : > { %1098 = vmatmul.msk.f32.gmra.mxu2 %vm601_vm2, %v574_v48 }
 0x117   : > { %1082 = vmatmul.msk.f32.gmra.mxu1 %vm601_vm2, %v590_v50 }
 0x11f   : > { %1083 = vmatmul.msk.f32.vlgmr.msrb.gmra.mxu1 %vm601_vm2, %v1397_v58 }
 0x127   : > { %1084 = vmatmul.msk.f32.gmra.mxu1 %vm601_vm2, %v1407_v3 }
 0x12f   : > { %1085 = vmatmul.msk.f32.gmra.mxu1 %vm601_vm2, %v561_v12 }
 0x137   : > { %1086 = vmatmul.msk.f32.gmra.mxu1 %vm601_vm2, %v562_v21 }
 0x13e   : > { %v1479_v24 = vpop.f32.mrf.mxu2 }
 0x146   : > { %v1481_v25 = vpop.f32.mrf.mxu2 }
 0x14e   : > { %v1483_v26 = vpop.f32.mrf.mxu2 }
 0x156   : > { %v1485_v27 = vpop.f32.mrf.mxu2 }
 0x15c   : > { %v643_v55 = vpop.f32.mrf.mxu1 }
 0x15d   : > { %v644_v57 = vadd.f32 %v1149_v54, %v643_v55 }
 0x15e   : > { %v787_v28 = vpop.f32.mrf.mxu2 }
 0x15f   : > { %vm667_vm4 = vcmp.ge.f32.partialorder %v644_v57, 0.0  ;;  %v676_v58 = vmul.f32 %v675_v56, %v644_v57 }
 0x161   : > { %v684_v59 = vsel %vm667_vm4, %v644_v57, %v676_v58 }
 0x162   : > { %1099 = vmatmul.msk.f32.vlgmr.msrb.gmra.mxu3 %vm601_vm2, %v684_v59 }
 0x164   : > { %v646_v60 = vpop.f32.mrf.mxu1 }
 0x165   : > { %v647_v61 = vadd.f32 %v1149_v54, %v646_v60 }
 0x166   : > { %v790_v32 = vpop.f32.mrf.mxu2 }
 0x167   : > { %v677_v62 = vmul.f32 %v675_v56, %v647_v61  ;;  %vm668_vm5 = vcmp.ge.f32.partialorder %v647_v61, 0.0 }
 0x169   : > { %v685_v63 = vsel %vm668_vm5, %v647_v61, %v677_v62 }
 0x16a   : > { %1100 = vmatmul.msk.f32.gmra.mxu3 %vm601_vm2, %v685_v63 }
 0x16c   : > { %v649_v0 = vpop.f32.mrf.mxu1 }
 0x16d   : > { %v650_v1 = vadd.f32 %v1149_v54, %v649_v0 }
 0x16e   : > { %v793_v45 = vpop.f32.mrf.mxu2 }
 0x16f   : > { %v678_v2 = vmul.f32 %v675_v56, %v650_v1  ;;  %vm669_vm6 = vcmp.ge.f32.partialorder %v650_v1, 0.0 }
 0x171   : > { %v686_v3 = vsel %vm669_vm6, %v650_v1, %v678_v2 }
 0x172   : > { %1101 = vmatmul.msk.f32.gmra.mxu3 %vm601_vm2, %v686_v3 }
 0x174   : > { %v652_v4 = vpop.f32.mrf.mxu1 }
 0x175   : > { %v653_v5 = vadd.f32 %v1149_v54, %v652_v4 }
 0x177   : > { %v679_v6 = vmul.f32 %v675_v56, %v653_v5  ;;  %vm670_vm7 = vcmp.ge.f32.partialorder %v653_v5, 0.0 }
 0x179   : > { %v687_v7 = vsel %vm670_vm7, %v653_v5, %v679_v6 }
 0x17a   : > { %1102 = vmatmul.msk.f32.gmra.mxu3 %vm601_vm2, %v687_v7 }
 0x17c   : > { %v655_v8 = vpop.f32.mrf.mxu1 }
 0x17d   : > { %v656_v9 = vadd.f32 %v1149_v54, %v655_v8 }
 0x17f   : > { %v680_v10 = vmul.f32 %v675_v56, %v656_v9  ;;  %vm671_vm8 = vcmp.ge.f32.partialorder %v656_v9, 0.0 }
 0x181   : > { %v688_v11 = vsel %vm671_vm8, %v656_v9, %v680_v10 }
 0x182   : > { %1103 = vmatmul.msk.f32.gmra.mxu3 %vm601_vm2, %v688_v11 }
 0x184   : > { %v658_v12 = vpop.f32.mrf.mxu1 }
 0x185   : > { %v659_v13 = vadd.f32 %v1149_v54, %v658_v12 }
 0x187   : > { %v681_v14 = vmul.f32 %v675_v56, %v659_v13  ;;  %vm672_vm9 = vcmp.ge.f32.partialorder %v659_v13, 0.0 }
 0x189   : > { %v689_v15 = vsel %vm672_vm9, %v659_v13, %v681_v14 }
 0x18a   : > { %1104 = vmatmul.msk.f32.gmra.mxu3 %vm601_vm2, %v689_v15 }
 0x18c   : > { %v661_v16 = vpop.f32.mrf.mxu1 }
 0x18d   : > { %v662_v17 = vadd.f32 %v1149_v54, %v661_v16 }
 0x18f   : > { %v682_v18 = vmul.f32 %v675_v56, %v662_v17  ;;  %vm673_vm10 = vcmp.ge.f32.partialorder %v662_v17, 0.0 }
 0x191   : > { %v690_v19 = vsel %vm673_vm10, %v662_v17, %v682_v18 }
 0x192   : > { %1105 = vmatmul.msk.f32.gmra.mxu3 %vm601_vm2, %v690_v19 }
 0x194   : > { %v664_v20 = vpop.f32.mrf.mxu1 }
 0x195   : > { %v665_v21 = vadd.f32 %v1149_v54, %v664_v20  ;;  %v796_v54 = vpop.f32.mrf.mxu2 }
 0x197   : > { %v683_v22 = vmul.f32 %v675_v56, %v665_v21  ;;  %vm674_vm11 = vcmp.ge.f32.partialorder %v665_v21, 0.0 }
 0x199   : > { %v691_v23 = vsel %vm674_vm11, %v665_v21, %v683_v22 }
 0x19a   : > { %1106 = vmatmul.msk.f32.gmra.mxu3 %vm601_vm2, %v691_v23 }
 0x19c   : > { %v763_v30 = vpop.f32.mrf.mxu1 }
 0x19d   : > { %v799_v2 = vpop.f32.mrf.mxu2 }
 0x1a4   : > { %v766_v42 = vpop.f32.mrf.mxu1 }
 0x1a5   : > { %v802_v13 = vpop.f32.mrf.mxu2 }
 0x1ac   : > { %v769_v51 = vpop.f32.mrf.mxu1 }
 0x1b4   : > { %v772_v63 = vpop.f32.mrf.mxu1 }
 0x1e5   : > { %v862_v34 = vpop.f32.mrf.mxu3 }
 0x1e6   : > { %v863_v35 = vadd.f32 %v1490_v31, %v862_v34 }
 0x1e8   : > { %v886_v38 = vadd.f32 %v863_v35, %v763_v30  ;;  %v927_v39 = vadd.f32 %v863_v35, %v787_v28 }
 0x1ea   : > { %vm894_vm2 = vcmp.ge.f32.partialorder %v886_v38, 0.0  ;;  %v903_v40 = vmul.f32 %v1493_v36, %v886_v38  ;;  %vm935_vm12 = vcmp.ge.f32.partialorder %v927_v39, 0.0  ;;  %v943_v41 = vmul.f32 %v927_v39, %v1493_v36 }
 0x1ec   : > { %v911_v37 = vsel %vm894_vm2, %v886_v38, %v903_v40  ;;  %v951_v44 = vsel %vm935_vm12, %v927_v39, %v943_v41 }
 0x1ed   : > { %919 = vst.msk [vmem:[%s1500_s26] sm:$0xff] %vm412_vm0, %v911_v37  ;;  %v865_v46 = vpop.f32.mrf.mxu3 }
 0x1ee   : > { %959 = vst.msk [vmem:[%s1500_s26 + $0x40] sm:$0xff] %vm412_vm0, %v951_v44  ;;  %v866_v43 = vadd.f32 %v1490_v31, %v865_v46 }
 0x1f0   : > { %v887_v48 = vadd.f32 %v866_v43, %v766_v42  ;;  %v928_v49 = vadd.f32 %v866_v43, %v790_v32 }
 0x1f2   : > { %vm895_vm13 = vcmp.ge.f32.partialorder %v887_v48, 0.0  ;;  %v904_v50 = vmul.f32 %v1493_v36, %v887_v48  ;;  %vm936_vm14 = vcmp.ge.f32.partialorder %v928_v49, 0.0  ;;  %v944_v29 = vmul.f32 %v928_v49, %v1493_v36 }
 0x1f4   : > { %v912_v33 = vsel %vm895_vm13, %v887_v48, %v904_v50  ;;  %v952_v47 = vsel %vm936_vm14, %v928_v49, %v944_v29 }
 0x1f5   : > { %920 = vst.msk [vmem:[%s1500_s26 + $0x8] sm:$0xff] %vm412_vm0, %v912_v33  ;;  %v868_v52 = vpop.f32.mrf.mxu3 }
 0x1f6   : > { %960 = vst.msk [vmem:[%s1500_s26 + $0x48] sm:$0xff] %vm412_vm0, %v952_v47  ;;  %v869_v53 = vadd.f32 %v1490_v31, %v868_v52 }
 0x1f8   : > { %v888_v55 = vadd.f32 %v869_v53, %v769_v51  ;;  %v929_v56 = vadd.f32 %v869_v53, %v793_v45 }
 0x1fa   : > { %vm896_vm15 = vcmp.ge.f32.partialorder %v888_v55, 0.0  ;;  %v905_v57 = vmul.f32 %v1493_v36, %v888_v55  ;;  %vm937_vm1 = vcmp.ge.f32.partialorder %v929_v56, 0.0  ;;  %v945_v58 = vmul.f32 %v929_v56, %v1493_v36 }
 0x1fc   : > { %v913_v59 = vsel %vm896_vm15, %v888_v55, %v905_v57  ;;  %v953_v60 = vsel %vm937_vm1, %v929_v56, %v945_v58 }
 0x1fd   : > { %921 = vst.msk [vmem:[%s1500_s26 + $0x10] sm:$0xff] %vm412_vm0, %v913_v59  ;;  %v871_v61 = vpop.f32.mrf.mxu3 }
 0x1fe   : > { %961 = vst.msk [vmem:[%s1500_s26 + $0x50] sm:$0xff] %vm412_vm0, %v953_v60  ;;  %v872_v62 = vadd.f32 %v1490_v31, %v871_v61 }
 0x200   : > { %v889_v0 = vadd.f32 %v872_v62, %v772_v63  ;;  %v930_v1 = vadd.f32 %v872_v62, %v796_v54 }
 0x202   : > { %vm897_vm3 = vcmp.ge.f32.partialorder %v889_v0, 0.0  ;;  %v906_v3 = vmul.f32 %v1493_v36, %v889_v0  ;;  %vm938_vm4 = vcmp.ge.f32.partialorder %v930_v1, 0.0  ;;  %v946_v4 = vmul.f32 %v930_v1, %v1493_v36 }
 0x204   : > { %v914_v5 = vsel %vm897_vm3, %v889_v0, %v906_v3  ;;  %v954_v6 = vsel %vm938_vm4, %v930_v1, %v946_v4 }
 0x205   : > { %922 = vst.msk [vmem:[%s1500_s26 + $0x18] sm:$0xff] %vm412_vm0, %v914_v5  ;;  %v874_v7 = vpop.f32.mrf.mxu3 }
 0x206   : > { %962 = vst.msk [vmem:[%s1500_s26 + $0x58] sm:$0xff] %vm412_vm0, %v954_v6  ;;  %v875_v8 = vadd.f32 %v1490_v31, %v874_v7 }
 0x208   : > { %v890_v9 = vadd.f32 %v875_v8, %v1479_v24  ;;  %v931_v10 = vadd.f32 %v875_v8, %v799_v2  ;;  %v805_v24 = vpop.f32.mrf.mxu2 }
 0x20a   : > { %vm898_vm5 = vcmp.ge.f32.partialorder %v890_v9, 0.0  ;;  %v907_v11 = vmul.f32 %v1493_v36, %v890_v9  ;;  %vm939_vm6 = vcmp.ge.f32.partialorder %v931_v10, 0.0  ;;  %v947_v12 = vmul.f32 %v931_v10, %v1493_v36 }
 0x20c   : > { %v915_v14 = vsel %vm898_vm5, %v890_v9, %v907_v11  ;;  %v955_v15 = vsel %vm939_vm6, %v931_v10, %v947_v12 }
 0x20d   : > { %923 = vst.msk [vmem:[%s1500_s26 + $0x20] sm:$0xff] %vm412_vm0, %v915_v14  ;;  %v877_v16 = vpop.f32.mrf.mxu3 }
 0x20e   : > { %963 = vst.msk [vmem:[%s1500_s26 + $0x60] sm:$0xff] %vm412_vm0, %v955_v15  ;;  %v878_v17 = vadd.f32 %v1490_v31, %v877_v16 }
 0x210   : > { %v891_v18 = vadd.f32 %v878_v17, %v1481_v25  ;;  %v932_v19 = vadd.f32 %v878_v17, %v802_v13  ;;  %v808_v42 = vpop.f32.mrf.mxu2 }
 0x212   : > { %vm899_vm7 = vcmp.ge.f32.partialorder %v891_v18, 0.0  ;;  %v908_v20 = vmul.f32 %v1493_v36, %v891_v18  ;;  %vm940_vm8 = vcmp.ge.f32.partialorder %v932_v19, 0.0  ;;  %v948_v21 = vmul.f32 %v932_v19, %v1493_v36 }
 0x214   : > { %v916_v22 = vsel %vm899_vm7, %v891_v18, %v908_v20  ;;  %v956_v23 = vsel %vm940_vm8, %v932_v19, %v948_v21 }
 0x215   : > { %924 = vst.msk [vmem:[%s1500_s26 + $0x28] sm:$0xff] %vm412_vm0, %v916_v22  ;;  %v880_v28 = vpop.f32.mrf.mxu3 }
 0x216   : > { %964 = vst.msk [vmem:[%s1500_s26 + $0x68] sm:$0xff] %vm412_vm0, %v956_v23  ;;  %v881_v30 = vadd.f32 %v1490_v31, %v880_v28 }
 0x218   : > { %v892_v25 = vadd.f32 %v881_v30, %v1483_v26  ;;  %v933_v32 = vadd.f32 %v881_v30, %v805_v24 }
 0x21a   : > { %vm900_vm9 = vcmp.ge.f32.partialorder %v892_v25, 0.0  ;;  %v909_v34 = vmul.f32 %v1493_v36, %v892_v25  ;;  %vm941_vm10 = vcmp.ge.f32.partialorder %v933_v32, 0.0  ;;  %v949_v35 = vmul.f32 %v933_v32, %v1493_v36 }
 0x21c   : > { %v917_v38 = vsel %vm900_vm9, %v892_v25, %v909_v34  ;;  %v957_v39 = vsel %vm941_vm10, %v933_v32, %v949_v35 }
 0x21d   : > { %925 = vst.msk [vmem:[%s1500_s26 + $0x30] sm:$0xff] %vm412_vm0, %v917_v38  ;;  %v883_v40 = vpop.f32.mrf.mxu3 }
 0x21e   : > { %965 = vst.msk [vmem:[%s1500_s26 + $0x70] sm:$0xff] %vm412_vm0, %v957_v39  ;;  %v884_v41 = vadd.f32 %v1490_v31, %v883_v40 }
 0x220   : > { %v893_v26 = vadd.f32 %v884_v41, %v1485_v27  ;;  %v934_v37 = vadd.f32 %v884_v41, %v808_v42 }
 0x222   : > { %vm901_vm11 = vcmp.ge.f32.partialorder %v893_v26, 0.0  ;;  %v910_v44 = vmul.f32 %v1493_v36, %v893_v26  ;;  %vm942_vm2 = vcmp.ge.f32.partialorder %v934_v37, 0.0  ;;  %v950_v45 = vmul.f32 %v934_v37, %v1493_v36 }
 0x224   : > { %v918_v46 = vsel %vm901_vm11, %v893_v26, %v910_v44  ;;  %v958_v43 = vsel %vm942_vm2, %v934_v37, %v950_v45 }
 0x225   : > { %926 = vst.msk [vmem:[%s1500_s26 + $0x38] sm:$0xff] %vm412_vm0, %v918_v46 }
 0x226   : > { %966 = vst.msk [vmem:[%s1500_s26 + $0x78] sm:$0xff] %vm412_vm0, %v958_v43 }
 0x227 PF: > { %s22_s13 = sadd.s32 1, %s1195_s13  }
 0x228   : > { %p19_p7 = scmp.ge.s32.totalorder %s22_s13, 4  }
 0x22a   :  { %21 = sbr.rel (!%p19_p7) target bundleno = 2 (0x2), region = 99 }
 0x22f   :  { %988 = vsyncpa [#allocation3], 1 }
 0x230   :  { %990 = vsyncpa [#allocation3 + $0x1], 1 }
 0x231   :  { %991 = vsyncpa [#allocation5], 1 }

</bundles_post_ra>
